<compile_context>
chip_gen: v7x
topology: tpu7x:2x2x1
jax: 0.10.0
libtpu: 0.0.40
codegen_flags: <defaults>
</compile_context>

<pallas_src>
import functools

import jax
import jax.numpy as jnp
from jax.experimental import pallas as pl
from jax.experimental.pallas import tpu as pltpu

IN_CHANNELS = 4
OUT_CHANNELS = 24          # 16 + 4 + 4
KSIZE = 7                  # largest branch kernel; 3x3 / 5x5 are zero-padded into it
MAX_PAD = 3                # spatial padding of the 7x7 branch
BN_EPS = 1e-5
SUBLANE = 8                # f32 sublane tile; Cin is zero-padded up to a multiple of this


def _round_up(x, m):
    return (x + m - 1) // m * m


def _conv_stats_kernel(xf_ref, w_ref, mask_ref, conv_ref, stats_ref, p_ref,
                       *, cin_pad, wp, q):
    """Per-batch fused conv (all 3 branches) + BatchNorm partial statistics.

    xf_ref:    [1, cin_pad, Lp]  flattened, spatially pre-padded input (channels padded to 8)
    w_ref:     [24, K]           fused im2col weight, K = 49*cin_pad, column order (dy, dx, ci)
    mask_ref:  [1, q]            1.0 where the flat output column is a valid (h, w) position
    conv_ref:  [1, 24, q]        pre-BN conv output on the padded-width grid (lane dense)
    stats_ref: [1, 48, 1]        per-batch [sum(0:24); sum-of-squares(24:48)] over valid cols
    p_ref:     [K, q]            VMEM scratch: im2col matrix
    """
    # Build the im2col matrix: each tap's row block is a contiguous lane-shifted slice of
    # the flattened input; with cin_pad == 8 every write is a full (8, 128)-tile store.
    for dy in range(KSIZE):
        for dx in range(KSIZE):
            tap = dy * KSIZE + dx
            s = dy * wp + dx
            p_ref[tap * cin_pad:(tap + 1) * cin_pad, :] = xf_ref[0, :, s:s + q]

    # One MXU matmul realizes all three branches plus the channel concat (via the fused
    # zero-padded weight layout).  f32 accumulation.
    out = jnp.dot(w_ref[...], p_ref[...], preferred_element_type=jnp.float32)
    conv_ref[0] = out

    # One-pass BN partial stats with a single fused cross-lane reduction (keeps the XLU
    # epilogue off the critical path).
    masked = out * mask_ref[...]                                    # [24, Q]
    stacked = jnp.concatenate([masked, masked * out], axis=0)       # [48, Q]
    stats_ref[0] = jnp.sum(stacked, axis=1, keepdims=True)          # [48, 1]


def _bn_crop_kernel(conv_ref, ss_ref, y_ref, *, wp, h, w):
    """Fused BN apply + padded-width crop: y[n,c,h,w] = conv[n,c,h*wp+w]*scale[c]+shift[c]."""
    bn = conv_ref[0] * ss_ref[:, 0:1] + ss_ref[:, 1:2]              # lane-dense [24, Q]
    for row in range(h):                                            # static, unrolled
        y_ref[0, :, row, :] = bn[:, row * wp:row * wp + w]


@jax.jit
def inception_x(x_nchw, w3, w5, w7, gamma, beta):
    """x_nchw: [N, Cin, H, W] f32.  w3/w5/w7: OIHW conv weights.  Returns [N, 24, H, W]."""
    N, Cin, H, W = x_nchw.shape
    cin_pad = _round_up(Cin, SUBLANE)
    Hp, Wp = H + 2 * MAX_PAD, W + 2 * MAX_PAD
    K = KSIZE * KSIZE * cin_pad

    # Lane-dense number of output columns on the padded-width grid.
    Q = _round_up(H * Wp, 128)
    shift_max = (KSIZE - 1) * Wp + (KSIZE - 1)
    Lp = _round_up(Q + shift_max, 128)

    # ---------- host-side (XLA) prep: pure layout work on tiny arrays ----------
    # Input: spatial zero-pad by 3, channel zero-pad to 8, flatten (Hp, Wp), zero tail.
    xp = jnp.pad(x_nchw, ((0, 0), (0, cin_pad - Cin),
                          (MAX_PAD, MAX_PAD), (MAX_PAD, MAX_PAD)))
    xf = xp.reshape(N, cin_pad, Hp * Wp)
    xf = jnp.pad(xf, ((0, 0), (0, 0), (0, Lp - Hp * Wp)))

    # Weights: zero-pad 3x3 / 5x5 spatially into 7x7 (equivalent to their "same" padding),
    # concat along out-channels, zero-pad Cin, reorder columns to im2col order (dy, dx, ci).
    w3p = jnp.pad(w3, ((0, 0), (0, 0), (2, 2), (2, 2)))
    w5p = jnp.pad(w5, ((0, 0), (0, 0), (1, 1), (1, 1)))
    wfull = jnp.concatenate([w3p, w5p, w7], axis=0)                     # [24, Cin, 7, 7]
    wfull = jnp.pad(wfull, ((0, 0), (0, cin_pad - Cin), (0, 0), (0, 0)))
    wmat = jnp.transpose(wfull, (0, 2, 3, 1)).reshape(OUT_CHANNELS, K)  # [24, K]

    # Valid-position mask for the padded-width output grid.
    qidx = jnp.arange(Q)
    vmask = (((qidx % Wp) < W) & (qidx < H * Wp)).astype(jnp.float32)[None, :]

    # ---------- kernel 1: fused conv + per-batch BN partial stats ----------
    conv_kernel = functools.partial(_conv_stats_kernel, cin_pad=cin_pad, wp=Wp, q=Q)
    conv_full, stats = pl.pallas_call(
        conv_kernel,
        out_shape=(jax.ShapeDtypeStruct((N, OUT_CHANNELS, Q), jnp.float32),
                   jax.ShapeDtypeStruct((N, 2 * OUT_CHANNELS, 1), jnp.float32)),
        grid=(N,),
        in_specs=[pl.BlockSpec((1, cin_pad, Lp), lambda n: (n, 0, 0)),
                  pl.BlockSpec((OUT_CHANNELS, K), lambda n: (0, 0)),
                  pl.BlockSpec((1, Q), lambda n: (0, 0))],
        out_specs=(pl.BlockSpec((1, OUT_CHANNELS, Q), lambda n: (n, 0, 0)),
                   pl.BlockSpec((1, 2 * OUT_CHANNELS, 1), lambda n: (n, 0, 0))),
        scratch_shapes=[pltpu.VMEM((K, Q), jnp.float32)],
        compiler_params=pltpu.CompilerParams(dimension_semantics=("parallel",)),
    )(xf, wmat, vmask)

    # Combine the tiny per-batch partials -> global training-mode BN scale/shift (96 numbers).
    count = jnp.float32(N * H * W)
    s = jnp.sum(stats[:, :, 0], axis=0)                 # [48]
    mean = s[:OUT_CHANNELS] / count
    var = s[OUT_CHANNELS:] / count - mean * mean        # biased variance (torch training mode)
    inv_std = jax.lax.rsqrt(var + BN_EPS)
    scale = gamma * inv_std
    shift = beta - mean * scale
    ss = jnp.stack([scale, shift], axis=1)              # [24, 2]

    # ---------- kernel 2: fused BN apply + padded-width crop (single HBM pass) ----------
    bn_kernel = functools.partial(_bn_crop_kernel, wp=Wp, h=H, w=W)
    y = pl.pallas_call(
        bn_kernel,
        out_shape=jax.ShapeDtypeStruct((N, OUT_CHANNELS, H, W), jnp.float32),
        grid=(N,),
        in_specs=[pl.BlockSpec((1, OUT_CHANNELS, Q), lambda n: (n, 0, 0)),
                  pl.BlockSpec((OUT_CHANNELS, 2), lambda n: (0, 0))],
        out_specs=pl.BlockSpec((1, OUT_CHANNELS, H, W), lambda n: (n, 0, 0, 0)),
        compiler_params=pltpu.CompilerParams(dimension_semantics=("parallel",)),
    )(conv_full, ss)
    return y


def _reference(x, w3, w5, w7, gamma, beta):
    """Pure-JAX reference: three NCHW convs + concat + training-mode BatchNorm."""
    def conv(w, pad):
        return jax.lax.conv_general_dilated(
            x, w, window_strides=(1, 1), padding=[(pad, pad), (pad, pad)],
            dimension_numbers=("NCHW", "OIHW", "NCHW"),
            precision=jax.lax.Precision.HIGHEST)

    out = jnp.concatenate([conv(w3, 1), conv(w5, 2), conv(w7, 3)], axis=1)  # [N, 24, H, W]
    mean = jnp.mean(out, axis=(0, 2, 3), keepdims=True)
    var = jnp.mean((out - mean) ** 2, axis=(0, 2, 3), keepdims=True)
    norm = (out - mean) * jax.lax.rsqrt(var + BN_EPS)
    return norm * gamma.reshape(1, -1, 1, 1) + beta.reshape(1, -1, 1, 1)


if __name__ == "__main__":
    key = jax.random.PRNGKey(0)
    k_x, k3, k5, k7 = jax.random.split(key, 4)

    N, Cin, H, W = 2, IN_CHANNELS, 16, 16
    x = jax.random.normal(k_x, (N, Cin, H, W), jnp.float32)

    # Conv weights in torch OIHW layout (bias-free branches).
    w3 = 0.1 * jax.random.normal(k3, (16, Cin, 3, 3), jnp.float32)
    w5 = 0.1 * jax.random.normal(k5, (4, Cin, 5, 5), jnp.float32)
    w7 = 0.1 * jax.random.normal(k7, (4, Cin, 7, 7), jnp.float32)

    # BatchNorm affine params (torch default init: weight=1, bias=0).
    gamma = jnp.ones((OUT_CHANNELS,), jnp.float32)
    beta = jnp.zeros((OUT_CHANNELS,), jnp.float32)

    out = jax.block_until_ready(inception_x(x, w3, w5, w7, gamma, beta))
    assert out.shape == (N, OUT_CHANNELS, H, W), out.shape

    ref = _reference(x, w3, w5, w7, gamma, beta)
    max_err = float(jnp.max(jnp.abs(out - ref)))
    assert jnp.allclose(out, ref, rtol=2e-3, atol=2e-3), max_err

    print("KERNEL_OK")
</pallas_src>

<mosaic_0001>
module attributes {stable_mosaic.version = 11 : i64} {
  func.func @_conv_stats_kernel(%arg0: i32, %arg1: memref<1x8x640xf32, #tpu.memory_space<vmem>>, %arg2: memref<24x392xf32, #tpu.memory_space<vmem>>, %arg3: memref<1x384xf32, #tpu.memory_space<vmem>>, %arg4: memref<1x24x384xf32, #tpu.memory_space<vmem>>, %arg5: memref<1x48x1xf32, #tpu.memory_space<vmem>>, %arg6: memref<392x384xf32, #tpu.memory_space<vmem>>) attributes {dimension_semantics = [#tpu.dimension_semantics<parallel>], iteration_bounds = array<i64: 2>, scalar_prefetch = 0 : i64, scratch_operands = 1 : i64, tpu.core_type = #tpu.core_type<tc>, window_params = [{transform_indices = @transform_0, window_bounds = array<i64: 1, 8, 640>}, {pipeline_mode = #tpu.pipeline_mode<synchronous>, transform_indices = @transform_1, window_bounds = array<i64: 24, 392>}, {pipeline_mode = #tpu.pipeline_mode<synchronous>, transform_indices = @transform_2, window_bounds = array<i64: 1, 384>}, {transform_indices = @transform_3, window_bounds = array<i64: 1, 24, 384>}, {transform_indices = @transform_4, window_bounds = array<i64: 1, 48, 1>}]} {
    %c0 = arith.constant 0 : index
    %c0_0 = arith.constant 0 : index
    %c0_1 = arith.constant 0 : index
    %0 = vector.load %arg1[%c0, %c0_0, %c0_1] : memref<1x8x640xf32, #tpu.memory_space<vmem>>, vector<1x8x384xf32>
    %1 = vector.shape_cast %0 : vector<1x8x384xf32> to vector<8x384xf32>
    %c0_2 = arith.constant 0 : index
    %c0_3 = arith.constant 0 : index
    %2 = vector.load %arg6[%c0_2, %c0_3] : memref<392x384xf32, #tpu.memory_space<vmem>>, vector<8x384xf32>
    tpu.vector_store %arg6[%c0_2, %c0_3], %1 {strides = array<i32>} : memref<392x384xf32, #tpu.memory_space<vmem>>, vector<8x384xf32>,
    %c0_4 = arith.constant 0 : index
    %c0_5 = arith.constant 0 : index
    %c1 = arith.constant 1 : index
    %3 = vector.load %arg1[%c0_4, %c0_5, %c1] : memref<1x8x640xf32, #tpu.memory_space<vmem>>, vector<1x8x384xf32>
    %4 = vector.shape_cast %3 : vector<1x8x384xf32> to vector<8x384xf32>
    %c8 = arith.constant 8 : index
    %c0_6 = arith.constant 0 : index
    %5 = vector.load %arg6[%c8, %c0_6] : memref<392x384xf32, #tpu.memory_space<vmem>>, vector<8x384xf32>
    tpu.vector_store %arg6[%c8, %c0_6], %4 {strides = array<i32>} : memref<392x384xf32, #tpu.memory_space<vmem>>, vector<8x384xf32>,
    %c0_7 = arith.constant 0 : index
    %c0_8 = arith.constant 0 : index
    %c2 = arith.constant 2 : index
    %6 = vector.load %arg1[%c0_7, %c0_8, %c2] : memref<1x8x640xf32, #tpu.memory_space<vmem>>, vector<1x8x384xf32>
    %7 = vector.shape_cast %6 : vector<1x8x384xf32> to vector<8x384xf32>
    %c16 = arith.constant 16 : index
    %c0_9 = arith.constant 0 : index
    %8 = vector.load %arg6[%c16, %c0_9] : memref<392x384xf32, #tpu.memory_space<vmem>>, vector<8x384xf32>
    tpu.vector_store %arg6[%c16, %c0_9], %7 {strides = array<i32>} : memref<392x384xf32, #tpu.memory_space<vmem>>, vector<8x384xf32>,
    %c0_10 = arith.constant 0 : index
    %c0_11 = arith.constant 0 : index
    %c3 = arith.constant 3 : index
    %9 = vector.load %arg1[%c0_10, %c0_11, %c3] : memref<1x8x640xf32, #tpu.memory_space<vmem>>, vector<1x8x384xf32>
    %10 = vector.shape_cast %9 : vector<1x8x384xf32> to vector<8x384xf32>
    %c24 = arith.constant 24 : index
    %c0_12 = arith.constant 0 : index
    %11 = vector.load %arg6[%c24, %c0_12] : memref<392x384xf32, #tpu.memory_space<vmem>>, vector<8x384xf32>
    tpu.vector_store %arg6[%c24, %c0_12], %10 {strides = array<i32>} : memref<392x384xf32, #tpu.memory_space<vmem>>, vector<8x384xf32>,
    %c0_13 = arith.constant 0 : index
    %c0_14 = arith.constant 0 : index
    %c4 = arith.constant 4 : index
    %12 = vector.load %arg1[%c0_13, %c0_14, %c4] : memref<1x8x640xf32, #tpu.memory_space<vmem>>, vector<1x8x384xf32>
    %13 = vector.shape_cast %12 : vector<1x8x384xf32> to vector<8x384xf32>
    %c32 = arith.constant 32 : index
    %c0_15 = arith.constant 0 : index
    %14 = vector.load %arg6[%c32, %c0_15] : memref<392x384xf32, #tpu.memory_space<vmem>>, vector<8x384xf32>
    tpu.vector_store %arg6[%c32, %c0_15], %13 {strides = array<i32>} : memref<392x384xf32, #tpu.memory_space<vmem>>, vector<8x384xf32>,
    %c0_16 = arith.constant 0 : index
    %c0_17 = arith.constant 0 : index
    %c5 = arith.constant 5 : index
    %15 = vector.load %arg1[%c0_16, %c0_17, %c5] : memref<1x8x640xf32, #tpu.memory_space<vmem>>, vector<1x8x384xf32>
    %16 = vector.shape_cast %15 : vector<1x8x384xf32> to vector<8x384xf32>
    %c40 = arith.constant 40 : index
    %c0_18 = arith.constant 0 : index
    %17 = vector.load %arg6[%c40, %c0_18] : memref<392x384xf32, #tpu.memory_space<vmem>>, vector<8x384xf32>
    tpu.vector_store %arg6[%c40, %c0_18], %16 {strides = array<i32>} : memref<392x384xf32, #tpu.memory_space<vmem>>, vector<8x384xf32>,
    %c0_19 = arith.constant 0 : index
    %c0_20 = arith.constant 0 : index
    %c6 = arith.constant 6 : index
    %18 = vector.load %arg1[%c0_19, %c0_20, %c6] : memref<1x8x640xf32, #tpu.memory_space<vmem>>, vector<1x8x384xf32>
    %19 = vector.shape_cast %18 : vector<1x8x384xf32> to vector<8x384xf32>
    %c48 = arith.constant 48 : index
    %c0_21 = arith.constant 0 : index
    %20 = vector.load %arg6[%c48, %c0_21] : memref<392x384xf32, #tpu.memory_space<vmem>>, vector<8x384xf32>
    tpu.vector_store %arg6[%c48, %c0_21], %19 {strides = array<i32>} : memref<392x384xf32, #tpu.memory_space<vmem>>, vector<8x384xf32>,
    %c0_22 = arith.constant 0 : index
    %c0_23 = arith.constant 0 : index
    %c22 = arith.constant 22 : index
    %21 = vector.load %arg1[%c0_22, %c0_23, %c22] : memref<1x8x640xf32, #tpu.memory_space<vmem>>, vector<1x8x384xf32>
    %22 = vector.shape_cast %21 : vector<1x8x384xf32> to vector<8x384xf32>
    %c56 = arith.constant 56 : index
    %c0_24 = arith.constant 0 : index
    %23 = vector.load %arg6[%c56, %c0_24] : memref<392x384xf32, #tpu.memory_space<vmem>>, vector<8x384xf32>
    tpu.vector_store %arg6[%c56, %c0_24], %22 {strides = array<i32>} : memref<392x384xf32, #tpu.memory_space<vmem>>, vector<8x384xf32>,
    %c0_25 = arith.constant 0 : index
    %c0_26 = arith.constant 0 : index
    %c23 = arith.constant 23 : index
    %24 = vector.load %arg1[%c0_25, %c0_26, %c23] : memref<1x8x640xf32, #tpu.memory_space<vmem>>, vector<1x8x384xf32>
    %25 = vector.shape_cast %24 : vector<1x8x384xf32> to vector<8x384xf32>
    %c64 = arith.constant 64 : index
    %c0_27 = arith.constant 0 : index
    %26 = vector.load %arg6[%c64, %c0_27] : memref<392x384xf32, #tpu.memory_space<vmem>>, vector<8x384xf32>
    tpu.vector_store %arg6[%c64, %c0_27], %25 {strides = array<i32>} : memref<392x384xf32, #tpu.memory_space<vmem>>, vector<8x384xf32>,
    %c0_28 = arith.constant 0 : index
    %c0_29 = arith.constant 0 : index
    %c24_30 = arith.constant 24 : index
    %27 = vector.load %arg1[%c0_28, %c0_29, %c24_30] : memref<1x8x640xf32, #tpu.memory_space<vmem>>, vector<1x8x384xf32>
    %28 = vector.shape_cast %27 : vector<1x8x384xf32> to vector<8x384xf32>
    %c72 = arith.constant 72 : index
    %c0_31 = arith.constant 0 : index
    %29 = vector.load %arg6[%c72, %c0_31] : memref<392x384xf32, #tpu.memory_space<vmem>>, vector<8x384xf32>
    tpu.vector_store %arg6[%c72, %c0_31], %28 {strides = array<i32>} : memref<392x384xf32, #tpu.memory_space<vmem>>, vector<8x384xf32>,
    %c0_32 = arith.constant 0 : index
    %c0_33 = arith.constant 0 : index
    %c25 = arith.constant 25 : index
    %30 = vector.load %arg1[%c0_32, %c0_33, %c25] : memref<1x8x640xf32, #tpu.memory_space<vmem>>, vector<1x8x384xf32>
    %31 = vector.shape_cast %30 : vector<1x8x384xf32> to vector<8x384xf32>
    %c80 = arith.constant 80 : index
    %c0_34 = arith.constant 0 : index
    %32 = vector.load %arg6[%c80, %c0_34] : memref<392x384xf32, #tpu.memory_space<vmem>>, vector<8x384xf32>
    tpu.vector_store %arg6[%c80, %c0_34], %31 {strides = array<i32>} : memref<392x384xf32, #tpu.memory_space<vmem>>, vector<8x384xf32>,
    %c0_35 = arith.constant 0 : index
    %c0_36 = arith.constant 0 : index
    %c26 = arith.constant 26 : index
    %33 = vector.load %arg1[%c0_35, %c0_36, %c26] : memref<1x8x640xf32, #tpu.memory_space<vmem>>, vector<1x8x384xf32>
    %34 = vector.shape_cast %33 : vector<1x8x384xf32> to vector<8x384xf32>
    %c88 = arith.constant 88 : index
    %c0_37 = arith.constant 0 : index
    %35 = vector.load %arg6[%c88, %c0_37] : memref<392x384xf32, #tpu.memory_space<vmem>>, vector<8x384xf32>
    tpu.vector_store %arg6[%c88, %c0_37], %34 {strides = array<i32>} : memref<392x384xf32, #tpu.memory_space<vmem>>, vector<8x384xf32>,
    %c0_38 = arith.constant 0 : index
    %c0_39 = arith.constant 0 : index
    %c27 = arith.constant 27 : index
    %36 = vector.load %arg1[%c0_38, %c0_39, %c27] : memref<1x8x640xf32, #tpu.memory_space<vmem>>, vector<1x8x384xf32>
    %37 = vector.shape_cast %36 : vector<1x8x384xf32> to vector<8x384xf32>
    %c96 = arith.constant 96 : index
    %c0_40 = arith.constant 0 : index
    %38 = vector.load %arg6[%c96, %c0_40] : memref<392x384xf32, #tpu.memory_space<vmem>>, vector<8x384xf32>
    tpu.vector_store %arg6[%c96, %c0_40], %37 {strides = array<i32>} : memref<392x384xf32, #tpu.memory_space<vmem>>, vector<8x384xf32>,
    %c0_41 = arith.constant 0 : index
    %c0_42 = arith.constant 0 : index
    %c28 = arith.constant 28 : index
    %39 = vector.load %arg1[%c0_41, %c0_42, %c28] : memref<1x8x640xf32, #tpu.memory_space<vmem>>, vector<1x8x384xf32>
    %40 = vector.shape_cast %39 : vector<1x8x384xf32> to vector<8x384xf32>
    %c104 = arith.constant 104 : index
    %c0_43 = arith.constant 0 : index
    %41 = vector.load %arg6[%c104, %c0_43] : memref<392x384xf32, #tpu.memory_space<vmem>>, vector<8x384xf32>
    tpu.vector_store %arg6[%c104, %c0_43], %40 {strides = array<i32>} : memref<392x384xf32, #tpu.memory_space<vmem>>, vector<8x384xf32>,
    %c0_44 = arith.constant 0 : index
    %c0_45 = arith.constant 0 : index
    %c44 = arith.constant 44 : index
    %42 = vector.load %arg1[%c0_44, %c0_45, %c44] : memref<1x8x640xf32, #tpu.memory_space<vmem>>, vector<1x8x384xf32>
    %43 = vector.shape_cast %42 : vector<1x8x384xf32> to vector<8x384xf32>
    %c112 = arith.constant 112 : index
    %c0_46 = arith.constant 0 : index
    %44 = vector.load %arg6[%c112, %c0_46] : memref<392x384xf32, #tpu.memory_space<vmem>>, vector<8x384xf32>
    tpu.vector_store %arg6[%c112, %c0_46], %43 {strides = array<i32>} : memref<392x384xf32, #tpu.memory_space<vmem>>, vector<8x384xf32>,
    %c0_47 = arith.constant 0 : index
    %c0_48 = arith.constant 0 : index
    %c45 = arith.constant 45 : index
    %45 = vector.load %arg1[%c0_47, %c0_48, %c45] : memref<1x8x640xf32, #tpu.memory_space<vmem>>, vector<1x8x384xf32>
    %46 = vector.shape_cast %45 : vector<1x8x384xf32> to vector<8x384xf32>
    %c120 = arith.constant 120 : index
    %c0_49 = arith.constant 0 : index
    %47 = vector.load %arg6[%c120, %c0_49] : memref<392x384xf32, #tpu.memory_space<vmem>>, vector<8x384xf32>
    tpu.vector_store %arg6[%c120, %c0_49], %46 {strides = array<i32>} : memref<392x384xf32, #tpu.memory_space<vmem>>, vector<8x384xf32>,
    %c0_50 = arith.constant 0 : index
    %c0_51 = arith.constant 0 : index
    %c46 = arith.constant 46 : index
    %48 = vector.load %arg1[%c0_50, %c0_51, %c46] : memref<1x8x640xf32, #tpu.memory_space<vmem>>, vector<1x8x384xf32>
    %49 = vector.shape_cast %48 : vector<1x8x384xf32> to vector<8x384xf32>
    %c128 = arith.constant 128 : index
    %c0_52 = arith.constant 0 : index
    %50 = vector.load %arg6[%c128, %c0_52] : memref<392x384xf32, #tpu.memory_space<vmem>>, vector<8x384xf32>
    tpu.vector_store %arg6[%c128, %c0_52], %49 {strides = array<i32>} : memref<392x384xf32, #tpu.memory_space<vmem>>, vector<8x384xf32>,
    %c0_53 = arith.constant 0 : index
    %c0_54 = arith.constant 0 : index
    %c47 = arith.constant 47 : index
    %51 = vector.load %arg1[%c0_53, %c0_54, %c47] : memref<1x8x640xf32, #tpu.memory_space<vmem>>, vector<1x8x384xf32>
    %52 = vector.shape_cast %51 : vector<1x8x384xf32> to vector<8x384xf32>
    %c136 = arith.constant 136 : index
    %c0_55 = arith.constant 0 : index
    %53 = vector.load %arg6[%c136, %c0_55] : memref<392x384xf32, #tpu.memory_space<vmem>>, vector<8x384xf32>
    tpu.vector_store %arg6[%c136, %c0_55], %52 {strides = array<i32>} : memref<392x384xf32, #tpu.memory_space<vmem>>, vector<8x384xf32>,
    %c0_56 = arith.constant 0 : index
    %c0_57 = arith.constant 0 : index
    %c48_58 = arith.constant 48 : index
    %54 = vector.load %arg1[%c0_56, %c0_57, %c48_58] : memref<1x8x640xf32, #tpu.memory_space<vmem>>, vector<1x8x384xf32>
    %55 = vector.shape_cast %54 : vector<1x8x384xf32> to vector<8x384xf32>
    %c144 = arith.constant 144 : index
    %c0_59 = arith.constant 0 : index
    %56 = vector.load %arg6[%c144, %c0_59] : memref<392x384xf32, #tpu.memory_space<vmem>>, vector<8x384xf32>
    tpu.vector_store %arg6[%c144, %c0_59], %55 {strides = array<i32>} : memref<392x384xf32, #tpu.memory_space<vmem>>, vector<8x384xf32>,
    %c0_60 = arith.constant 0 : index
    %c0_61 = arith.constant 0 : index
    %c49 = arith.constant 49 : index
    %57 = vector.load %arg1[%c0_60, %c0_61, %c49] : memref<1x8x640xf32, #tpu.memory_space<vmem>>, vector<1x8x384xf32>
    %58 = vector.shape_cast %57 : vector<1x8x384xf32> to vector<8x384xf32>
    %c152 = arith.constant 152 : index
    %c0_62 = arith.constant 0 : index
    %59 = vector.load %arg6[%c152, %c0_62] : memref<392x384xf32, #tpu.memory_space<vmem>>, vector<8x384xf32>
    tpu.vector_store %arg6[%c152, %c0_62], %58 {strides = array<i32>} : memref<392x384xf32, #tpu.memory_space<vmem>>, vector<8x384xf32>,
    %c0_63 = arith.constant 0 : index
    %c0_64 = arith.constant 0 : index
    %c50 = arith.constant 50 : index
    %60 = vector.load %arg1[%c0_63, %c0_64, %c50] : memref<1x8x640xf32, #tpu.memory_space<vmem>>, vector<1x8x384xf32>
    %61 = vector.shape_cast %60 : vector<1x8x384xf32> to vector<8x384xf32>
    %c160 = arith.constant 160 : index
    %c0_65 = arith.constant 0 : index
    %62 = vector.load %arg6[%c160, %c0_65] : memref<392x384xf32, #tpu.memory_space<vmem>>, vector<8x384xf32>
    tpu.vector_store %arg6[%c160, %c0_65], %61 {strides = array<i32>} : memref<392x384xf32, #tpu.memory_space<vmem>>, vector<8x384xf32>,
    %c0_66 = arith.constant 0 : index
    %c0_67 = arith.constant 0 : index
    %c66 = arith.constant 66 : index
    %63 = vector.load %arg1[%c0_66, %c0_67, %c66] : memref<1x8x640xf32, #tpu.memory_space<vmem>>, vector<1x8x384xf32>
    %64 = vector.shape_cast %63 : vector<1x8x384xf32> to vector<8x384xf32>
    %c168 = arith.constant 168 : index
    %c0_68 = arith.constant 0 : index
    %65 = vector.load %arg6[%c168, %c0_68] : memref<392x384xf32, #tpu.memory_space<vmem>>, vector<8x384xf32>
    tpu.vector_store %arg6[%c168, %c0_68], %64 {strides = array<i32>} : memref<392x384xf32, #tpu.memory_space<vmem>>, vector<8x384xf32>,
    %c0_69 = arith.constant 0 : index
    %c0_70 = arith.constant 0 : index
    %c67 = arith.constant 67 : index
    %66 = vector.load %arg1[%c0_69, %c0_70, %c67] : memref<1x8x640xf32, #tpu.memory_space<vmem>>, vector<1x8x384xf32>
    %67 = vector.shape_cast %66 : vector<1x8x384xf32> to vector<8x384xf32>
    %c176 = arith.constant 176 : index
    %c0_71 = arith.constant 0 : index
    %68 = vector.load %arg6[%c176, %c0_71] : memref<392x384xf32, #tpu.memory_space<vmem>>, vector<8x384xf32>
    tpu.vector_store %arg6[%c176, %c0_71], %67 {strides = array<i32>} : memref<392x384xf32, #tpu.memory_space<vmem>>, vector<8x384xf32>,
    %c0_72 = arith.constant 0 : index
    %c0_73 = arith.constant 0 : index
    %c68 = arith.constant 68 : index
    %69 = vector.load %arg1[%c0_72, %c0_73, %c68] : memref<1x8x640xf32, #tpu.memory_space<vmem>>, vector<1x8x384xf32>
    %70 = vector.shape_cast %69 : vector<1x8x384xf32> to vector<8x384xf32>
    %c184 = arith.constant 184 : index
    %c0_74 = arith.constant 0 : index
    %71 = vector.load %arg6[%c184, %c0_74] : memref<392x384xf32, #tpu.memory_space<vmem>>, vector<8x384xf32>
    tpu.vector_store %arg6[%c184, %c0_74], %70 {strides = array<i32>} : memref<392x384xf32, #tpu.memory_space<vmem>>, vector<8x384xf32>,
    %c0_75 = arith.constant 0 : index
    %c0_76 = arith.constant 0 : index
    %c69 = arith.constant 69 : index
    %72 = vector.load %arg1[%c0_75, %c0_76, %c69] : memref<1x8x640xf32, #tpu.memory_space<vmem>>, vector<1x8x384xf32>
    %73 = vector.shape_cast %72 : vector<1x8x384xf32> to vector<8x384xf32>
    %c192 = arith.constant 192 : index
    %c0_77 = arith.constant 0 : index
    %74 = vector.load %arg6[%c192, %c0_77] : memref<392x384xf32, #tpu.memory_space<vmem>>, vector<8x384xf32>
    tpu.vector_store %arg6[%c192, %c0_77], %73 {strides = array<i32>} : memref<392x384xf32, #tpu.memory_space<vmem>>, vector<8x384xf32>,
    %c0_78 = arith.constant 0 : index
    %c0_79 = arith.constant 0 : index
    %c70 = arith.constant 70 : index
    %75 = vector.load %arg1[%c0_78, %c0_79, %c70] : memref<1x8x640xf32, #tpu.memory_space<vmem>>, vector<1x8x384xf32>
    %76 = vector.shape_cast %75 : vector<1x8x384xf32> to vector<8x384xf32>
    %c200 = arith.constant 200 : index
    %c0_80 = arith.constant 0 : index
    %77 = vector.load %arg6[%c200, %c0_80] : memref<392x384xf32, #tpu.memory_space<vmem>>, vector<8x384xf32>
    tpu.vector_store %arg6[%c200, %c0_80], %76 {strides = array<i32>} : memref<392x384xf32, #tpu.memory_space<vmem>>, vector<8x384xf32>,
    %c0_81 = arith.constant 0 : index
    %c0_82 = arith.constant 0 : index
    %c71 = arith.constant 71 : index
    %78 = vector.load %arg1[%c0_81, %c0_82, %c71] : memref<1x8x640xf32, #tpu.memory_space<vmem>>, vector<1x8x384xf32>
    %79 = vector.shape_cast %78 : vector<1x8x384xf32> to vector<8x384xf32>
    %c208 = arith.constant 208 : index
    %c0_83 = arith.constant 0 : index
    %80 = vector.load %arg6[%c208, %c0_83] : memref<392x384xf32, #tpu.memory_space<vmem>>, vector<8x384xf32>
    tpu.vector_store %arg6[%c208, %c0_83], %79 {strides = array<i32>} : memref<392x384xf32, #tpu.memory_space<vmem>>, vector<8x384xf32>,
    %c0_84 = arith.constant 0 : index
    %c0_85 = arith.constant 0 : index
    %c72_86 = arith.constant 72 : index
    %81 = vector.load %arg1[%c0_84, %c0_85, %c72_86] : memref<1x8x640xf32, #tpu.memory_space<vmem>>, vector<1x8x384xf32>
    %82 = vector.shape_cast %81 : vector<1x8x384xf32> to vector<8x384xf32>
    %c216 = arith.constant 216 : index
    %c0_87 = arith.constant 0 : index
    %83 = vector.load %arg6[%c216, %c0_87] : memref<392x384xf32, #tpu.memory_space<vmem>>, vector<8x384xf32>
    tpu.vector_store %arg6[%c216, %c0_87], %82 {strides = array<i32>} : memref<392x384xf32, #tpu.memory_space<vmem>>, vector<8x384xf32>,
    %c0_88 = arith.constant 0 : index
    %c0_89 = arith.constant 0 : index
    %c88_90 = arith.constant 88 : index
    %84 = vector.load %arg1[%c0_88, %c0_89, %c88_90] : memref<1x8x640xf32, #tpu.memory_space<vmem>>, vector<1x8x384xf32>
    %85 = vector.shape_cast %84 : vector<1x8x384xf32> to vector<8x384xf32>
    %c224 = arith.constant 224 : index
    %c0_91 = arith.constant 0 : index
    %86 = vector.load %arg6[%c224, %c0_91] : memref<392x384xf32, #tpu.memory_space<vmem>>, vector<8x384xf32>
    tpu.vector_store %arg6[%c224, %c0_91], %85 {strides = array<i32>} : memref<392x384xf32, #tpu.memory_space<vmem>>, vector<8x384xf32>,
    %c0_92 = arith.constant 0 : index
    %c0_93 = arith.constant 0 : index
    %c89 = arith.constant 89 : index
    %87 = vector.load %arg1[%c0_92, %c0_93, %c89] : memref<1x8x640xf32, #tpu.memory_space<vmem>>, vector<1x8x384xf32>
    %88 = vector.shape_cast %87 : vector<1x8x384xf32> to vector<8x384xf32>
    %c232 = arith.constant 232 : index
    %c0_94 = arith.constant 0 : index
    %89 = vector.load %arg6[%c232, %c0_94] : memref<392x384xf32, #tpu.memory_space<vmem>>, vector<8x384xf32>
    tpu.vector_store %arg6[%c232, %c0_94], %88 {strides = array<i32>} : memref<392x384xf32, #tpu.memory_space<vmem>>, vector<8x384xf32>,
    %c0_95 = arith.constant 0 : index
    %c0_96 = arith.constant 0 : index
    %c90 = arith.constant 90 : index
    %90 = vector.load %arg1[%c0_95, %c0_96, %c90] : memref<1x8x640xf32, #tpu.memory_space<vmem>>, vector<1x8x384xf32>
    %91 = vector.shape_cast %90 : vector<1x8x384xf32> to vector<8x384xf32>
    %c240 = arith.constant 240 : index
    %c0_97 = arith.constant 0 : index
    %92 = vector.load %arg6[%c240, %c0_97] : memref<392x384xf32, #tpu.memory_space<vmem>>, vector<8x384xf32>
    tpu.vector_store %arg6[%c240, %c0_97], %91 {strides = array<i32>} : memref<392x384xf32, #tpu.memory_space<vmem>>, vector<8x384xf32>,
    %c0_98 = arith.constant 0 : index
    %c0_99 = arith.constant 0 : index
    %c91 = arith.constant 91 : index
    %93 = vector.load %arg1[%c0_98, %c0_99, %c91] : memref<1x8x640xf32, #tpu.memory_space<vmem>>, vector<1x8x384xf32>
    %94 = vector.shape_cast %93 : vector<1x8x384xf32> to vector<8x384xf32>
    %c248 = arith.constant 248 : index
    %c0_100 = arith.constant 0 : index
    %95 = vector.load %arg6[%c248, %c0_100] : memref<392x384xf32, #tpu.memory_space<vmem>>, vector<8x384xf32>
    tpu.vector_store %arg6[%c248, %c0_100], %94 {strides = array<i32>} : memref<392x384xf32, #tpu.memory_space<vmem>>, vector<8x384xf32>,
    %c0_101 = arith.constant 0 : index
    %c0_102 = arith.constant 0 : index
    %c92 = arith.constant 92 : index
    %96 = vector.load %arg1[%c0_101, %c0_102, %c92] : memref<1x8x640xf32, #tpu.memory_space<vmem>>, vector<1x8x384xf32>
    %97 = vector.shape_cast %96 : vector<1x8x384xf32> to vector<8x384xf32>
    %c256 = arith.constant 256 : index
    %c0_103 = arith.constant 0 : index
    %98 = vector.load %arg6[%c256, %c0_103] : memref<392x384xf32, #tpu.memory_space<vmem>>, vector<8x384xf32>
    tpu.vector_store %arg6[%c256, %c0_103], %97 {strides = array<i32>} : memref<392x384xf32, #tpu.memory_space<vmem>>, vector<8x384xf32>,
    %c0_104 = arith.constant 0 : index
    %c0_105 = arith.constant 0 : index
    %c93 = arith.constant 93 : index
    %99 = vector.load %arg1[%c0_104, %c0_105, %c93] : memref<1x8x640xf32, #tpu.memory_space<vmem>>, vector<1x8x384xf32>
    %100 = vector.shape_cast %99 : vector<1x8x384xf32> to vector<8x384xf32>
    %c264 = arith.constant 264 : index
    %c0_106 = arith.constant 0 : index
    %101 = vector.load %arg6[%c264, %c0_106] : memref<392x384xf32, #tpu.memory_space<vmem>>, vector<8x384xf32>
    tpu.vector_store %arg6[%c264, %c0_106], %100 {strides = array<i32>} : memref<392x384xf32, #tpu.memory_space<vmem>>, vector<8x384xf32>,
    %c0_107 = arith.constant 0 : index
    %c0_108 = arith.constant 0 : index
    %c94 = arith.constant 94 : index
    %102 = vector.load %arg1[%c0_107, %c0_108, %c94] : memref<1x8x640xf32, #tpu.memory_space<vmem>>, vector<1x8x384xf32>
    %103 = vector.shape_cast %102 : vector<1x8x384xf32> to vector<8x384xf32>
    %c272 = arith.constant 272 : index
    %c0_109 = arith.constant 0 : index
    %104 = vector.load %arg6[%c272, %c0_109] : memref<392x384xf32, #tpu.memory_space<vmem>>, vector<8x384xf32>
    tpu.vector_store %arg6[%c272, %c0_109], %103 {strides = array<i32>} : memref<392x384xf32, #tpu.memory_space<vmem>>, vector<8x384xf32>,
    %c0_110 = arith.constant 0 : index
    %c0_111 = arith.constant 0 : index
    %c110 = arith.constant 110 : index
    %105 = vector.load %arg1[%c0_110, %c0_111, %c110] : memref<1x8x640xf32, #tpu.memory_space<vmem>>, vector<1x8x384xf32>
    %106 = vector.shape_cast %105 : vector<1x8x384xf32> to vector<8x384xf32>
    %c280 = arith.constant 280 : index
    %c0_112 = arith.constant 0 : index
    %107 = vector.load %arg6[%c280, %c0_112] : memref<392x384xf32, #tpu.memory_space<vmem>>, vector<8x384xf32>
    tpu.vector_store %arg6[%c280, %c0_112], %106 {strides = array<i32>} : memref<392x384xf32, #tpu.memory_space<vmem>>, vector<8x384xf32>,
    %c0_113 = arith.constant 0 : index
    %c0_114 = arith.constant 0 : index
    %c111 = arith.constant 111 : index
    %108 = vector.load %arg1[%c0_113, %c0_114, %c111] : memref<1x8x640xf32, #tpu.memory_space<vmem>>, vector<1x8x384xf32>
    %109 = vector.shape_cast %108 : vector<1x8x384xf32> to vector<8x384xf32>
    %c288 = arith.constant 288 : index
    %c0_115 = arith.constant 0 : index
    %110 = vector.load %arg6[%c288, %c0_115] : memref<392x384xf32, #tpu.memory_space<vmem>>, vector<8x384xf32>
    tpu.vector_store %arg6[%c288, %c0_115], %109 {strides = array<i32>} : memref<392x384xf32, #tpu.memory_space<vmem>>, vector<8x384xf32>,
    %c0_116 = arith.constant 0 : index
    %c0_117 = arith.constant 0 : index
    %c112_118 = arith.constant 112 : index
    %111 = vector.load %arg1[%c0_116, %c0_117, %c112_118] : memref<1x8x640xf32, #tpu.memory_space<vmem>>, vector<1x8x384xf32>
    %112 = vector.shape_cast %111 : vector<1x8x384xf32> to vector<8x384xf32>
    %c296 = arith.constant 296 : index
    %c0_119 = arith.constant 0 : index
    %113 = vector.load %arg6[%c296, %c0_119] : memref<392x384xf32, #tpu.memory_space<vmem>>, vector<8x384xf32>
    tpu.vector_store %arg6[%c296, %c0_119], %112 {strides = array<i32>} : memref<392x384xf32, #tpu.memory_space<vmem>>, vector<8x384xf32>,
    %c0_120 = arith.constant 0 : index
    %c0_121 = arith.constant 0 : index
    %c113 = arith.constant 113 : index
    %114 = vector.load %arg1[%c0_120, %c0_121, %c113] : memref<1x8x640xf32, #tpu.memory_space<vmem>>, vector<1x8x384xf32>
    %115 = vector.shape_cast %114 : vector<1x8x384xf32> to vector<8x384xf32>
    %c304 = arith.constant 304 : index
    %c0_122 = arith.constant 0 : index
    %116 = vector.load %arg6[%c304, %c0_122] : memref<392x384xf32, #tpu.memory_space<vmem>>, vector<8x384xf32>
    tpu.vector_store %arg6[%c304, %c0_122], %115 {strides = array<i32>} : memref<392x384xf32, #tpu.memory_space<vmem>>, vector<8x384xf32>,
    %c0_123 = arith.constant 0 : index
    %c0_124 = arith.constant 0 : index
    %c114 = arith.constant 114 : index
    %117 = vector.load %arg1[%c0_123, %c0_124, %c114] : memref<1x8x640xf32, #tpu.memory_space<vmem>>, vector<1x8x384xf32>
    %118 = vector.shape_cast %117 : vector<1x8x384xf32> to vector<8x384xf32>
    %c312 = arith.constant 312 : index
    %c0_125 = arith.constant 0 : index
    %119 = vector.load %arg6[%c312, %c0_125] : memref<392x384xf32, #tpu.memory_space<vmem>>, vector<8x384xf32>
    tpu.vector_store %arg6[%c312, %c0_125], %118 {strides = array<i32>} : memref<392x384xf32, #tpu.memory_space<vmem>>, vector<8x384xf32>,
    %c0_126 = arith.constant 0 : index
    %c0_127 = arith.constant 0 : index
    %c115 = arith.constant 115 : index
    %120 = vector.load %arg1[%c0_126, %c0_127, %c115] : memref<1x8x640xf32, #tpu.memory_space<vmem>>, vector<1x8x384xf32>
    %121 = vector.shape_cast %120 : vector<1x8x384xf32> to vector<8x384xf32>
    %c320 = arith.constant 320 : index
    %c0_128 = arith.constant 0 : index
    %122 = vector.load %arg6[%c320, %c0_128] : memref<392x384xf32, #tpu.memory_space<vmem>>, vector<8x384xf32>
    tpu.vector_store %arg6[%c320, %c0_128], %121 {strides = array<i32>} : memref<392x384xf32, #tpu.memory_space<vmem>>, vector<8x384xf32>,
    %c0_129 = arith.constant 0 : index
    %c0_130 = arith.constant 0 : index
    %c116 = arith.constant 116 : index
    %123 = vector.load %arg1[%c0_129, %c0_130, %c116] : memref<1x8x640xf32, #tpu.memory_space<vmem>>, vector<1x8x384xf32>
    %124 = vector.shape_cast %123 : vector<1x8x384xf32> to vector<8x384xf32>
    %c328 = arith.constant 328 : index
    %c0_131 = arith.constant 0 : index
    %125 = vector.load %arg6[%c328, %c0_131] : memref<392x384xf32, #tpu.memory_space<vmem>>, vector<8x384xf32>
    tpu.vector_store %arg6[%c328, %c0_131], %124 {strides = array<i32>} : memref<392x384xf32, #tpu.memory_space<vmem>>, vector<8x384xf32>,
    %c0_132 = arith.constant 0 : index
    %c0_133 = arith.constant 0 : index
    %c132 = arith.constant 132 : index
    %126 = vector.load %arg1[%c0_132, %c0_133, %c132] : memref<1x8x640xf32, #tpu.memory_space<vmem>>, vector<1x8x384xf32>
    %127 = vector.shape_cast %126 : vector<1x8x384xf32> to vector<8x384xf32>
    %c336 = arith.constant 336 : index
    %c0_134 = arith.constant 0 : index
    %128 = vector.load %arg6[%c336, %c0_134] : memref<392x384xf32, #tpu.memory_space<vmem>>, vector<8x384xf32>
    tpu.vector_store %arg6[%c336, %c0_134], %127 {strides = array<i32>} : memref<392x384xf32, #tpu.memory_space<vmem>>, vector<8x384xf32>,
    %c0_135 = arith.constant 0 : index
    %c0_136 = arith.constant 0 : index
    %c133 = arith.constant 133 : index
    %129 = vector.load %arg1[%c0_135, %c0_136, %c133] : memref<1x8x640xf32, #tpu.memory_space<vmem>>, vector<1x8x384xf32>
    %130 = vector.shape_cast %129 : vector<1x8x384xf32> to vector<8x384xf32>
    %c344 = arith.constant 344 : index
    %c0_137 = arith.constant 0 : index
    %131 = vector.load %arg6[%c344, %c0_137] : memref<392x384xf32, #tpu.memory_space<vmem>>, vector<8x384xf32>
    tpu.vector_store %arg6[%c344, %c0_137], %130 {strides = array<i32>} : memref<392x384xf32, #tpu.memory_space<vmem>>, vector<8x384xf32>,
    %c0_138 = arith.constant 0 : index
    %c0_139 = arith.constant 0 : index
    %c134 = arith.constant 134 : index
    %132 = vector.load %arg1[%c0_138, %c0_139, %c134] : memref<1x8x640xf32, #tpu.memory_space<vmem>>, vector<1x8x384xf32>
    %133 = vector.shape_cast %132 : vector<1x8x384xf32> to vector<8x384xf32>
    %c352 = arith.constant 352 : index
    %c0_140 = arith.constant 0 : index
    %134 = vector.load %arg6[%c352, %c0_140] : memref<392x384xf32, #tpu.memory_space<vmem>>, vector<8x384xf32>
    tpu.vector_store %arg6[%c352, %c0_140], %133 {strides = array<i32>} : memref<392x384xf32, #tpu.memory_space<vmem>>, vector<8x384xf32>,
    %c0_141 = arith.constant 0 : index
    %c0_142 = arith.constant 0 : index
    %c135 = arith.constant 135 : index
    %135 = vector.load %arg1[%c0_141, %c0_142, %c135] : memref<1x8x640xf32, #tpu.memory_space<vmem>>, vector<1x8x384xf32>
    %136 = vector.shape_cast %135 : vector<1x8x384xf32> to vector<8x384xf32>
    %c360 = arith.constant 360 : index
    %c0_143 = arith.constant 0 : index
    %137 = vector.load %arg6[%c360, %c0_143] : memref<392x384xf32, #tpu.memory_space<vmem>>, vector<8x384xf32>
    tpu.vector_store %arg6[%c360, %c0_143], %136 {strides = array<i32>} : memref<392x384xf32, #tpu.memory_space<vmem>>, vector<8x384xf32>,
    %c0_144 = arith.constant 0 : index
    %c0_145 = arith.constant 0 : index
    %c136_146 = arith.constant 136 : index
    %138 = vector.load %arg1[%c0_144, %c0_145, %c136_146] : memref<1x8x640xf32, #tpu.memory_space<vmem>>, vector<1x8x384xf32>
    %139 = vector.shape_cast %138 : vector<1x8x384xf32> to vector<8x384xf32>
    %c368 = arith.constant 368 : index
    %c0_147 = arith.constant 0 : index
    %140 = vector.load %arg6[%c368, %c0_147] : memref<392x384xf32, #tpu.memory_space<vmem>>, vector<8x384xf32>
    tpu.vector_store %arg6[%c368, %c0_147], %139 {strides = array<i32>} : memref<392x384xf32, #tpu.memory_space<vmem>>, vector<8x384xf32>,
    %c0_148 = arith.constant 0 : index
    %c0_149 = arith.constant 0 : index
    %c137 = arith.constant 137 : index
    %141 = vector.load %arg1[%c0_148, %c0_149, %c137] : memref<1x8x640xf32, #tpu.memory_space<vmem>>, vector<1x8x384xf32>
    %142 = vector.shape_cast %141 : vector<1x8x384xf32> to vector<8x384xf32>
    %c376 = arith.constant 376 : index
    %c0_150 = arith.constant 0 : index
    %143 = vector.load %arg6[%c376, %c0_150] : memref<392x384xf32, #tpu.memory_space<vmem>>, vector<8x384xf32>
    tpu.vector_store %arg6[%c376, %c0_150], %142 {strides = array<i32>} : memref<392x384xf32, #tpu.memory_space<vmem>>, vector<8x384xf32>,
    %c0_151 = arith.constant 0 : index
    %c0_152 = arith.constant 0 : index
    %c138 = arith.constant 138 : index
    %144 = vector.load %arg1[%c0_151, %c0_152, %c138] : memref<1x8x640xf32, #tpu.memory_space<vmem>>, vector<1x8x384xf32>
    %145 = vector.shape_cast %144 : vector<1x8x384xf32> to vector<8x384xf32>
    %c384 = arith.constant 384 : index
    %c0_153 = arith.constant 0 : index
    %146 = vector.load %arg6[%c384, %c0_153] : memref<392x384xf32, #tpu.memory_space<vmem>>, vector<8x384xf32>
    tpu.vector_store %arg6[%c384, %c0_153], %145 {strides = array<i32>} : memref<392x384xf32, #tpu.memory_space<vmem>>, vector<8x384xf32>,
    %c0_154 = arith.constant 0 : index
    %c0_155 = arith.constant 0 : index
    %147 = vector.load %arg2[%c0_154, %c0_155] : memref<24x392xf32, #tpu.memory_space<vmem>>, vector<24x392xf32>
    %c0_156 = arith.constant 0 : index
    %c0_157 = arith.constant 0 : index
    %148 = vector.load %arg6[%c0_156, %c0_157] : memref<392x384xf32, #tpu.memory_space<vmem>>, vector<392x384xf32>
    %cst = arith.constant dense<0.000000e+00> : vector<24x384xf32>
    %149 = tpu.matmul %147, %148, %cst {dimension_numbers = #tpu.dot_dimension_numbers<[1], [0], [0], [1], [0, 0, 1, 1], [], []>} : vector<24x392xf32>, vector<392x384xf32>, vector<24x384xf32> -> vector<24x384xf32>
    %c0_158 = arith.constant 0 : index
    %c0_159 = arith.constant 0 : index
    %c0_160 = arith.constant 0 : index
    %150 = vector.load %arg4[%c0_158, %c0_159, %c0_160] : memref<1x24x384xf32, #tpu.memory_space<vmem>>, vector<1x24x384xf32>
    %151 = vector.shape_cast %150 : vector<1x24x384xf32> to vector<24x384xf32>
    %152 = vector.shape_cast %149 : vector<24x384xf32> to vector<1x24x384xf32>
    tpu.vector_store %arg4[%c0_158, %c0_159, %c0_160], %152 {strides = array<i32>} : memref<1x24x384xf32, #tpu.memory_space<vmem>>, vector<1x24x384xf32>,
    %c0_161 = arith.constant 0 : index
    %c0_162 = arith.constant 0 : index
    %153 = vector.load %arg3[%c0_161, %c0_162] : memref<1x384xf32, #tpu.memory_space<vmem>>, vector<1x384xf32>
    %154 = vector.broadcast %153 : vector<1x384xf32> to vector<24x384xf32>
    %155 = arith.mulf %149, %154 : vector<24x384xf32>
    %156 = arith.mulf %155, %149 : vector<24x384xf32>
    %157 = tpu.concatenate %155, %156 in 0 : vector<24x384xf32>, vector<24x384xf32> -> vector<48x384xf32>
    %cst_163 = arith.constant dense<0.000000e+00> : vector<48xf32>
    %158 = vector.multi_reduction <add>, %157, %cst_163 [1] : vector<48x384xf32> to vector<48xf32>
    %159 = vector.shape_cast %158 : vector<48xf32> to vector<48x1xf32>
    %c0_164 = arith.constant 0 : index
    %c0_165 = arith.constant 0 : index
    %c0_166 = arith.constant 0 : index
    %160 = vector.load %arg5[%c0_164, %c0_165, %c0_166] : memref<1x48x1xf32, #tpu.memory_space<vmem>>, vector<1x48x1xf32>
    %161 = vector.shape_cast %160 : vector<1x48x1xf32> to vector<48x1xf32>
    %162 = vector.shape_cast %159 : vector<48x1xf32> to vector<1x48x1xf32>
    tpu.vector_store %arg5[%c0_164, %c0_165, %c0_166], %162 {strides = array<i32>} : memref<1x48x1xf32, #tpu.memory_space<vmem>>, vector<1x48x1xf32>,
    return
  }
  func.func @transform_0(%arg0: i32) -> (i32, i32, i32) {
    %c0_i32 = arith.constant 0 : i32
    %c0_i32_0 = arith.constant 0 : i32
    %c0_i32_1 = arith.constant 0 : i32
    return %arg0, %c0_i32, %c0_i32_0 : i32, i32, i32
  }
  func.func @transform_1(%arg0: i32) -> (i32, i32) {
    %c0_i32 = arith.constant 0 : i32
    %c0_i32_0 = arith.constant 0 : i32
    %c0_i32_1 = arith.constant 0 : i32
    return %c0_i32, %c0_i32_0 : i32, i32
  }
  func.func @transform_2(%arg0: i32) -> (i32, i32) {
    %c0_i32 = arith.constant 0 : i32
    %c0_i32_0 = arith.constant 0 : i32
    %c0_i32_1 = arith.constant 0 : i32
    return %c0_i32, %c0_i32_0 : i32, i32
  }
  func.func @transform_3(%arg0: i32) -> (i32, i32, i32) {
    %c0_i32 = arith.constant 0 : i32
    %c0_i32_0 = arith.constant 0 : i32
    %c0_i32_1 = arith.constant 0 : i32
    return %arg0, %c0_i32, %c0_i32_0 : i32, i32, i32
  }
  func.func @transform_4(%arg0: i32) -> (i32, i32, i32) {
    %c0_i32 = arith.constant 0 : i32
    %c0_i32_0 = arith.constant 0 : i32
    %c0_i32_1 = arith.constant 0 : i32
    return %arg0, %c0_i32, %c0_i32_0 : i32, i32, i32
  }
}

module attributes {stable_mosaic.version = 11 : i64} {
  func.func @_bn_crop_kernel(%arg0: i32, %arg1: memref<1x24x384xf32, #tpu.memory_space<vmem>>, %arg2: memref<24x2xf32, #tpu.memory_space<vmem>>, %arg3: memref<1x24x16x16xf32, #tpu.memory_space<vmem>>) attributes {dimension_semantics = [#tpu.dimension_semantics<parallel>], iteration_bounds = array<i64: 2>, scalar_prefetch = 0 : i64, scratch_operands = 0 : i64, tpu.core_type = #tpu.core_type<tc>, window_params = [{transform_indices = @transform_0, window_bounds = array<i64: 1, 24, 384>}, {pipeline_mode = #tpu.pipeline_mode<synchronous>, transform_indices = @transform_1, window_bounds = array<i64: 24, 2>}, {transform_indices = @transform_2, window_bounds = array<i64: 1, 24, 16, 16>}]} {
    %c0 = arith.constant 0 : index
    %c0_0 = arith.constant 0 : index
    %c0_1 = arith.constant 0 : index
    %0 = vector.load %arg1[%c0, %c0_0, %c0_1] : memref<1x24x384xf32, #tpu.memory_space<vmem>>, vector<1x24x384xf32>
    %1 = vector.shape_cast %0 : vector<1x24x384xf32> to vector<24x384xf32>
    %c0_2 = arith.constant 0 : index
    %c0_3 = arith.constant 0 : index
    %2 = vector.load %arg2[%c0_2, %c0_3] : memref<24x2xf32, #tpu.memory_space<vmem>>, vector<24x1xf32>
    %3 = vector.broadcast %2 : vector<24x1xf32> to vector<24x384xf32>
    %4 = arith.mulf %1, %3 : vector<24x384xf32>
    %c0_4 = arith.constant 0 : index
    %c1 = arith.constant 1 : index
    %5 = vector.load %arg2[%c0_4, %c1] : memref<24x2xf32, #tpu.memory_space<vmem>>, vector<24x1xf32>
    %6 = vector.broadcast %5 : vector<24x1xf32> to vector<24x384xf32>
    %7 = arith.addf %4, %6 : vector<24x384xf32>
    %8 = vector.extract_strided_slice %7 {offsets = [0, 0], sizes = [24, 16], strides = [1, 1]} : vector<24x384xf32> to vector<24x16xf32>
    %c0_5 = arith.constant 0 : index
    %c0_6 = arith.constant 0 : index
    %c0_7 = arith.constant 0 : index
    %c0_8 = arith.constant 0 : index
    %9 = vector.load %arg3[%c0_5, %c0_6, %c0_7, %c0_8] : memref<1x24x16x16xf32, #tpu.memory_space<vmem>>, vector<1x24x1x16xf32>
    %10 = vector.shape_cast %9 : vector<1x24x1x16xf32> to vector<24x16xf32>
    %11 = vector.shape_cast %8 : vector<24x16xf32> to vector<1x24x1x16xf32>
    tpu.vector_store %arg3[%c0_5, %c0_6, %c0_7, %c0_8], %11 {strides = array<i32>} : memref<1x24x16x16xf32, #tpu.memory_space<vmem>>, vector<1x24x1x16xf32>,
    %12 = vector.extract_strided_slice %7 {offsets = [0, 22], sizes = [24, 16], strides = [1, 1]} : vector<24x384xf32> to vector<24x16xf32>
    %c0_9 = arith.constant 0 : index
    %c0_10 = arith.constant 0 : index
    %c1_11 = arith.constant 1 : index
    %c0_12 = arith.constant 0 : index
    %13 = vector.load %arg3[%c0_9, %c0_10, %c1_11, %c0_12] : memref<1x24x16x16xf32, #tpu.memory_space<vmem>>, vector<1x24x1x16xf32>
    %14 = vector.shape_cast %13 : vector<1x24x1x16xf32> to vector<24x16xf32>
    %15 = vector.shape_cast %12 : vector<24x16xf32> to vector<1x24x1x16xf32>
    tpu.vector_store %arg3[%c0_9, %c0_10, %c1_11, %c0_12], %15 {strides = array<i32>} : memref<1x24x16x16xf32, #tpu.memory_space<vmem>>, vector<1x24x1x16xf32>,
    %16 = vector.extract_strided_slice %7 {offsets = [0, 44], sizes = [24, 16], strides = [1, 1]} : vector<24x384xf32> to vector<24x16xf32>
    %c0_13 = arith.constant 0 : index
    %c0_14 = arith.constant 0 : index
    %c2 = arith.constant 2 : index
    %c0_15 = arith.constant 0 : index
    %17 = vector.load %arg3[%c0_13, %c0_14, %c2, %c0_15] : memref<1x24x16x16xf32, #tpu.memory_space<vmem>>, vector<1x24x1x16xf32>
    %18 = vector.shape_cast %17 : vector<1x24x1x16xf32> to vector<24x16xf32>
    %19 = vector.shape_cast %16 : vector<24x16xf32> to vector<1x24x1x16xf32>
    tpu.vector_store %arg3[%c0_13, %c0_14, %c2, %c0_15], %19 {strides = array<i32>} : memref<1x24x16x16xf32, #tpu.memory_space<vmem>>, vector<1x24x1x16xf32>,
    %20 = vector.extract_strided_slice %7 {offsets = [0, 66], sizes = [24, 16], strides = [1, 1]} : vector<24x384xf32> to vector<24x16xf32>
    %c0_16 = arith.constant 0 : index
    %c0_17 = arith.constant 0 : index
    %c3 = arith.constant 3 : index
    %c0_18 = arith.constant 0 : index
    %21 = vector.load %arg3[%c0_16, %c0_17, %c3, %c0_18] : memref<1x24x16x16xf32, #tpu.memory_space<vmem>>, vector<1x24x1x16xf32>
    %22 = vector.shape_cast %21 : vector<1x24x1x16xf32> to vector<24x16xf32>
    %23 = vector.shape_cast %20 : vector<24x16xf32> to vector<1x24x1x16xf32>
    tpu.vector_store %arg3[%c0_16, %c0_17, %c3, %c0_18], %23 {strides = array<i32>} : memref<1x24x16x16xf32, #tpu.memory_space<vmem>>, vector<1x24x1x16xf32>,
    %24 = vector.extract_strided_slice %7 {offsets = [0, 88], sizes = [24, 16], strides = [1, 1]} : vector<24x384xf32> to vector<24x16xf32>
    %c0_19 = arith.constant 0 : index
    %c0_20 = arith.constant 0 : index
    %c4 = arith.constant 4 : index
    %c0_21 = arith.constant 0 : index
    %25 = vector.load %arg3[%c0_19, %c0_20, %c4, %c0_21] : memref<1x24x16x16xf32, #tpu.memory_space<vmem>>, vector<1x24x1x16xf32>
    %26 = vector.shape_cast %25 : vector<1x24x1x16xf32> to vector<24x16xf32>
    %27 = vector.shape_cast %24 : vector<24x16xf32> to vector<1x24x1x16xf32>
    tpu.vector_store %arg3[%c0_19, %c0_20, %c4, %c0_21], %27 {strides = array<i32>} : memref<1x24x16x16xf32, #tpu.memory_space<vmem>>, vector<1x24x1x16xf32>,
    %28 = vector.extract_strided_slice %7 {offsets = [0, 110], sizes = [24, 16], strides = [1, 1]} : vector<24x384xf32> to vector<24x16xf32>
    %c0_22 = arith.constant 0 : index
    %c0_23 = arith.constant 0 : index
    %c5 = arith.constant 5 : index
    %c0_24 = arith.constant 0 : index
    %29 = vector.load %arg3[%c0_22, %c0_23, %c5, %c0_24] : memref<1x24x16x16xf32, #tpu.memory_space<vmem>>, vector<1x24x1x16xf32>
    %30 = vector.shape_cast %29 : vector<1x24x1x16xf32> to vector<24x16xf32>
    %31 = vector.shape_cast %28 : vector<24x16xf32> to vector<1x24x1x16xf32>
    tpu.vector_store %arg3[%c0_22, %c0_23, %c5, %c0_24], %31 {strides = array<i32>} : memref<1x24x16x16xf32, #tpu.memory_space<vmem>>, vector<1x24x1x16xf32>,
    %32 = vector.extract_strided_slice %7 {offsets = [0, 132], sizes = [24, 16], strides = [1, 1]} : vector<24x384xf32> to vector<24x16xf32>
    %c0_25 = arith.constant 0 : index
    %c0_26 = arith.constant 0 : index
    %c6 = arith.constant 6 : index
    %c0_27 = arith.constant 0 : index
    %33 = vector.load %arg3[%c0_25, %c0_26, %c6, %c0_27] : memref<1x24x16x16xf32, #tpu.memory_space<vmem>>, vector<1x24x1x16xf32>
    %34 = vector.shape_cast %33 : vector<1x24x1x16xf32> to vector<24x16xf32>
    %35 = vector.shape_cast %32 : vector<24x16xf32> to vector<1x24x1x16xf32>
    tpu.vector_store %arg3[%c0_25, %c0_26, %c6, %c0_27], %35 {strides = array<i32>} : memref<1x24x16x16xf32, #tpu.memory_space<vmem>>, vector<1x24x1x16xf32>,
    %36 = vector.extract_strided_slice %7 {offsets = [0, 154], sizes = [24, 16], strides = [1, 1]} : vector<24x384xf32> to vector<24x16xf32>
    %c0_28 = arith.constant 0 : index
    %c0_29 = arith.constant 0 : index
    %c7 = arith.constant 7 : index
    %c0_30 = arith.constant 0 : index
    %37 = vector.load %arg3[%c0_28, %c0_29, %c7, %c0_30] : memref<1x24x16x16xf32, #tpu.memory_space<vmem>>, vector<1x24x1x16xf32>
    %38 = vector.shape_cast %37 : vector<1x24x1x16xf32> to vector<24x16xf32>
    %39 = vector.shape_cast %36 : vector<24x16xf32> to vector<1x24x1x16xf32>
    tpu.vector_store %arg3[%c0_28, %c0_29, %c7, %c0_30], %39 {strides = array<i32>} : memref<1x24x16x16xf32, #tpu.memory_space<vmem>>, vector<1x24x1x16xf32>,
    %40 = vector.extract_strided_slice %7 {offsets = [0, 176], sizes = [24, 16], strides = [1, 1]} : vector<24x384xf32> to vector<24x16xf32>
    %c0_31 = arith.constant 0 : index
    %c0_32 = arith.constant 0 : index
    %c8 = arith.constant 8 : index
    %c0_33 = arith.constant 0 : index
    %41 = vector.load %arg3[%c0_31, %c0_32, %c8, %c0_33] : memref<1x24x16x16xf32, #tpu.memory_space<vmem>>, vector<1x24x1x16xf32>
    %42 = vector.shape_cast %41 : vector<1x24x1x16xf32> to vector<24x16xf32>
    %43 = vector.shape_cast %40 : vector<24x16xf32> to vector<1x24x1x16xf32>
    tpu.vector_store %arg3[%c0_31, %c0_32, %c8, %c0_33], %43 {strides = array<i32>} : memref<1x24x16x16xf32, #tpu.memory_space<vmem>>, vector<1x24x1x16xf32>,
    %44 = vector.extract_strided_slice %7 {offsets = [0, 198], sizes = [24, 16], strides = [1, 1]} : vector<24x384xf32> to vector<24x16xf32>
    %c0_34 = arith.constant 0 : index
    %c0_35 = arith.constant 0 : index
    %c9 = arith.constant 9 : index
    %c0_36 = arith.constant 0 : index
    %45 = vector.load %arg3[%c0_34, %c0_35, %c9, %c0_36] : memref<1x24x16x16xf32, #tpu.memory_space<vmem>>, vector<1x24x1x16xf32>
    %46 = vector.shape_cast %45 : vector<1x24x1x16xf32> to vector<24x16xf32>
    %47 = vector.shape_cast %44 : vector<24x16xf32> to vector<1x24x1x16xf32>
    tpu.vector_store %arg3[%c0_34, %c0_35, %c9, %c0_36], %47 {strides = array<i32>} : memref<1x24x16x16xf32, #tpu.memory_space<vmem>>, vector<1x24x1x16xf32>,
    %48 = vector.extract_strided_slice %7 {offsets = [0, 220], sizes = [24, 16], strides = [1, 1]} : vector<24x384xf32> to vector<24x16xf32>
    %c0_37 = arith.constant 0 : index
    %c0_38 = arith.constant 0 : index
    %c10 = arith.constant 10 : index
    %c0_39 = arith.constant 0 : index
    %49 = vector.load %arg3[%c0_37, %c0_38, %c10, %c0_39] : memref<1x24x16x16xf32, #tpu.memory_space<vmem>>, vector<1x24x1x16xf32>
    %50 = vector.shape_cast %49 : vector<1x24x1x16xf32> to vector<24x16xf32>
    %51 = vector.shape_cast %48 : vector<24x16xf32> to vector<1x24x1x16xf32>
    tpu.vector_store %arg3[%c0_37, %c0_38, %c10, %c0_39], %51 {strides = array<i32>} : memref<1x24x16x16xf32, #tpu.memory_space<vmem>>, vector<1x24x1x16xf32>,
    %52 = vector.extract_strided_slice %7 {offsets = [0, 242], sizes = [24, 16], strides = [1, 1]} : vector<24x384xf32> to vector<24x16xf32>
    %c0_40 = arith.constant 0 : index
    %c0_41 = arith.constant 0 : index
    %c11 = arith.constant 11 : index
    %c0_42 = arith.constant 0 : index
    %53 = vector.load %arg3[%c0_40, %c0_41, %c11, %c0_42] : memref<1x24x16x16xf32, #tpu.memory_space<vmem>>, vector<1x24x1x16xf32>
    %54 = vector.shape_cast %53 : vector<1x24x1x16xf32> to vector<24x16xf32>
    %55 = vector.shape_cast %52 : vector<24x16xf32> to vector<1x24x1x16xf32>
    tpu.vector_store %arg3[%c0_40, %c0_41, %c11, %c0_42], %55 {strides = array<i32>} : memref<1x24x16x16xf32, #tpu.memory_space<vmem>>, vector<1x24x1x16xf32>,
    %56 = vector.extract_strided_slice %7 {offsets = [0, 264], sizes = [24, 16], strides = [1, 1]} : vector<24x384xf32> to vector<24x16xf32>
    %c0_43 = arith.constant 0 : index
    %c0_44 = arith.constant 0 : index
    %c12 = arith.constant 12 : index
    %c0_45 = arith.constant 0 : index
    %57 = vector.load %arg3[%c0_43, %c0_44, %c12, %c0_45] : memref<1x24x16x16xf32, #tpu.memory_space<vmem>>, vector<1x24x1x16xf32>
    %58 = vector.shape_cast %57 : vector<1x24x1x16xf32> to vector<24x16xf32>
    %59 = vector.shape_cast %56 : vector<24x16xf32> to vector<1x24x1x16xf32>
    tpu.vector_store %arg3[%c0_43, %c0_44, %c12, %c0_45], %59 {strides = array<i32>} : memref<1x24x16x16xf32, #tpu.memory_space<vmem>>, vector<1x24x1x16xf32>,
    %60 = vector.extract_strided_slice %7 {offsets = [0, 286], sizes = [24, 16], strides = [1, 1]} : vector<24x384xf32> to vector<24x16xf32>
    %c0_46 = arith.constant 0 : index
    %c0_47 = arith.constant 0 : index
    %c13 = arith.constant 13 : index
    %c0_48 = arith.constant 0 : index
    %61 = vector.load %arg3[%c0_46, %c0_47, %c13, %c0_48] : memref<1x24x16x16xf32, #tpu.memory_space<vmem>>, vector<1x24x1x16xf32>
    %62 = vector.shape_cast %61 : vector<1x24x1x16xf32> to vector<24x16xf32>
    %63 = vector.shape_cast %60 : vector<24x16xf32> to vector<1x24x1x16xf32>
    tpu.vector_store %arg3[%c0_46, %c0_47, %c13, %c0_48], %63 {strides = array<i32>} : memref<1x24x16x16xf32, #tpu.memory_space<vmem>>, vector<1x24x1x16xf32>,
    %64 = vector.extract_strided_slice %7 {offsets = [0, 308], sizes = [24, 16], strides = [1, 1]} : vector<24x384xf32> to vector<24x16xf32>
    %c0_49 = arith.constant 0 : index
    %c0_50 = arith.constant 0 : index
    %c14 = arith.constant 14 : index
    %c0_51 = arith.constant 0 : index
    %65 = vector.load %arg3[%c0_49, %c0_50, %c14, %c0_51] : memref<1x24x16x16xf32, #tpu.memory_space<vmem>>, vector<1x24x1x16xf32>
    %66 = vector.shape_cast %65 : vector<1x24x1x16xf32> to vector<24x16xf32>
    %67 = vector.shape_cast %64 : vector<24x16xf32> to vector<1x24x1x16xf32>
    tpu.vector_store %arg3[%c0_49, %c0_50, %c14, %c0_51], %67 {strides = array<i32>} : memref<1x24x16x16xf32, #tpu.memory_space<vmem>>, vector<1x24x1x16xf32>,
    %68 = vector.extract_strided_slice %7 {offsets = [0, 330], sizes = [24, 16], strides = [1, 1]} : vector<24x384xf32> to vector<24x16xf32>
    %c0_52 = arith.constant 0 : index
    %c0_53 = arith.constant 0 : index
    %c15 = arith.constant 15 : index
    %c0_54 = arith.constant 0 : index
    %69 = vector.load %arg3[%c0_52, %c0_53, %c15, %c0_54] : memref<1x24x16x16xf32, #tpu.memory_space<vmem>>, vector<1x24x1x16xf32>
    %70 = vector.shape_cast %69 : vector<1x24x1x16xf32> to vector<24x16xf32>
    %71 = vector.shape_cast %68 : vector<24x16xf32> to vector<1x24x1x16xf32>
    tpu.vector_store %arg3[%c0_52, %c0_53, %c15, %c0_54], %71 {strides = array<i32>} : memref<1x24x16x16xf32, #tpu.memory_space<vmem>>, vector<1x24x1x16xf32>,
    return
  }
  func.func @transform_0(%arg0: i32) -> (i32, i32, i32) {
    %c0_i32 = arith.constant 0 : i32
    %c0_i32_0 = arith.constant 0 : i32
    %c0_i32_1 = arith.constant 0 : i32
    return %arg0, %c0_i32, %c0_i32_0 : i32, i32, i32
  }
  func.func @transform_1(%arg0: i32) -> (i32, i32) {
    %c0_i32 = arith.constant 0 : i32
    %c0_i32_0 = arith.constant 0 : i32
    %c0_i32_1 = arith.constant 0 : i32
    return %c0_i32, %c0_i32_0 : i32, i32
  }
  func.func @transform_2(%arg0: i32) -> (i32, i32, i32, i32) {
    %c0_i32 = arith.constant 0 : i32
    %c0_i32_0 = arith.constant 0 : i32
    %c0_i32_1 = arith.constant 0 : i32
    %c0_i32_2 = arith.constant 0 : i32
    return %arg0, %c0_i32, %c0_i32_0, %c0_i32_1 : i32, i32, i32, i32
  }
}

</mosaic_0001>

<bundles_post_ra>
// kernel: inception_x.2
= control target key start
LH: loop header
LB: loop body
LE: loop exit
PB: predicated region body
PF: predicated region fallthrough
CT: control target
= control target key end

     0   :  { %s2943_s15 = smov 0   ;;  %s3390_s0 = inlined_call_operand.vmem [shape: f32[2,8,640], index: 0, kind: input, shape index: {}]   ;;  %s3391_s1 = inlined_call_operand.vmem [shape: f32[24,392], index: 1, kind: input, shape index: {}]   ;;  %s3392_s2 = inlined_call_operand.vmem [shape: f32[1,384], index: 2, kind: input, shape index: {}]   ;;  %s3393_s3 = inlined_call_operand.vmem [shape: f32[2,24,384], index: 3, kind: output, shape index: {0}]   ;;  %s3394_s4 = inlined_call_operand.vmem [shape: f32[2,48,1], index: 4, kind: output, shape index: {1}]  }
   0x1 LB: > { %s2120_s16 = sadd.s32 4294967295, %s2869_s15   ;;  %p2124_p0 = scmp.ge.s32.totalorder %s2869_s15, 1  ;;  %s2869_s15 = sphi %s2943_s15, %s15_s15  }
   0x2   : > { %p165_p1 = scmp.lt.s32.totalorder %s2869_s15, 3 }
   0x4   : > { %p166_p2 = pnand %p2124_p0, %p165_p1 }
   0x5   : > { %p196_p3 = scmp.lt.s32.totalorder (!%p166_p2), %s2120_s16, 1  ;;  %s2871_s21 = smov (!%p166_p2), 126   ;;  %vm233_vm0 = vcmask (!%p166_p2), 1039360   ;;  %vm259_vm1 = vcmask (!%p166_p2), 1031168   ;;  %vm285_vm2 = vcmask (!%p166_p2), 1022976   ;;  %v1463_v22 = vld [vmem:[%s3391_s1 + $0x8] sm:$0xff] (!%p166_p2) }
   0x6   : > { %169 = sbr.rel (%p166_p2) target bundleno = 703 (0x2bf), region = 32  ;;  %s2872_s22 = smov (!%p166_p2), 127   ;;  %1695 = vmatprep.mubr.f32.mxu0 (!%p166_p2), %v1463_v22  ;;  %1861 = vmatprep.mubr.f32.mxu1 (!%p166_p2), %v1463_v22  ;;  %vm311_vm3 = vcmask (!%p166_p2), 1014784   ;;  %vm337_vm4 = vcmask (!%p166_p2), 1006592   ;;  %vm363_vm5 = vcmask (!%p166_p2), 998400   ;;  %vm389_vm6 = vcmask (!%p166_p2), 867328  }
   0x7   : > { %s2873_s23 = smov (!%p166_p2), 125   ;;  %s2874_s24 = smov (!%p166_p2), 123   ;;  %vm415_vm7 = vcmask (!%p166_p2), 859136   ;;  %vm441_vm8 = vcmask (!%p166_p2), 850944   ;;  %vm467_vm9 = vcmask (!%p166_p2), 842752   ;;  %vm493_vm10 = vcmask (!%p166_p2), 834560  }
   0x8   : > { %s2875_s25 = smov (!%p166_p2), 124   ;;  %s2876_s26 = smov (!%p166_p2), 106   ;;  %vm519_vm11 = vcmask (!%p166_p2), 826368   ;;  %vm545_vm12 = vcmask (!%p166_p2), 818176   ;;  %vm571_vm13 = vcmask (!%p166_p2), 687104   ;;  %vm597_vm14 = vcmask (!%p166_p2), 678912  }
   0x9   : > { %s2877_s27 = smov (!%p166_p2), 122   ;;  %s2878_s28 = smov (!%p166_p2), 104   ;;  %vm623_vm15 = vcmask (!%p166_p2), 670720  }
   0xa   : > { %s2879_s29 = smov (!%p166_p2), 105   ;;  %s2880_s30 = smov (!%p166_p2), 102  }
   0xb   : > { %s2881_s5 = smov (!%p166_p2), 103   ;;  %s2882_s6 = smov (!%p166_p2), 100  }
   0xc   : > { %s2883_s7 = smov (!%p166_p2), 101   ;;  %s2884_s8 = smov (!%p166_p2), 83  }
   0xd   : > { %s3396_s16 = smov (!%p196_p3, %s2120_s16), 1  ;;  %s2885_s9 = smov 84  }
   0xe   : > { %s2335_s17 = smul.u32 40, %s3396_s16  ;;  %s2886_s10 = smov 81  }
   0xf   : > { %s2887_s11 = smov 82   ;;  %s2888_s12 = smov 79  }
  0x10   : > { %s2957_s20 = scalar_lea.vmem %s3390_s0, %s2335_s17  ;;  %s2889_s13 = smov 80  }
  0x11   : > { %v2960_v0 = vld [vmem:[%s2957_s20 + $0x8] sm:$0xff]  ;;  %v245_v1 = vld [vmem:[%s2957_s20 + $0x10] sm:$0xff]  ;;  %v2964_v2 = vld [vmem:[%s2957_s20] sm:$0xff]  ;;  %s2890_s14 = smov 62   ;;  %s2891_s17 = smov 78  }
  0x12   : > { %v2967_v3 = vpack.i.bf16 %v245_v1, %v2960_v0  ;;  %v220_v4 = vld [vmem:[%s2957_s20 + $0x18] sm:$0xff]  ;;  %s2892_s18 = smov 60   ;;  %s2893_s19 = smov 61   ;;  %v3044_v21 = vld [vmem:[%s2957_s20 + $0x10] sm:$0xff] }
  0x13   : > { %v2973_v5 = vpack.i.bf16 %v220_v4, %v2964_v2  ;;  %v2997_v6 = vpack.i.bf16 %v220_v4, %v245_v1 }
  0x14   : > { %2404 = vrot.lane.b32.xlu1 %v2967_v3, %s2871_s21  ;;  %2394 = vrot.lane.b32.xlu0 %v2967_v3, %s2872_s22 }
  0x18   : > { %2409 = vrot.lane.b32.xlu1 %v2967_v3, %s2873_s23  ;;  %2399 = vrot.lane.b32.xlu0 %v2973_v5, %s2872_s22  ;;  %s2895_s22 = smov 59  }
  0x1c   : > { %2419 = vrot.lane.b32.xlu1 %v2973_v5, %s2873_s23  ;;  %2414 = vrot.lane.b32.xlu0 %v2973_v5, %s2871_s21  ;;  %s2894_s21 = smov 58   ;;  %s2896_s23 = smov 56  }
  0x20   : > { %2429 = vrot.lane.b32.xlu1 %v2967_v3, %s2874_s24  ;;  %2424 = vrot.lane.b32.xlu0 %v2967_v3, %s2875_s25 }
  0x24   : > { %2439 = vrot.lane.b32.xlu1 %v2973_v5, %s2874_s24  ;;  %2434 = vrot.lane.b32.xlu0 %v2973_v5, %s2875_s25 }
  0x28   : > { %2449 = vrot.lane.b32.xlu1 %v2967_v3, %s2876_s26  ;;  %2444 = vrot.lane.b32.xlu0 %v2967_v3, %s2877_s27 }
  0x2c   : > { %2459 = vrot.lane.b32.xlu1 %v2973_v5, %s2876_s26  ;;  %2454 = vrot.lane.b32.xlu0 %v2973_v5, %s2877_s27  ;;  %s2897_s26 = smov 57  }
  0x30   : > { %2469 = vrot.lane.b32.xlu1 %v2967_v3, %s2878_s28  ;;  %2464 = vrot.lane.b32.xlu0 %v2967_v3, %s2879_s29 }
  0x34   : > { %2479 = vrot.lane.b32.xlu1 %v2973_v5, %s2878_s28  ;;  %2474 = vrot.lane.b32.xlu0 %v2973_v5, %s2879_s29  ;;  %s2898_s28 = smov 39   ;;  %s2899_s29 = smov 40  }
  0x38   : > { %2489 = vrot.lane.b32.xlu1 %v2967_v3, %s2880_s30  ;;  %2484 = vrot.lane.b32.xlu0 %v2967_v3, %s2881_s5 }
  0x3c   : > { %2499 = vrot.lane.b32.xlu1 %v2973_v5, %s2880_s30  ;;  %2494 = vrot.lane.b32.xlu0 %v2973_v5, %s2881_s5  ;;  %s2900_s30 = smov 37   ;;  %s2901_s5 = smov 38  }
  0x40   : > { %2509 = vrot.lane.b32.xlu1 %v2967_v3, %s2882_s6  ;;  %2504 = vrot.lane.b32.xlu0 %v2967_v3, %s2883_s7 }
  0x44   : > { %2519 = vrot.lane.b32.xlu1 %v2973_v5, %s2882_s6  ;;  %2514 = vrot.lane.b32.xlu0 %v2973_v5, %s2883_s7 }
  0x48   : > { %2529 = vrot.lane.b32.xlu1 %v2967_v3, %s2884_s8  ;;  %2524 = vrot.lane.b32.xlu0 %v2967_v3, %s2885_s9 }
  0x4c   : > { %2539 = vrot.lane.b32.xlu1 %v2973_v5, %s2884_s8  ;;  %2534 = vrot.lane.b32.xlu0 %v2973_v5, %s2885_s9  ;;  %s2902_s8 = smov 35   ;;  %s2903_s9 = smov 36  }
  0x50   : > { %2549 = vrot.lane.b32.xlu1 %v2967_v3, %s2886_s10  ;;  %2544 = vrot.lane.b32.xlu0 %v2967_v3, %s2887_s11 }
  0x54   : > { %2559 = vrot.lane.b32.xlu1 %v2973_v5, %s2886_s10  ;;  %2554 = vrot.lane.b32.xlu0 %v2973_v5, %s2887_s11  ;;  %s2904_s10 = smov 18   ;;  %s2905_s11 = smov 34  }
  0x58   : > { %2569 = vrot.lane.b32.xlu1 %v2967_v3, %s2888_s12  ;;  %2564 = vrot.lane.b32.xlu0 %v2967_v3, %s2889_s13 }
  0x5c   : > { %2579 = vrot.lane.b32.xlu1 %v2973_v5, %s2888_s12  ;;  %2574 = vrot.lane.b32.xlu0 %v2973_v5, %s2889_s13  ;;  %s2906_s12 = smov 16   ;;  %s2907_s13 = smov 17  }
  0x60   : > { %2589 = vrot.lane.b32.xlu1 %v2967_v3, %s2890_s14  ;;  %2584 = vrot.lane.b32.xlu0 %v2967_v3, %s2891_s17 }
  0x64   : > { %2599 = vrot.lane.b32.xlu1 %v2973_v5, %s2890_s14  ;;  %2594 = vrot.lane.b32.xlu0 %v2973_v5, %s2891_s17  ;;  %s2908_s14 = smov 14   ;;  %s2909_s17 = smov 15  }
  0x68   : > { %2609 = vrot.lane.b32.xlu1 %v2967_v3, %s2892_s18  ;;  %2604 = vrot.lane.b32.xlu0 %v2967_v3, %s2893_s19 }
  0x6c   : > { %2619 = vrot.lane.b32.xlu1 %v2973_v5, %s2892_s18  ;;  %2614 = vrot.lane.b32.xlu0 %v2973_v5, %s2893_s19  ;;  %s2910_s18 = smov 12   ;;  %s2911_s19 = smov 13  }
  0x70   : > { %2629 = vrot.lane.b32.xlu1 %v2967_v3, %s2894_s21  ;;  %2624 = vrot.lane.b32.xlu0 %v2967_v3, %s2895_s22 }
  0x74   : > { %2639 = vrot.lane.b32.xlu1 %v2973_v5, %s2894_s21  ;;  %2634 = vrot.lane.b32.xlu0 %v2973_v5, %s2895_s22 }
  0x78   : > { %2649 = vrot.lane.b32.xlu1 %v2967_v3, %s2896_s23  ;;  %2644 = vrot.lane.b32.xlu0 %v2967_v3, %s2897_s26 }
  0x7c   : > { %2659 = vrot.lane.b32.xlu1 %v2973_v5, %s2896_s23  ;;  %2654 = vrot.lane.b32.xlu0 %v2973_v5, %s2897_s26 }
  0x80   : > { %2669 = vrot.lane.b32.xlu1 %v2967_v3, %s2898_s28  ;;  %2664 = vrot.lane.b32.xlu0 %v2967_v3, %s2899_s29 }
  0x84   : > { %2679 = vrot.lane.b32.xlu1 %v2973_v5, %s2898_s28  ;;  %2674 = vrot.lane.b32.xlu0 %v2973_v5, %s2899_s29  ;;  %s2337_s28 = smul.u32 48, %s3396_s16 }
  0x86   : > { %v2405_v7 = vpop.permute.xlu1 %2404  ;;  %v2395_v8 = vpop.permute.xlu0 %2394 }
  0x87   : > { %v2397_v9 = vunpack.i.h.bf16 %v2395_v8  ;;  %v2396_v10 = vunpack.i.l.bf16 %v2395_v8  ;;  %v2407_v11 = vunpack.i.h.bf16 %v2405_v7  ;;  %v2406_v12 = vunpack.i.l.bf16 %v2405_v7 }
  0x88   : > { %2689 = vrot.lane.b32.xlu1 %v2967_v3, %s2900_s30  ;;  %2684 = vrot.lane.b32.xlu0 %v2967_v3, %s2901_s5 }
  0x89   : > { %v235_v13 = vsel %vm233_vm0, %v2396_v10, %v2397_v9  ;;  %v261_v23 = vsel %vm259_vm1, %v2406_v12, %v2407_v11 }
  0x8a   : > { %v2410_v14 = vpop.permute.xlu1 %2409  ;;  %v2400_v15 = vpop.permute.xlu0 %2399  ;;  %v2177_v16 = vpack.c.bf16 %v235_v13, %v2960_v0 }
  0x8b   : > { %v2412_v17 = vunpack.i.h.bf16 %v2410_v14  ;;  %v2411_v18 = vunpack.i.l.bf16 %v2410_v14  ;;  %v2402_v19 = vunpack.i.h.bf16 %v2400_v15  ;;  %v2401_v20 = vunpack.i.l.bf16 %v2400_v15 }
  0x8c   : > { %2699 = vrot.lane.b32.xlu1 %v2973_v5, %s2900_s30  ;;  %2694 = vrot.lane.b32.xlu0 %v2973_v5, %s2901_s5  ;;  %s210_s5 = scalar_lea.vmem %s3394_s4, %s2337_s28 }
  0x8d   : > { %2178 = vmatprep.subr.bf16.mxu0 %v2177_v16  ;;  %v234_v24 = vsel %vm233_vm0, %v2401_v20, %v2396_v10  ;;  %v287_v25 = vsel %vm285_vm2, %v2411_v18, %v2412_v17  ;;  %v3055_v26 = vsel %vm233_vm0, %v2397_v9, %v2402_v19  ;;  %vm649_vm0 = vcmask 662528  }
  0x8e   : > { %v2420_v27 = vpop.permute.xlu1 %2419  ;;  %v2415_v28 = vpop.permute.xlu0 %2414  ;;  %v2179_v29 = vpack.c.bf16 %v234_v24, %v2964_v2  ;;  %v2181_v30 = vpack.c.bf16 %v287_v25, %v261_v23  ;;  %v2275_v31 = vpack.c.bf16 %v3055_v26, %v3044_v21 }
  0x8f   : > { %v2422_v32 = vunpack.i.h.bf16 %v2420_v27  ;;  %v2421_v33 = vunpack.i.l.bf16 %v2420_v27  ;;  %v2417_v34 = vunpack.i.h.bf16 %v2415_v28  ;;  %v2416_v35 = vunpack.i.l.bf16 %v2415_v28 }
  0x90   : > { %2709 = vrot.lane.b32.xlu1 %v2967_v3, %s2902_s8  ;;  %2704 = vrot.lane.b32.xlu0 %v2967_v3, %s2903_s9 }
  0x91   : > { %2180 = vmatpush1.bf16.msra.mxu0 %v2179_v29  ;;  %v260_v36 = vsel %vm259_vm1, %v2416_v35, %v2406_v12  ;;  %v286_v37 = vsel %vm285_vm2, %v2421_v33, %v2411_v18  ;;  %v3065_v38 = vsel %vm259_vm1, %v2407_v11, %v2417_v34  ;;  %v3068_v39 = vsel %vm285_vm2, %v2412_v17, %v2422_v32 }
  0x92   : > { %2182 = vmatprep.subr.bf16.mxu0 %v2181_v30  ;;  %v2430_v40 = vpop.permute.xlu1 %2429  ;;  %v2425_v41 = vpop.permute.xlu0 %2424  ;;  %v2183_v42 = vpack.c.bf16 %v286_v37, %v260_v36  ;;  %v2279_v43 = vpack.c.bf16 %v3068_v39, %v3065_v38  ;;  %vm675_vm1 = vcmask 654336   ;;  %vm701_vm2 = vcmask 646144  }
  0x93   : > { %v2432_v44 = vunpack.i.h.bf16 %v2430_v40  ;;  %v2431_v45 = vunpack.i.l.bf16 %v2430_v40  ;;  %v2427_v46 = vunpack.i.h.bf16 %v2425_v41  ;;  %v2426_v47 = vunpack.i.l.bf16 %v2425_v41 }
  0x94   : > { %2719 = vrot.lane.b32.xlu1 %v2973_v5, %s2902_s8  ;;  %2714 = vrot.lane.b32.xlu0 %v2973_v5, %s2903_s9 }
  0x95   : > { %2184 = vmatpush1.bf16.msra.mxu0 %v2183_v42  ;;  %v313_v48 = vsel %vm311_vm3, %v2426_v47, %v2427_v46  ;;  %v339_v49 = vsel %vm337_vm4, %v2431_v45, %v2432_v44 }
  0x96   : > { %v2440_v50 = vpop.permute.xlu1 %2439  ;;  %v2435_v51 = vpop.permute.xlu0 %2434  ;;  %v2185_v52 = vpack.c.bf16 %v339_v49, %v313_v48 }
  0x97   : > { %v2442_v53 = vunpack.i.h.bf16 %v2440_v50  ;;  %v2441_v54 = vunpack.i.l.bf16 %v2440_v50  ;;  %v2437_v55 = vunpack.i.h.bf16 %v2435_v51  ;;  %v2436_v56 = vunpack.i.l.bf16 %v2435_v51 }
  0x98   : > { %2729 = vrot.lane.b32.xlu1 %v2967_v3, %s2904_s10  ;;  %2724 = vrot.lane.b32.xlu0 %v2967_v3, %s2905_s11 }
  0x99   : > { %2186 = vmatprep.subr.bf16.mxu0 %v2185_v52  ;;  %v312_v57 = vsel %vm311_vm3, %v2436_v56, %v2426_v47  ;;  %v338_v58 = vsel %vm337_vm4, %v2441_v54, %v2431_v45  ;;  %v3081_v59 = vsel %vm311_vm3, %v2427_v46, %v2437_v55  ;;  %v3084_v60 = vsel %vm337_vm4, %v2432_v44, %v2442_v53 }
  0x9a   : > { %v2450_v61 = vpop.permute.xlu1 %2449  ;;  %v2445_v62 = vpop.permute.xlu0 %2444  ;;  %v2187_v63 = vpack.c.bf16 %v338_v58, %v312_v57  ;;  %v2283_v0 = vpack.c.bf16 %v3084_v60, %v3081_v59 }
  0x9b   : > { %v2452_v1 = vunpack.i.h.bf16 %v2450_v61  ;;  %v2451_v2 = vunpack.i.l.bf16 %v2450_v61  ;;  %v2447_v4 = vunpack.i.h.bf16 %v2445_v62  ;;  %v2446_v7 = vunpack.i.l.bf16 %v2445_v62 }
  0x9c   : > { %2739 = vrot.lane.b32.xlu1 %v2973_v5, %s2904_s10  ;;  %2734 = vrot.lane.b32.xlu0 %v2973_v5, %s2905_s11 }
  0x9d   : > { %2188 = vmatpush1.bf16.msra.mxu0 %v2187_v63  ;;  %v365_v8 = vsel %vm363_vm5, %v2446_v7, %v2447_v4  ;;  %v391_v9 = vsel %vm389_vm6, %v2451_v2, %v2452_v1 }
  0x9e   : > { %v2460_v10 = vpop.permute.xlu1 %2459  ;;  %v2455_v11 = vpop.permute.xlu0 %2454  ;;  %v2189_v12 = vpack.c.bf16 %v391_v9, %v365_v8 }
  0x9f   : > { %v2462_v13 = vunpack.i.h.bf16 %v2460_v10  ;;  %v2461_v14 = vunpack.i.l.bf16 %v2460_v10  ;;  %v2457_v15 = vunpack.i.h.bf16 %v2455_v11  ;;  %v2456_v16 = vunpack.i.l.bf16 %v2455_v11 }
  0xa0   : > { %2749 = vrot.lane.b32.xlu1 %v2967_v3, %s2906_s12  ;;  %2744 = vrot.lane.b32.xlu0 %v2967_v3, %s2907_s13 }
  0xa1   : > { %2190 = vmatprep.subr.bf16.mxu0 %v2189_v12  ;;  %v364_v17 = vsel %vm363_vm5, %v2456_v16, %v2446_v7  ;;  %v390_v18 = vsel %vm389_vm6, %v2461_v14, %v2451_v2  ;;  %v3097_v19 = vsel %vm363_vm5, %v2447_v4, %v2457_v15  ;;  %v3100_v20 = vsel %vm389_vm6, %v2452_v1, %v2462_v13 }
  0xa2   : > { %v2470_v22 = vpop.permute.xlu1 %2469  ;;  %v2465_v23 = vpop.permute.xlu0 %2464  ;;  %v2191_v24 = vpack.c.bf16 %v390_v18, %v364_v17  ;;  %v2287_v25 = vpack.c.bf16 %v3100_v20, %v3097_v19  ;;  %vm727_vm6 = vcmask 637952  }
  0xa3   : > { %v2472_v27 = vunpack.i.h.bf16 %v2470_v22  ;;  %v2471_v28 = vunpack.i.l.bf16 %v2470_v22  ;;  %v2467_v29 = vunpack.i.h.bf16 %v2465_v23  ;;  %v2466_v30 = vunpack.i.l.bf16 %v2465_v23  ;;  %v3141_v23 = vld [vmem:[%s2957_s20 + $0x8] sm:$0xff] }
  0xa4   : > { %2759 = vrot.lane.b32.xlu1 %v2973_v5, %s2906_s12  ;;  %2754 = vrot.lane.b32.xlu0 %v2973_v5, %s2907_s13 }
  0xa5   : > { %2192 = vmatpush1.bf16.msra.mxu0 %v2191_v24  ;;  %v417_v32 = vsel %vm415_vm7, %v2466_v30, %v2467_v29  ;;  %v443_v33 = vsel %vm441_vm8, %v2471_v28, %v2472_v27  ;;  %v3144_v24 = vld [vmem:[%s2957_s20 + $0x20] sm:$0xff] }
  0xa6   : > { %v2480_v34 = vpop.permute.xlu1 %2479  ;;  %v2475_v35 = vpop.permute.xlu0 %2474  ;;  %v2193_v36 = vpack.c.bf16 %v443_v33, %v417_v32 }
  0xa7   : > { %v2482_v37 = vunpack.i.h.bf16 %v2480_v34  ;;  %v2481_v40 = vunpack.i.l.bf16 %v2480_v34  ;;  %v2477_v41 = vunpack.i.h.bf16 %v2475_v35  ;;  %v2476_v42 = vunpack.i.l.bf16 %v2475_v35 }
  0xa8   : > { %2769 = vrot.lane.b32.xlu1 %v2967_v3, %s2908_s14  ;;  %2764 = vrot.lane.b32.xlu0 %v2967_v3, %s2909_s17 }
  0xa9   : > { %2194 = vmatprep.subr.bf16.mxu0 %v2193_v36  ;;  %v416_v44 = vsel %vm415_vm7, %v2476_v42, %v2466_v30  ;;  %v442_v45 = vsel %vm441_vm8, %v2481_v40, %v2471_v28  ;;  %v3113_v46 = vsel %vm415_vm7, %v2467_v29, %v2477_v41  ;;  %v3116_v47 = vsel %vm441_vm8, %v2472_v27, %v2482_v37  ;;  %v3157_v37 = vld [vmem:[%s2957_s20 + $0x18] sm:$0xff]  ;;  %s2912_s20 = smov 121  }
  0xaa   : > { %v2490_v48 = vpop.permute.xlu1 %2489  ;;  %v2485_v49 = vpop.permute.xlu0 %2484  ;;  %v2195_v50 = vpack.c.bf16 %v442_v45, %v416_v44  ;;  %v2291_v51 = vpack.c.bf16 %v3116_v47, %v3113_v46  ;;  %vm753_vm7 = vcmask 506880   ;;  %vm779_vm8 = vcmask 498688  }
  0xab   : > { %v2492_v52 = vunpack.i.h.bf16 %v2490_v48  ;;  %v2491_v53 = vunpack.i.l.bf16 %v2490_v48  ;;  %v2487_v54 = vunpack.i.h.bf16 %v2485_v49  ;;  %v2486_v55 = vunpack.i.l.bf16 %v2485_v49 }
  0xac   : > { %2779 = vrot.lane.b32.xlu1 %v2973_v5, %s2908_s14  ;;  %2774 = vrot.lane.b32.xlu0 %v2973_v5, %s2909_s17 }
  0xad   : > { %2196 = vmatpush1.bf16.msra.mxu0 %v2195_v50  ;;  %v469_v56 = vsel %vm467_vm9, %v2486_v55, %v2487_v54  ;;  %v495_v57 = vsel %vm493_vm10, %v2491_v53, %v2492_v52 }
  0xae   : > { %v2500_v58 = vpop.permute.xlu1 %2499  ;;  %v2495_v61 = vpop.permute.xlu0 %2494  ;;  %v2197_v62 = vpack.c.bf16 %v495_v57, %v469_v56 }
  0xaf   : > { %v2502_v63 = vunpack.i.h.bf16 %v2500_v58  ;;  %v2501_v1 = vunpack.i.l.bf16 %v2500_v58  ;;  %v2497_v2 = vunpack.i.h.bf16 %v2495_v61  ;;  %v2496_v4 = vunpack.i.l.bf16 %v2495_v61 }
  0xb0   : > { %2789 = vrot.lane.b32.xlu1 %v2967_v3, %s2910_s18  ;;  %2784 = vrot.lane.b32.xlu0 %v2967_v3, %s2911_s19 }
  0xb1   : > { %2198 = vmatprep.subr.bf16.mxu0 %v2197_v62  ;;  %v468_v7 = vsel %vm467_vm9, %v2496_v4, %v2486_v55  ;;  %v494_v8 = vsel %vm493_vm10, %v2501_v1, %v2491_v53  ;;  %v3129_v9 = vsel %vm467_vm9, %v2487_v54, %v2497_v2  ;;  %v3132_v10 = vsel %vm493_vm10, %v2492_v52, %v2502_v63 }
  0xb2   : > { %v2510_v11 = vpop.permute.xlu1 %2509  ;;  %v2505_v12 = vpop.permute.xlu0 %2504  ;;  %v2199_v13 = vpack.c.bf16 %v494_v8, %v468_v7  ;;  %v2295_v3 = vpack.c.bf16 %v3132_v10, %v3129_v9  ;;  %v2828_v53 = vpack.i.bf16 %v3157_v37, %v3044_v21  ;;  %vm805_vm9 = vcmask 490496  }
  0xb3   : > { %v2512_v14 = vunpack.i.h.bf16 %v2510_v11  ;;  %v2511_v15 = vunpack.i.l.bf16 %v2510_v11  ;;  %v2507_v16 = vunpack.i.h.bf16 %v2505_v12  ;;  %v2506_v17 = vunpack.i.l.bf16 %v2505_v12 }
  0xb4   : > { %2799 = vrot.lane.b32.xlu1 %v2973_v5, %s2910_s18  ;;  %2794 = vrot.lane.b32.xlu0 %v2973_v5, %s2911_s19  ;;  %v3152_v5 = vpack.i.bf16 %v3144_v24, %v3141_v23  ;;  %vm831_vm10 = vcmask 482304  }
  0xb5   : > { %2200 = vmatpush1.bf16.msra.mxu0 %v2199_v13  ;;  %v521_v18 = vsel %vm519_vm11, %v2506_v17, %v2507_v16  ;;  %v547_v22 = vsel %vm545_vm12, %v2511_v15, %v2512_v14 }
  0xb6   : > { %v2520_v27 = vpop.permute.xlu1 %2519  ;;  %v2515_v28 = vpop.permute.xlu0 %2514  ;;  %v2201_v29 = vpack.c.bf16 %v547_v22, %v521_v18 }
  0xb7   : > { %v2522_v30 = vunpack.i.h.bf16 %v2520_v27  ;;  %v2521_v32 = vunpack.i.l.bf16 %v2520_v27  ;;  %v2517_v33 = vunpack.i.h.bf16 %v2515_v28  ;;  %v2516_v34 = vunpack.i.l.bf16 %v2515_v28 }
  0xb8   : > { %2809 = vrot.lane.b32.xlu1 %v2997_v6, %s2874_s24  ;;  %2804 = vrot.lane.b32.xlu0 %v2997_v6, %s2875_s25 }
  0xb9   : > { %2202 = vmatprep.subr.bf16.mxu0 %v2201_v29  ;;  %v520_v35 = vsel %vm519_vm11, %v2516_v34, %v2506_v17  ;;  %v546_v36 = vsel %vm545_vm12, %v2521_v32, %v2511_v15  ;;  %v3160_v40 = vsel %vm519_vm11, %v2507_v16, %v2517_v33  ;;  %v3163_v41 = vsel %vm545_vm12, %v2512_v14, %v2522_v30 }
  0xba   : > { %v2530_v42 = vpop.permute.xlu1 %2529  ;;  %v2525_v44 = vpop.permute.xlu0 %2524  ;;  %v2203_v6 = vpack.c.bf16 %v546_v36, %v520_v35  ;;  %v2299_v45 = vpack.c.bf16 %v3163_v41, %v3160_v40  ;;  %vm857_vm11 = vcmask 474112   ;;  %vm883_vm12 = vcmask 465920  }
  0xbb   : > { %v2532_v48 = vunpack.i.h.bf16 %v2530_v42  ;;  %v2531_v49 = vunpack.i.l.bf16 %v2530_v42  ;;  %v2527_v50 = vunpack.i.h.bf16 %v2525_v44  ;;  %v2526_v52 = vunpack.i.l.bf16 %v2525_v44 }
  0xbc   : > { %2819 = vrot.lane.b32.xlu1 %v3152_v5, %s2874_s24  ;;  %2814 = vrot.lane.b32.xlu0 %v3152_v5, %s2875_s25  ;;  %s2913_s24 = smov 119   ;;  %s2914_s25 = smov 120  }
  0xbd   : > { %2204 = vmatpush1.bf16.msra.mxu0 %v2203_v6  ;;  %v573_v54 = vsel %vm571_vm13, %v2526_v52, %v2527_v50  ;;  %v599_v55 = vsel %vm597_vm14, %v2531_v49, %v2532_v48 }
  0xbe   : > { %v2540_v56 = vpop.permute.xlu1 %2539  ;;  %v2535_v57 = vpop.permute.xlu0 %2534  ;;  %v2205_v58 = vpack.c.bf16 %v599_v55, %v573_v54 }
  0xbf   : > { %v2542_v61 = vunpack.i.h.bf16 %v2540_v56  ;;  %v2541_v62 = vunpack.i.l.bf16 %v2540_v56  ;;  %v2537_v63 = vunpack.i.h.bf16 %v2535_v57  ;;  %v2536_v1 = vunpack.i.l.bf16 %v2535_v57 }
  0xc0   : > { %2829 = vrot.lane.b32.xlu1 %v2828_v53, %s2912_s20  ;;  %2824 = vrot.lane.b32.xlu0 %v2828_v53, %s2877_s27 }
  0xc1   : > { %2206 = vmatprep.subr.bf16.mxu0 %v2205_v58  ;;  %v572_v2 = vsel %vm571_vm13, %v2536_v1, %v2526_v52  ;;  %v598_v4 = vsel %vm597_vm14, %v2541_v62, %v2531_v49  ;;  %v3179_v7 = vsel %vm571_vm13, %v2527_v50, %v2537_v63  ;;  %v3182_v8 = vsel %vm597_vm14, %v2532_v48, %v2542_v61 }
  0xc2   : > { %v2550_v11 = vpop.permute.xlu1 %2549  ;;  %v2545_v12 = vpop.permute.xlu0 %2544  ;;  %v2207_v13 = vpack.c.bf16 %v598_v4, %v572_v2  ;;  %v2303_v14 = vpack.c.bf16 %v3182_v8, %v3179_v7  ;;  %vm909_vm13 = vcmask 457728   ;;  %vm935_vm14 = vcmask 326656   ;;  %v1466_v7 = vld [vmem:[%s3391_s1 + $0x20] sm:$0xff] }
  0xc3   : > { %v2552_v15 = vunpack.i.h.bf16 %v2550_v11  ;;  %v2551_v16 = vunpack.i.l.bf16 %v2550_v11  ;;  %v2547_v17 = vunpack.i.h.bf16 %v2545_v12  ;;  %v2546_v18 = vunpack.i.l.bf16 %v2545_v12 }
  0xc4   : > { %2839 = vrot.lane.b32.xlu1 %v3152_v5, %s2912_s20  ;;  %2834 = vrot.lane.b32.xlu0 %v3152_v5, %s2877_s27  ;;  %s2915_s27 = smov 118  }
  0xc5   : > { %2208 = vmatpush1.bf16.msra.mxu0 %v2207_v13  ;;  %v625_v22 = vsel %vm623_vm15, %v2546_v18, %v2547_v17  ;;  %v651_v27 = vsel %vm649_vm0, %v2551_v16, %v2552_v15 }
  0xc6   : > { %v2560_v28 = vpop.permute.xlu1 %2559  ;;  %v2555_v29 = vpop.permute.xlu0 %2554  ;;  %v2209_v30 = vpack.c.bf16 %v651_v27, %v625_v22 }
  0xc7   : > { %v2562_v32 = vunpack.i.h.bf16 %v2560_v28  ;;  %v2561_v33 = vunpack.i.l.bf16 %v2560_v28  ;;  %v2557_v34 = vunpack.i.h.bf16 %v2555_v29  ;;  %v2556_v35 = vunpack.i.l.bf16 %v2555_v29 }
  0xc8   : > { %2849 = vrot.lane.b32.xlu1 %v2828_v53, %s2913_s24  ;;  %2844 = vrot.lane.b32.xlu0 %v2828_v53, %s2914_s25 }
  0xc9   : > { %2210 = vmatprep.subr.bf16.mxu0 %v2209_v30  ;;  %v624_v36 = vsel %vm623_vm15, %v2556_v35, %v2546_v18  ;;  %v650_v42 = vsel %vm649_vm0, %v2561_v33, %v2551_v16  ;;  %v626_v44 = vsel %vm623_vm15, %v2547_v17, %v2557_v34  ;;  %v652_v6 = vsel %vm649_vm0, %v2552_v15, %v2562_v32 }
  0xca   : > { %v2570_v48 = vpop.permute.xlu1 %2569  ;;  %v2565_v49 = vpop.permute.xlu0 %2564  ;;  %v2211_v50 = vpack.c.bf16 %v650_v42, %v624_v36  ;;  %v2273_v52 = vpack.c.bf16 %v652_v6, %v626_v44  ;;  %vm961_vm15 = vcmask 318464   ;;  %vm987_vm0 = vcmask 310272  }
  0xcb   : > { %v2572_v54 = vunpack.i.h.bf16 %v2570_v48  ;;  %v2571_v55 = vunpack.i.l.bf16 %v2570_v48  ;;  %v2567_v56 = vunpack.i.h.bf16 %v2565_v49  ;;  %v2566_v57 = vunpack.i.l.bf16 %v2565_v49 }
  0xcc   : > { %2859 = vrot.lane.b32.xlu1 %v3152_v5, %s2913_s24  ;;  %2854 = vrot.lane.b32.xlu0 %v3152_v5, %s2914_s25  ;;  %s2336_s25 = smul.u32 72, %s3396_s16 }
  0xcd   : > { %2212 = vmatpush1.bf16.msra.mxu0 %v2211_v50  ;;  %2274 = vmatprep.subr.bf16.mxu1 %v2273_v52  ;;  %v677_v53 = vsel %vm675_vm1, %v2566_v57, %v2567_v56  ;;  %v703_v58 = vsel %vm701_vm2, %v2571_v55, %v2572_v54 }
  0xce   : > { %2276 = vmatpush3.bf16.msra.mxu1 %v2275_v31  ;;  %v2580_v61 = vpop.permute.xlu1 %2579  ;;  %v2575_v62 = vpop.permute.xlu0 %2574  ;;  %v2213_v63 = vpack.c.bf16 %v703_v58, %v677_v53  ;;  %s3372_s26 = scalar_lea.vmem %s3393_s3, %s2336_s25 }
  0xcf   : > { %v2582_v1 = vunpack.i.h.bf16 %v2580_v61  ;;  %v2581_v2 = vunpack.i.l.bf16 %v2580_v61  ;;  %v2577_v4 = vunpack.i.h.bf16 %v2575_v62  ;;  %v2576_v11 = vunpack.i.l.bf16 %v2575_v62 }
  0xd0   : > { %1448 = vrot.lane.b32.xlu1 %v3157_v37, %s2915_s27  ;;  %1446 = vrot.lane.b32.xlu0 %v3044_v21, %s2915_s27 }
  0xd1   : > { %2214 = vmatprep.subr.bf16.mxu0 %v2213_v63  ;;  %v676_v5 = vsel %vm675_vm1, %v2576_v11, %v2566_v57  ;;  %v702_v12 = vsel %vm701_vm2, %v2581_v2, %v2571_v55  ;;  %v678_v26 = vsel %vm675_vm1, %v2567_v56, %v2577_v4  ;;  %v704_v31 = vsel %vm701_vm2, %v2572_v54, %v2582_v1 }
  0xd2   : > { %v2590_v13 = vpop.permute.xlu1 %2589  ;;  %v2585_v15 = vpop.permute.xlu0 %2584  ;;  %v2215_v16 = vpack.c.bf16 %v702_v12, %v676_v5  ;;  %v2277_v17 = vpack.c.bf16 %v704_v31, %v678_v26  ;;  %vm1013_vm1 = vcmask 302080   ;;  %vm1065_vm2 = vcmask 285696  }
  0xd3   : > { %v2592_v18 = vunpack.i.h.bf16 %v2590_v13  ;;  %v2591_v22 = vunpack.i.l.bf16 %v2590_v13  ;;  %v2587_v37 = vunpack.i.h.bf16 %v2585_v15  ;;  %v2586_v27 = vunpack.i.l.bf16 %v2585_v15 }
  0xd4   : > { %1450 = vrot.lane.b32.xlu1 %v3144_v24, %s2915_s27  ;;  %1444 = vrot.lane.b32.xlu0 %v3141_v23, %s2915_s27 }
  0xd5   : > { %2216 = vmatpush1.bf16.msra.mxu0 %v2215_v16  ;;  %2278 = vmatprep.subr.bf16.mxu1 %v2277_v17  ;;  %v729_v21 = vsel %vm727_vm6, %v2586_v27, %v2587_v37  ;;  %v755_v28 = vsel %vm753_vm7, %v2591_v22, %v2592_v18 }
  0xd6   : > { %2280 = vmatpush3.bf16.msra.mxu1 %v2279_v43  ;;  %v2600_v29 = vpop.permute.xlu1 %2599  ;;  %v2595_v30 = vpop.permute.xlu0 %2594  ;;  %v2217_v32 = vpack.c.bf16 %v755_v28, %v729_v21 }
  0xd7   : > { %v2602_v33 = vunpack.i.h.bf16 %v2600_v29  ;;  %v2601_v34 = vunpack.i.l.bf16 %v2600_v29  ;;  %v2597_v35 = vunpack.i.h.bf16 %v2595_v30  ;;  %v2596_v36 = vunpack.i.l.bf16 %v2595_v30 }
  0xd8   : > { %2218 = vmatprep.subr.bf16.mxu0 %v2217_v32 }
  0xd9   : > { %v728_v23 = vsel %vm727_vm6, %v2596_v36, %v2586_v27  ;;  %v754_v24 = vsel %vm753_vm7, %v2601_v34, %v2591_v22  ;;  %v730_v42 = vsel %vm727_vm6, %v2587_v37, %v2597_v35  ;;  %v756_v44 = vsel %vm753_vm7, %v2592_v18, %v2602_v33 }
  0xda   : > { %v2610_v6 = vpop.permute.xlu1 %2609  ;;  %v2605_v48 = vpop.permute.xlu0 %2604  ;;  %v2219_v38 = vpack.c.bf16 %v754_v24, %v728_v23  ;;  %v2281_v39 = vpack.c.bf16 %v756_v44, %v730_v42  ;;  %vm1039_vm6 = vcmask 293888   ;;  %vm1117_vm7 = vcmask 146432  }
  0xdb   : > { %v2612_v43 = vunpack.i.h.bf16 %v2610_v6  ;;  %v2611_v49 = vunpack.i.l.bf16 %v2610_v6  ;;  %v2607_v50 = vunpack.i.h.bf16 %v2605_v48  ;;  %v2606_v52 = vunpack.i.l.bf16 %v2605_v48 }
  0xdc   : > { %2220 = vmatpush1.bf16.msra.mxu0 %v2219_v38  ;;  %2282 = vmatprep.subr.bf16.mxu1 %v2281_v39 }
  0xdd   : > { %2284 = vmatpush3.bf16.msra.mxu1 %v2283_v0  ;;  %v781_v54 = vsel %vm779_vm8, %v2606_v52, %v2607_v50  ;;  %v807_v55 = vsel %vm805_vm9, %v2611_v49, %v2612_v43 }
  0xde   : > { %v2620_v56 = vpop.permute.xlu1 %2619  ;;  %v2615_v57 = vpop.permute.xlu0 %2614  ;;  %v2221_v53 = vpack.c.bf16 %v807_v55, %v781_v54 }
  0xdf   : > { %v2622_v58 = vunpack.i.h.bf16 %v2620_v56  ;;  %v2621_v61 = vunpack.i.l.bf16 %v2620_v56  ;;  %v2617_v62 = vunpack.i.h.bf16 %v2615_v57  ;;  %v2616_v63 = vunpack.i.l.bf16 %v2615_v57 }
  0xe0   : > { %2222 = vmatprep.subr.bf16.mxu0 %v2221_v53 }
  0xe1   : > { %v780_v1 = vsel %vm779_vm8, %v2616_v63, %v2606_v52  ;;  %v806_v2 = vsel %vm805_vm9, %v2621_v61, %v2611_v49  ;;  %v782_v4 = vsel %vm779_vm8, %v2607_v50, %v2617_v62  ;;  %v808_v59 = vsel %vm805_vm9, %v2612_v43, %v2622_v58 }
  0xe2   : > { %v2630_v60 = vpop.permute.xlu1 %2629  ;;  %v2625_v0 = vpop.permute.xlu0 %2624  ;;  %v2223_v11 = vpack.c.bf16 %v806_v2, %v780_v1  ;;  %v2285_v5 = vpack.c.bf16 %v808_v59, %v782_v4  ;;  %vm1091_vm8 = vcmask 277504   ;;  %vm1621_vm9 = vcmask 64512  }
  0xe3   : > { %v2632_v12 = vunpack.i.h.bf16 %v2630_v60  ;;  %v2631_v26 = vunpack.i.l.bf16 %v2630_v60  ;;  %v2627_v31 = vunpack.i.h.bf16 %v2625_v0  ;;  %v2626_v13 = vunpack.i.l.bf16 %v2625_v0 }
  0xe4   : > { %2224 = vmatpush1.bf16.msra.mxu0 %v2223_v11  ;;  %2286 = vmatprep.subr.bf16.mxu1 %v2285_v5 }
  0xe5   : > { %2288 = vmatpush3.bf16.msra.mxu1 %v2287_v25  ;;  %v833_v15 = vsel %vm831_vm10, %v2626_v13, %v2627_v31  ;;  %v859_v16 = vsel %vm857_vm11, %v2631_v26, %v2632_v12 }
  0xe6   : > { %v2640_v17 = vpop.permute.xlu1 %2639  ;;  %v2635_v18 = vpop.permute.xlu0 %2634  ;;  %v2225_v22 = vpack.c.bf16 %v859_v16, %v833_v15 }
  0xe7   : > { %v2642_v37 = vunpack.i.h.bf16 %v2640_v17  ;;  %v2641_v27 = vunpack.i.l.bf16 %v2640_v17  ;;  %v2637_v21 = vunpack.i.h.bf16 %v2635_v18  ;;  %v2636_v28 = vunpack.i.l.bf16 %v2635_v18 }
  0xe8   : > { %2226 = vmatprep.subr.bf16.mxu0 %v2225_v22 }
  0xe9   : > { %v832_v29 = vsel %vm831_vm10, %v2636_v28, %v2626_v13  ;;  %v858_v30 = vsel %vm857_vm11, %v2641_v27, %v2631_v26  ;;  %v834_v32 = vsel %vm831_vm10, %v2627_v31, %v2637_v21  ;;  %v860_v19 = vsel %vm857_vm11, %v2632_v12, %v2642_v37 }
  0xea   : > { %v2650_v20 = vpop.permute.xlu1 %2649  ;;  %v2645_v25 = vpop.permute.xlu0 %2644  ;;  %v2227_v33 = vpack.c.bf16 %v858_v30, %v832_v29  ;;  %v2289_v34 = vpack.c.bf16 %v860_v19, %v834_v32  ;;  %vm1169_vm10 = vcmask 130048   ;;  %vm1143_vm11 = vcmask 138240  }
  0xeb   : > { %v2652_v35 = vunpack.i.h.bf16 %v2650_v20  ;;  %v2651_v36 = vunpack.i.l.bf16 %v2650_v20  ;;  %v2647_v23 = vunpack.i.h.bf16 %v2645_v25  ;;  %v2646_v24 = vunpack.i.l.bf16 %v2645_v25 }
  0xec   : > { %2228 = vmatpush1.bf16.msra.mxu0 %v2227_v33  ;;  %2290 = vmatprep.subr.bf16.mxu1 %v2289_v34 }
  0xed   : > { %2292 = vmatpush3.bf16.msra.mxu1 %v2291_v51  ;;  %v885_v42 = vsel %vm883_vm12, %v2646_v24, %v2647_v23  ;;  %v911_v44 = vsel %vm909_vm13, %v2651_v36, %v2652_v35 }
  0xee   : > { %v2660_v6 = vpop.permute.xlu1 %2659  ;;  %v2655_v48 = vpop.permute.xlu0 %2654  ;;  %v2229_v38 = vpack.c.bf16 %v911_v44, %v885_v42 }
  0xef   : > { %v2662_v39 = vunpack.i.h.bf16 %v2660_v6  ;;  %v2661_v43 = vunpack.i.l.bf16 %v2660_v6  ;;  %v2657_v49 = vunpack.i.h.bf16 %v2655_v48  ;;  %v2656_v50 = vunpack.i.l.bf16 %v2655_v48  ;;  %v1462_v6 = vld [vmem:[%s3391_s1] sm:$0xff] }
  0xf0   : > { %2230 = vmatprep.subr.bf16.mxu0 %v2229_v38 }
  0xf1   : > { %v884_v52 = vsel %vm883_vm12, %v2656_v50, %v2646_v24  ;;  %v910_v54 = vsel %vm909_vm13, %v2661_v43, %v2651_v36  ;;  %v886_v55 = vsel %vm883_vm12, %v2647_v23, %v2657_v49  ;;  %v912_v46 = vsel %vm909_vm13, %v2652_v35, %v2662_v39 }
  0xf2   : > { %v2670_v47 = vpop.permute.xlu1 %2669  ;;  %v2665_v51 = vpop.permute.xlu0 %2664  ;;  %v2231_v56 = vpack.c.bf16 %v910_v54, %v884_v52  ;;  %v2293_v57 = vpack.c.bf16 %v912_v46, %v886_v55  ;;  %v2916_v50 = vmov 0.0|0.0   ;;  %v1467_v52 = vld [vmem:[%s3391_s1 + $0x28] sm:$0xff]  ;;  %vm1221_vm12 = vcmask 113664  }
  0xf3   : > { %v2672_v53 = vunpack.i.h.bf16 %v2670_v47  ;;  %v2671_v58 = vunpack.i.l.bf16 %v2670_v47  ;;  %v2667_v61 = vunpack.i.h.bf16 %v2665_v51  ;;  %v2666_v62 = vunpack.i.l.bf16 %v2665_v51 }
  0xf4   : > { %2232 = vmatpush1.bf16.msra.mxu0 %v2231_v56  ;;  %2294 = vmatprep.subr.bf16.mxu1 %v2293_v57  ;;  %vm1195_vm13 = vcmask 121856  }
  0xf5   : > { %2296 = vmatpush3.bf16.msra.mxu1 %v2295_v3  ;;  %v937_v63 = vsel %vm935_vm14, %v2666_v62, %v2667_v61  ;;  %v963_v1 = vsel %vm961_vm15, %v2671_v58, %v2672_v53 }
  0xf6   : > { %v2680_v2 = vpop.permute.xlu1 %2679  ;;  %v2675_v4 = vpop.permute.xlu0 %2674  ;;  %v2233_v59 = vpack.c.bf16 %v963_v1, %v937_v63 }
  0xf7   : > { %v2682_v60 = vunpack.i.h.bf16 %v2680_v2  ;;  %v2681_v0 = vunpack.i.l.bf16 %v2680_v2  ;;  %v2677_v11 = vunpack.i.h.bf16 %v2675_v4  ;;  %v2676_v5 = vunpack.i.l.bf16 %v2675_v4  ;;  %v1471_v4 = vld [vmem:[%s3391_s1 + $0x48] sm:$0xff] }
  0xf8   : > { %2234 = vmatprep.subr.bf16.mxu0 %v2233_v59  ;;  %v1470_v59 = vld [vmem:[%s3391_s1 + $0x40] sm:$0xff] }
  0xf9   : > { %v936_v12 = vsel %vm935_vm14, %v2676_v5, %v2666_v62  ;;  %v962_v26 = vsel %vm961_vm15, %v2681_v0, %v2671_v58  ;;  %v938_v31 = vsel %vm935_vm14, %v2667_v61, %v2677_v11  ;;  %v964_v9 = vsel %vm961_vm15, %v2672_v53, %v2682_v60  ;;  %v1465_v11 = vld [vmem:[%s3391_s1 + $0x18] sm:$0xff] }
  0xfa   : > { %v2690_v10 = vpop.permute.xlu1 %2689  ;;  %v2685_v3 = vpop.permute.xlu0 %2684  ;;  %v2235_v13 = vpack.c.bf16 %v962_v26, %v936_v12  ;;  %v2297_v15 = vpack.c.bf16 %v964_v9, %v938_v31  ;;  %vm1273_vm14 = vcmask 97280   ;;  %vm1247_vm15 = vcmask 105472  }
  0xfb   : > { %v2692_v16 = vunpack.i.h.bf16 %v2690_v10  ;;  %v2691_v17 = vunpack.i.l.bf16 %v2690_v10  ;;  %v2687_v18 = vunpack.i.h.bf16 %v2685_v3  ;;  %v2686_v22 = vunpack.i.l.bf16 %v2685_v3 }
  0xfc   : > { %2236 = vmatpush1.bf16.msra.mxu0 %v2235_v13  ;;  %2298 = vmatprep.subr.bf16.mxu1 %v2297_v15 }
  0xfd   : > { %2300 = vmatpush3.bf16.msra.mxu1 %v2299_v45  ;;  %v989_v37 = vsel %vm987_vm0, %v2686_v22, %v2687_v18  ;;  %v1015_v27 = vsel %vm1013_vm1, %v2691_v17, %v2692_v16 }
  0xfe   : > { %v2700_v21 = vpop.permute.xlu1 %2699  ;;  %v2695_v28 = vpop.permute.xlu0 %2694  ;;  %v2237_v29 = vpack.c.bf16 %v1015_v27, %v989_v37 }
  0xff   : > { %v2702_v30 = vunpack.i.h.bf16 %v2700_v21  ;;  %v2701_v32 = vunpack.i.l.bf16 %v2700_v21  ;;  %v2697_v19 = vunpack.i.h.bf16 %v2695_v28  ;;  %v2696_v20 = vunpack.i.l.bf16 %v2695_v28 }
 0x100   : > { %2238 = vmatprep.subr.bf16.mxu0 %v2237_v29 }
 0x101   : > { %v988_v25 = vsel %vm987_vm0, %v2696_v20, %v2686_v22  ;;  %v1014_v33 = vsel %vm1013_vm1, %v2701_v32, %v2691_v17  ;;  %v990_v40 = vsel %vm987_vm0, %v2687_v18, %v2697_v19  ;;  %v1016_v41 = vsel %vm1013_vm1, %v2692_v16, %v2702_v30 }
 0x102   : > { %v2710_v45 = vpop.permute.xlu1 %2709  ;;  %v2705_v34 = vpop.permute.xlu0 %2704  ;;  %v2239_v35 = vpack.c.bf16 %v1014_v33, %v988_v25  ;;  %v2301_v36 = vpack.c.bf16 %v1016_v41, %v990_v40  ;;  %vm1374_vm0 = vcmask 990208   ;;  %vm2025_vm1 = vcmask 7168  }
 0x103   : > { %v2712_v23 = vunpack.i.h.bf16 %v2710_v45  ;;  %v2711_v24 = vunpack.i.l.bf16 %v2710_v45  ;;  %v2707_v42 = vunpack.i.h.bf16 %v2705_v34  ;;  %v2706_v44 = vunpack.i.l.bf16 %v2705_v34 }
 0x104   : > { %2240 = vmatpush1.bf16.msra.mxu0 %v2239_v35  ;;  %2302 = vmatprep.subr.bf16.mxu1 %v2301_v36 }
 0x105   : > { %2304 = vmatpush3.bf16.msra.mxu1 %v2303_v14  ;;  %v1041_v48 = vsel %vm1039_vm6, %v2706_v44, %v2707_v42  ;;  %v1067_v38 = vsel %vm1065_vm2, %v2711_v24, %v2712_v23 }
 0x106   : > { %v2720_v39 = vpop.permute.xlu1 %2719  ;;  %v2715_v43 = vpop.permute.xlu0 %2714  ;;  %v2241_v49 = vpack.c.bf16 %v1067_v38, %v1041_v48  ;;  %2305 = vmatprep.subr.bf16.mxu1 %v2916_v50 }
 0x107   : > { %v2722_v54 = vunpack.i.h.bf16 %v2720_v39  ;;  %v2721_v55 = vunpack.i.l.bf16 %v2720_v39  ;;  %v2717_v46 = vunpack.i.h.bf16 %v2715_v43  ;;  %v2716_v47 = vunpack.i.l.bf16 %v2715_v43  ;;  %1696 = vmatmul.mubr.f32.vlgmr.msra.gmra.mrb[0].mxu0 %v1462_v6 }
 0x108   : > { %2242 = vmatprep.subr.bf16.mxu0 %v2241_v49  ;;  %1862 = vmatmul.mubr.f32.vlgmr.msra.gmra.mrb[0].mxu1 %v1462_v6 }
 0x109   : > { %v1066_v8 = vsel %vm1065_vm2, %v2721_v55, %v2711_v24  ;;  %v1068_v14 = vsel %vm1065_vm2, %v2712_v23, %v2722_v54  ;;  %v1040_v51 = vsel %vm1039_vm6, %v2716_v47, %v2706_v44  ;;  %v1042_v56 = vsel %vm1039_vm6, %v2707_v42, %v2717_v46  ;;  %1701 = vmatprep.mubr.f32.mxu0 %v1467_v52 }
 0x10a   : > { %v2243_v57 = vpack.c.bf16 %v1066_v8, %v1040_v51  ;;  %v2306_v53 = vpack.c.bf16 %v1068_v14, %v1042_v56  ;;  %v2730_v58 = vpop.permute.xlu1 %2729  ;;  %v2725_v61 = vpop.permute.xlu0 %2724  ;;  %1866 = vmatprep.mubr.f32.mxu1 %v1467_v52 }
 0x10b   : > { %v2732_v62 = vunpack.i.h.bf16 %v2730_v58  ;;  %v2731_v63 = vunpack.i.l.bf16 %v2730_v58  ;;  %v2727_v1 = vunpack.i.h.bf16 %v2725_v61  ;;  %v2726_v2 = vunpack.i.l.bf16 %v2725_v61  ;;  %1702 = vmatmul.mubr.f32.gmra.mrb[2].mxu0 %v1466_v7 }
 0x10c   : > { %2244 = vmatpush1.bf16.msra.mxu0 %v2243_v57  ;;  %2307 = vmatpush1.bf16.msra.mxu1 %v2306_v53 }
 0x10d   : > { %v1093_v60 = vsel %vm1091_vm8, %v2726_v2, %v2727_v1  ;;  %v1119_v0 = vsel %vm1117_vm7, %v2731_v63, %v2732_v62  ;;  %2308 = vmatprep.subr.bf16.mxu1 %v2916_v50  ;;  %1867 = vmatmul.mubr.f32.gmra.mrb[2].mxu1 %v1466_v7 }
 0x10e   : > { %v2740_v5 = vpop.permute.xlu1 %2739  ;;  %v2735_v12 = vpop.permute.xlu0 %2734  ;;  %v2245_v26 = vpack.c.bf16 %v1119_v0, %v1093_v60  ;;  %1707 = vmatprep.mubr.f32.mxu0 %v1471_v4  ;;  %1871 = vmatprep.mubr.f32.mxu1 %v1471_v4 }
 0x10f   : > { %v2742_v31 = vunpack.i.h.bf16 %v2740_v5  ;;  %v2741_v9 = vunpack.i.l.bf16 %v2740_v5  ;;  %v2737_v10 = vunpack.i.h.bf16 %v2735_v12  ;;  %v2736_v3 = vunpack.i.l.bf16 %v2735_v12  ;;  %1708 = vmatmul.mubr.f32.gmra.mrb[4].mxu0 %v1470_v59 }
 0x110   : > { %2246 = vmatprep.subr.bf16.mxu0 %v2245_v26  ;;  %2128 = vmatprep.mubr.msk.f32.mxu0 %vm1621_vm9, %v1465_v11 }
 0x111   : > { %v1118_v13 = vsel %vm1117_vm7, %v2741_v9, %v2731_v63  ;;  %v1120_v15 = vsel %vm1117_vm7, %v2732_v62, %v2742_v31  ;;  %v1092_v16 = vsel %vm1091_vm8, %v2736_v3, %v2726_v2  ;;  %v1094_v17 = vsel %vm1091_vm8, %v2727_v1, %v2737_v10  ;;  %1872 = vmatmul.mubr.f32.gmra.mrb[4].mxu1 %v1470_v59 }
 0x112   : > { %v2247_v18 = vpack.c.bf16 %v1118_v13, %v1092_v16  ;;  %v2309_v22 = vpack.c.bf16 %v1120_v15, %v1094_v17  ;;  %v2750_v37 = vpop.permute.xlu1 %2749  ;;  %v2745_v27 = vpop.permute.xlu0 %2744  ;;  %2131 = vmatprep.mubr.msk.f32.mxu1 %vm1621_vm9, %v1465_v11 }
 0x113   : > { %v2752_v21 = vunpack.i.h.bf16 %v2750_v37  ;;  %v2751_v28 = vunpack.i.l.bf16 %v2750_v37  ;;  %v2747_v29 = vunpack.i.h.bf16 %v2745_v27  ;;  %v2746_v30 = vunpack.i.l.bf16 %v2745_v27 }
 0x114   : > { %2248 = vmatpush1.bf16.msra.mxu0 %v2247_v18  ;;  %2310 = vmatpush1.bf16.msra.mxu1 %v2309_v22 }
 0x115   : > { %v1145_v32 = vsel %vm1143_vm11, %v2746_v30, %v2747_v29  ;;  %v1171_v19 = vsel %vm1169_vm10, %v2751_v28, %v2752_v21  ;;  %2311 = vmatprep.subr.bf16.mxu1 %v2916_v50 }
 0x116   : > { %v2760_v20 = vpop.permute.xlu1 %2759  ;;  %v2755_v25 = vpop.permute.xlu0 %2754  ;;  %v2249_v33 = vpack.c.bf16 %v1171_v19, %v1145_v32 }
 0x117   : > { %v2762_v40 = vunpack.i.h.bf16 %v2760_v20  ;;  %v2761_v41 = vunpack.i.l.bf16 %v2760_v20  ;;  %v2757_v45 = vunpack.i.h.bf16 %v2755_v25  ;;  %v2756_v34 = vunpack.i.l.bf16 %v2755_v25 }
 0x118   : > { %2250 = vmatprep.subr.bf16.mxu0 %v2249_v33 }
 0x119   : > { %v1170_v35 = vsel %vm1169_vm10, %v2761_v41, %v2751_v28  ;;  %v1172_v36 = vsel %vm1169_vm10, %v2752_v21, %v2762_v40  ;;  %v1144_v23 = vsel %vm1143_vm11, %v2756_v34, %v2746_v30  ;;  %v1146_v24 = vsel %vm1143_vm11, %v2747_v29, %v2757_v45 }
 0x11a   : > { %v2251_v42 = vpack.c.bf16 %v1170_v35, %v1144_v23  ;;  %v2312_v44 = vpack.c.bf16 %v1172_v36, %v1146_v24  ;;  %v2770_v6 = vpop.permute.xlu1 %2769  ;;  %v2765_v48 = vpop.permute.xlu0 %2764 }
 0x11b   : > { %v2772_v38 = vunpack.i.h.bf16 %v2770_v6  ;;  %v2771_v39 = vunpack.i.l.bf16 %v2770_v6  ;;  %v2767_v43 = vunpack.i.h.bf16 %v2765_v48  ;;  %v2766_v49 = vunpack.i.l.bf16 %v2765_v48 }
 0x11c   : > { %2252 = vmatpush1.bf16.msra.mxu0 %v2251_v42  ;;  %2313 = vmatpush1.bf16.msra.mxu1 %v2312_v44 }
 0x11d   : > { %v1197_v52 = vsel %vm1195_vm13, %v2766_v49, %v2767_v43  ;;  %v1223_v54 = vsel %vm1221_vm12, %v2771_v39, %v2772_v38  ;;  %2314 = vmatprep.subr.bf16.mxu1 %v2916_v50 }
 0x11e   : > { %v2780_v55 = vpop.permute.xlu1 %2779  ;;  %v2775_v46 = vpop.permute.xlu0 %2774  ;;  %v2253_v47 = vpack.c.bf16 %v1223_v54, %v1197_v52 }
 0x11f   : > { %v2782_v7 = vunpack.i.h.bf16 %v2780_v55  ;;  %v2781_v8 = vunpack.i.l.bf16 %v2780_v55  ;;  %v2777_v14 = vunpack.i.h.bf16 %v2775_v46  ;;  %v2776_v51 = vunpack.i.l.bf16 %v2775_v46 }
 0x120   : > { %2254 = vmatprep.subr.bf16.mxu0 %v2253_v47 }
 0x121   : > { %v1222_v56 = vsel %vm1221_vm12, %v2781_v8, %v2771_v39  ;;  %v1224_v57 = vsel %vm1221_vm12, %v2772_v38, %v2782_v7  ;;  %v1196_v53 = vsel %vm1195_vm13, %v2776_v51, %v2766_v49  ;;  %v1198_v58 = vsel %vm1195_vm13, %v2767_v43, %v2777_v14 }
 0x122   : > { %v2255_v61 = vpack.c.bf16 %v1222_v56, %v1196_v53  ;;  %v2315_v62 = vpack.c.bf16 %v1224_v57, %v1198_v58  ;;  %v2790_v63 = vpop.permute.xlu1 %2789  ;;  %v2785_v1 = vpop.permute.xlu0 %2784 }
 0x123   : > { %v2792_v2 = vunpack.i.h.bf16 %v2790_v63  ;;  %v2791_v4 = vunpack.i.l.bf16 %v2790_v63  ;;  %v2787_v59 = vunpack.i.h.bf16 %v2785_v1  ;;  %v2786_v60 = vunpack.i.l.bf16 %v2785_v1 }
 0x124   : > { %2256 = vmatpush1.bf16.msra.mxu0 %v2255_v61  ;;  %2316 = vmatpush1.bf16.msra.mxu1 %v2315_v62 }
 0x125   : > { %v1249_v0 = vsel %vm1247_vm15, %v2786_v60, %v2787_v59  ;;  %v1275_v11 = vsel %vm1273_vm14, %v2791_v4, %v2792_v2  ;;  %2317 = vmatprep.subr.bf16.mxu1 %v2916_v50 }
 0x126   : > { %v2800_v5 = vpop.permute.xlu1 %2799  ;;  %v2795_v12 = vpop.permute.xlu0 %2794  ;;  %v2257_v26 = vpack.c.bf16 %v1275_v11, %v1249_v0 }
 0x127   : > { %v2802_v31 = vunpack.i.h.bf16 %v2800_v5  ;;  %v2801_v9 = vunpack.i.l.bf16 %v2800_v5  ;;  %v2797_v10 = vunpack.i.h.bf16 %v2795_v12  ;;  %v2796_v3 = vunpack.i.l.bf16 %v2795_v12 }
 0x128   : > { %2258 = vmatprep.subr.bf16.mxu0 %v2257_v26 }
 0x129   : > { %v1274_v13 = vsel %vm1273_vm14, %v2801_v9, %v2791_v4  ;;  %v1276_v15 = vsel %vm1273_vm14, %v2792_v2, %v2802_v31  ;;  %v1248_v16 = vsel %vm1247_vm15, %v2796_v3, %v2786_v60  ;;  %v1250_v17 = vsel %vm1247_vm15, %v2787_v59, %v2797_v10 }
 0x12a   : > { %v2259_v18 = vpack.c.bf16 %v1274_v13, %v1248_v16  ;;  %v2318_v22 = vpack.c.bf16 %v1276_v15, %v1250_v17  ;;  %v2810_v37 = vpop.permute.xlu1 %2809  ;;  %v2805_v27 = vpop.permute.xlu0 %2804 }
 0x12b   : > { %v2812_v21 = vunpack.i.h.bf16 %v2810_v37  ;;  %v2811_v28 = vunpack.i.l.bf16 %v2810_v37  ;;  %v2807_v29 = vunpack.i.h.bf16 %v2805_v27  ;;  %v2806_v30 = vunpack.i.l.bf16 %v2805_v27 }
 0x12c   : > { %2260 = vmatpush1.bf16.msra.mxu0 %v2259_v18  ;;  %2319 = vmatpush1.bf16.msra.mxu1 %v2318_v22 }
 0x12d   : > { %v1300_v32 = vsel %vm311_vm3, %v2806_v30, %v2807_v29  ;;  %v1325_v19 = vsel %vm337_vm4, %v2811_v28, %v2812_v21  ;;  %2320 = vmatprep.subr.bf16.mxu1 %v2916_v50 }
 0x12e   : > { %v2820_v20 = vpop.permute.xlu1 %2819  ;;  %v2815_v25 = vpop.permute.xlu0 %2814  ;;  %v2261_v33 = vpack.c.bf16 %v1325_v19, %v1300_v32 }
 0x12f   : > { %v2822_v40 = vunpack.i.h.bf16 %v2820_v20  ;;  %v2821_v41 = vunpack.i.l.bf16 %v2820_v20  ;;  %v2817_v45 = vunpack.i.h.bf16 %v2815_v25  ;;  %v2816_v34 = vunpack.i.l.bf16 %v2815_v25  ;;  %v1469_v20 = vld [vmem:[%s3391_s1 + $0x38] sm:$0xff]  ;;  %v1468_v25 = vld [vmem:[%s3391_s1 + $0x30] sm:$0xff] }
 0x130   : > { %2262 = vmatprep.subr.bf16.mxu0 %v2261_v33  ;;  %v1473_v33 = vld [vmem:[%s3391_s1 + $0x58] sm:$0xff] }
 0x131   : > { %v1324_v35 = vsel %vm337_vm4, %v2821_v41, %v2811_v28  ;;  %v1326_v36 = vsel %vm337_vm4, %v2812_v21, %v2822_v40  ;;  %v1299_v23 = vsel %vm311_vm3, %v2816_v34, %v2806_v30  ;;  %v1301_v24 = vsel %vm311_vm3, %v2807_v29, %v2817_v45  ;;  %v1464_v30 = vld [vmem:[%s3391_s1 + $0x10] sm:$0xff] }
 0x132   : > { %v2263_v42 = vpack.c.bf16 %v1324_v35, %v1299_v23  ;;  %v2321_v44 = vpack.c.bf16 %v1326_v36, %v1301_v24  ;;  %v2830_v6 = vpop.permute.xlu1 %2829  ;;  %v2825_v48 = vpop.permute.xlu0 %2824  ;;  %vm1426_vm3 = vcmask 973824   ;;  %vm1400_vm4 = vcmask 982016   ;;  %v1472_v40 = vld [vmem:[%s3391_s1 + $0x50] sm:$0xff] }
 0x133   : > { %v2832_v38 = vunpack.i.h.bf16 %v2830_v6  ;;  %v2831_v39 = vunpack.i.l.bf16 %v2830_v6  ;;  %v2827_v43 = vunpack.i.h.bf16 %v2825_v48  ;;  %v2826_v49 = vunpack.i.l.bf16 %v2825_v48 }
 0x134   : > { %2264 = vmatpush1.bf16.msra.mxu0 %v2263_v42  ;;  %2322 = vmatpush1.bf16.msra.mxu1 %v2321_v44  ;;  %v2917_v21 = vmov 0.0   ;;  %v1968_v6 = vlaneseq }
 0x135   : > { %v1350_v52 = vsel %vm363_vm5, %v2826_v49, %v2827_v43  ;;  %v1376_v54 = vsel %vm1374_vm0, %v2831_v39, %v2832_v38  ;;  %2323 = vmatprep.subr.bf16.mxu1 %v2916_v50 }
 0x136   : > { %v2840_v55 = vpop.permute.xlu1 %2839  ;;  %v2835_v46 = vpop.permute.xlu0 %2834  ;;  %v2265_v47 = vpack.c.bf16 %v1376_v54, %v1350_v52  ;;  %v1969_v48 = vshrl.u32 %v1968_v6, 7 }
 0x137   : > { %v2842_v7 = vunpack.i.h.bf16 %v2840_v55  ;;  %v2841_v8 = vunpack.i.l.bf16 %v2840_v55  ;;  %v2837_v14 = vunpack.i.h.bf16 %v2835_v46  ;;  %v2836_v51 = vunpack.i.l.bf16 %v2835_v46 }
 0x138   : > { %2266 = vmatprep.subr.bf16.mxu0 %v2265_v47 }
 0x139   : > { %v1375_v56 = vsel %vm1374_vm0, %v2841_v8, %v2831_v39  ;;  %v1377_v57 = vsel %vm1374_vm0, %v2832_v38, %v2842_v7  ;;  %v1349_v53 = vsel %vm363_vm5, %v2836_v51, %v2826_v49  ;;  %v1351_v58 = vsel %vm363_vm5, %v2827_v43, %v2837_v14  ;;  %v1966_v39 = vld [vmem:[%s3392_s2] sm:$0x7] }
 0x13a   : > { %v2267_v61 = vpack.c.bf16 %v1375_v56, %v1349_v53  ;;  %v2324_v62 = vpack.c.bf16 %v1377_v57, %v1351_v58  ;;  %v2850_v63 = vpop.permute.xlu1 %2849  ;;  %v2845_v1 = vpop.permute.xlu0 %2844  ;;  %vm1452_vm5 = vcmask 965632   ;;  %v1970_v38 = vsub.s32 0, %v1969_v48 }
 0x13b   : > { %v2852_v2 = vunpack.i.h.bf16 %v2850_v63  ;;  %v2851_v4 = vunpack.i.l.bf16 %v2850_v63  ;;  %v2847_v59 = vunpack.i.h.bf16 %v2845_v1  ;;  %v2846_v60 = vunpack.i.l.bf16 %v2845_v1 }
 0x13c   : > { %2268 = vmatpush1.bf16.msra.mxu0 %v2267_v61  ;;  %2325 = vmatpush1.bf16.msra.mxu1 %v2324_v62  ;;  %v1974_v43 = vsub.s32 1, %v1969_v48  ;;  %v1978_v49 = vsub.s32 2, %v1969_v48  ;;  %v1971_v52 = vrot.slane %v1966_v39, %v1970_v38 }
 0x13d   : > { %v1402_v0 = vsel %vm1400_vm4, %v2846_v60, %v2847_v59  ;;  %v1428_v11 = vsel %vm1426_vm3, %v2851_v4, %v2852_v2  ;;  %2326 = vmatprep.subr.bf16.mxu1 %v2916_v50 }
 0x13e   : > { %v2860_v5 = vpop.permute.xlu1 %2859  ;;  %v2855_v12 = vpop.permute.xlu0 %2854  ;;  %v2269_v26 = vpack.c.bf16 %v1428_v11, %v1402_v0  ;;  %v1975_v54 = vrot.slane %v1966_v39, %v1974_v43  ;;  %v1979_v55 = vrot.slane %v1966_v39, %v1978_v49 }
 0x13f   : > { %v2862_v31 = vunpack.i.h.bf16 %v2860_v5  ;;  %v2861_v9 = vunpack.i.l.bf16 %v2860_v5  ;;  %v2857_v10 = vunpack.i.h.bf16 %v2855_v12  ;;  %v2856_v3 = vunpack.i.l.bf16 %v2855_v12 }
 0x140   : > { %2270 = vmatprep.subr.bf16.mxu0 %v2269_v26 }
 0x141   : > { %v1427_v13 = vsel %vm1426_vm3, %v2861_v9, %v2851_v4  ;;  %v1429_v15 = vsel %vm1426_vm3, %v2852_v2, %v2862_v31  ;;  %v1401_v16 = vsel %vm1400_vm4, %v2856_v3, %v2846_v60  ;;  %v1403_v17 = vsel %vm1400_vm4, %v2847_v59, %v2857_v10 }
 0x142   : > { %v2271_v18 = vpack.c.bf16 %v1427_v13, %v1401_v16  ;;  %v2327_v22 = vpack.c.bf16 %v1429_v15, %v1403_v17  ;;  %v1449_v50 = vpop.permute.xlu1 %1448  ;;  %v1447_v37 = vpop.permute.xlu0 %1446 }
 0x143   : > { %v1454_v27 = vsel %vm1452_vm5, %v1447_v37, %v1449_v50 }
 0x144   : > { %2272 = vmatpush1.bf16.msra.mxu0 %v2271_v18  ;;  %2328 = vmatpush1.bf16.msra.mxu1 %v2327_v22 }
 0x145   : > { %1746 = vmatprep.subr.mxu0 %v1454_v27  ;;  %1909 = vmatprep.subr.mxu1 %v2917_v21 }
 0x146   : > { %v1451_v28 = vpop.permute.xlu1 %1450  ;;  %v1445_v29 = vpop.permute.xlu0 %1444 }
 0x147   : > { %v1455_v32 = vsel %vm1452_vm5, %v1449_v50, %v1451_v28  ;;  %v1453_v19 = vsel %vm1452_vm5, %v1445_v29, %v1447_v37 }
 0x148   : > { %1747 = vmatpush1.msra.mxu0 %v1453_v19  ;;  %1910 = vmatpush1.msra.mxu1 %v1455_v32 }
 0x149   : > { %1779 = vmatmul.mubr.f32.vlgmr.msra.gmra.mrb[0].mxu0 %v1464_v30  ;;  %1942 = vmatmul.mubr.f32.vlgmr.msra.gmra.mrb[6].mxu1 %v1464_v30 }
 0x14a   : > { %2129 = vmatprep.mubr.msk.f32.mxu0 %vm1621_vm9, %v1469_v20  ;;  %2132 = vmatprep.mubr.msk.f32.mxu1 %vm1621_vm9, %v1469_v20 }
 0x14d   : > { %1785 = vmatmul.mubr.f32.gmra.mrb[2].mxu0 %v1468_v25  ;;  %1947 = vmatmul.mubr.f32.gmra.mrb[8].mxu1 %v1468_v25 }
 0x14e   : > { %2130 = vmatprep.mubr.msk.f32.mxu0 %vm1621_vm9, %v1473_v33  ;;  %2133 = vmatprep.mubr.msk.f32.mxu1 %vm1621_vm9, %v1473_v33 }
 0x151   : > { %1791 = vmatmul.mubr.f32.gmra.mrb[4].mxu0 %v1472_v40  ;;  %1952 = vmatmul.mubr.f32.gmra.mrb[10].mxu1 %v1472_v40 }
 0x1db   : > { %v2168_v41 = vpop.f32.mrb[0].mxu1 }
 0x1dc   : > { %v2169_v45 = vpop.f32.mrb[1].mxu1 }
 0x1dd   : > { %v2170_v34 = vadd.f32 %v2169_v45, %v2168_v41 }
 0x1e0   : > { %v2171_v35 = vpop.f32.mrb[2].mxu1 }
 0x1e1   : > { %v2172_v36 = vpop.f32.mrb[3].mxu1 }
 0x1e2   : > { %v2173_v23 = vadd.f32 %v2172_v36, %v2171_v35 }
 0x1e4   : > { %v2174_v24 = vpop.f32.mrb[4].mxu1 }
 0x1e5   : > { %v2175_v42 = vpop.f32.mrb[5].mxu1 }
 0x1e6   : > { %v2176_v44 = vadd.f32 %v2175_v42, %v2174_v24 }
 0x21c   : > { %v1780_v46 = vpop.f32.mrb[0].mxu0  ;;  %v1943_v47 = vpop.f32.mrb[6].mxu1 }
 0x21d   : > { %1957 = vst [vmem:[%s3372_s26] sm:$0xff] %v1780_v46  ;;  %v1983_v7 = vmul.f32 %v1971_v52, %v1780_v46  ;;  %v1944_v8 = vadd.f32 %v2170_v34, %v1943_v47  ;;  %v1782_v14 = vpop.f32.mrb[1].mxu0  ;;  %v1945_v51 = vpop.f32.mrb[7].mxu1 }
 0x21e   : > { %1958 = vst [vmem:[%s3372_s26 + $0x8] sm:$0xff] %v1782_v14  ;;  %v1984_v56 = vmul.f32 %v1975_v54, %v1782_v14 }
 0x21f   : > { %v1992_v57 = vmul.f32 %v1983_v7, %v1780_v46  ;;  %1959 = vst [vmem:[%s3372_s26 + $0x10] sm:$0xff] %v1944_v8  ;;  %v1985_v53 = vmul.f32 %v1979_v55, %v1944_v8 }
 0x220   : > { %v1993_v58 = vmul.f32 %v1984_v56, %v1782_v14  ;;  %v2001_v61 = vadd.f32 %v1984_v56, %v1983_v7  ;;  %v1786_v62 = vpop.f32.mrb[2].mxu0  ;;  %v1948_v63 = vpop.f32.mrb[8].mxu1 }
 0x221   : > { %v1994_v1 = vmul.f32 %v1985_v53, %v1944_v8  ;;  %1960 = vst [vmem:[%s3372_s26 + $0x18] sm:$0xff] %v1786_v62  ;;  %v1986_v2 = vmul.f32 %v1971_v52, %v1786_v62  ;;  %v1949_v4 = vadd.f32 %v2173_v23, %v1948_v63  ;;  %v1788_v59 = vpop.f32.mrb[3].mxu0  ;;  %v1950_v60 = vpop.f32.mrb[9].mxu1 }
 0x222   : > { %v2013_v0 = vadd.f32 %v1993_v58, %v1992_v57  ;;  %1961 = vst [vmem:[%s3372_s26 + $0x20] sm:$0xff] %v1788_v59  ;;  %v1987_v11 = vmul.f32 %v1975_v54, %v1788_v59  ;;  %v2002_v5 = vadd.f32 %v2001_v61, %v1985_v53 }
 0x223   : > { %v1995_v12 = vmul.f32 %v1986_v2, %v1786_v62  ;;  %1962 = vst [vmem:[%s3372_s26 + $0x28] sm:$0xff] %v1949_v4  ;;  %v1988_v26 = vmul.f32 %v1979_v55, %v1949_v4 }
 0x224   : > { %v1996_v31 = vmul.f32 %v1987_v11, %v1788_v59  ;;  %v2005_v9 = vadd.f32 %v1987_v11, %v1986_v2  ;;  %v1953_v10 = vpop.f32.mrb[10].mxu1  ;;  %2003 = vadd.xlane.f32.xlu0 %v2002_v5  ;;  %v1792_v3 = vpop.f32.mrb[4].mxu0  ;;  %v2014_v13 = vadd.f32 %v2013_v0, %v1994_v1 }
 0x225   : > { %v1997_v15 = vmul.f32 %v1988_v26, %v1949_v4  ;;  %v1954_v16 = vadd.f32 %v2176_v44, %v1953_v10  ;;  %1963 = vst [vmem:[%s3372_s26 + $0x30] sm:$0xff] %v1792_v3  ;;  %v1989_v17 = vmul.f32 %v1971_v52, %v1792_v3  ;;  %v1794_v18 = vpop.f32.mrb[5].mxu0  ;;  %v1955_v22 = vpop.f32.mrb[11].mxu1 }
 0x226   : > { %v2017_v50 = vadd.f32 %v1996_v31, %v1995_v12  ;;  %1964 = vst [vmem:[%s3372_s26 + $0x38] sm:$0xff] %v1794_v18  ;;  %v1990_v37 = vmul.f32 %v1975_v54, %v1794_v18  ;;  %v2006_v27 = vadd.f32 %v2005_v9, %v1988_v26 }
 0x227   : > { %1965 = vst [vmem:[%s3372_s26 + $0x40] sm:$0xff] %v1954_v16  ;;  %v1991_v21 = vmul.f32 %v1979_v55, %v1954_v16  ;;  %v1998_v28 = vmul.f32 %v1989_v17, %v1792_v3 }
 0x228   : > { %v1999_v29 = vmul.f32 %v1990_v37, %v1794_v18  ;;  %v2009_v30 = vadd.f32 %v1990_v37, %v1989_v17  ;;  %2015 = vadd.xlane.f32.xlu0 %v2014_v13  ;;  %2007 = vadd.xlane.f32.xlu1 %v2006_v27  ;;  %v2018_v32 = vadd.f32 %v2017_v50, %v1997_v15 }
 0x229   : > { %v2000_v19 = vmul.f32 %v1991_v21, %v1954_v16 }
 0x22a   : > { %v2021_v20 = vadd.f32 %v1999_v29, %v1998_v28  ;;  %v2010_v25 = vadd.f32 %v2009_v30, %v1991_v21 }
 0x22c   : > { %2019 = vadd.xlane.f32.xlu1 %v2018_v32  ;;  %2011 = vadd.xlane.f32.xlu0 %v2010_v25  ;;  %v2022_v33 = vadd.f32 %v2021_v20, %v2000_v19 }
 0x230   : > { %2023 = vadd.xlane.f32.xlu0 %v2022_v33 }
 0x2b1   : > { %v2004_v40 = vpop.xlane.xlu0 %2003 }
 0x2b2   : > { %2026 = vst.msk [vmem:[%s210_s5] sm:$0xff] %vm2025_vm1, %v2004_v40 }
 0x2b5   : > { %v2016_v41 = vpop.xlane.xlu0 %2015  ;;  %v2008_v45 = vpop.xlane.xlu1 %2007 }
 0x2b6   : > { %2029 = vst.msk [vmem:[%s210_s5 + $0x18] sm:$0xff] %vm2025_vm1, %v2016_v41  ;;  %2027 = vst.msk [vmem:[%s210_s5 + $0x8] sm:$0xff] %vm2025_vm1, %v2008_v45 }
 0x2b9   : > { %v2020_v34 = vpop.xlane.xlu1 %2019  ;;  %v2012_v35 = vpop.xlane.xlu0 %2011 }
 0x2ba   : > { %2030 = vst.msk [vmem:[%s210_s5 + $0x20] sm:$0xff] %vm2025_vm1, %v2020_v34  ;;  %2028 = vst.msk [vmem:[%s210_s5 + $0x10] sm:$0xff] %vm2025_vm1, %v2012_v35 }
 0x2bd   : > { %v2024_v36 = vpop.xlane.xlu0 %2023 }
 0x2be   : > { %2031 = vst.msk [vmem:[%s210_s5 + $0x28] sm:$0xff] %vm2025_vm1, %v2024_v36 }
 0x2bf PF: > { %s15_s15 = sadd.s32 1, %s2869_s15  }
 0x2c0   : > { %p12_p4 = scmp.ge.s32.totalorder %s15_s15, 4  }
 0x2c2   :  { %14 = sbr.rel (!%p12_p4) target bundleno = 1 (0x1), region = 74 }

// kernel: inception_x.3
= control target key start
LH: loop header
LB: loop body
LE: loop exit
PB: predicated region body
PF: predicated region fallthrough
CT: control target
= control target key end

     0   :  { %s2980_s9 = smov 0   ;;  %s5218_s0 = inlined_call_operand.vmem [shape: f32[2,24,384], index: 0, kind: input, shape index: {}]   ;;  %s5219_s1 = inlined_call_operand.vmem [shape: f32[24,2], index: 1, kind: input, shape index: {}]   ;;  %s5220_s2 = inlined_call_operand.vmem [shape: f32[2,24,16,16], index: 2, kind: output, shape index: {}]  }
   0x1 LB: > { %s2898_s10 = sadd.s32 4294967295, %s2945_s9   ;;  %p2902_p0 = scmp.ge.s32.totalorder %s2945_s9, 1  ;;  %s2945_s9 = sphi %s2980_s9, %s12_s9  }
   0x2   : > { %p112_p1 = scmp.lt.s32.totalorder %s2945_s9, 3 }
   0x4   : > { %p113_p2 = pnand %p2902_p0, %p112_p1 }
   0x5   : > { %v155_v0 = vld [vmem:[%s5219_s1 + $0x10] sm:$0xff] (!%p113_p2)  ;;  %v153_v1 = vld [vmem:[%s5219_s1] sm:$0xff] (!%p113_p2)  ;;  %v2947_v2 = vmov (!%p113_p2), 0   ;;  %v154_v3 = vld [vmem:[%s5219_s1 + $0x8] sm:$0xff] (!%p113_p2)  ;;  %v2948_v4 = vmov (!%p113_p2), 1   ;;  %p134_p3 = scmp.lt.s32.totalorder (!%p113_p2), %s2898_s10, 1  ;;  %v208_v7 = vlaneseq (!%p113_p2) }
   0x6   : > { %116 = sbr.rel (%p113_p2) target bundleno = 1034 (0x40a), region = 28  ;;  %2936 = vset.pattern.permute.xlu1 (!%p113_p2), %v2947_v2  ;;  %2935 = vset.pattern.permute.xlu0 (!%p113_p2), %v2947_v2  ;;  %v2949_v5 = vmov (!%p113_p2), 1966171168   ;;  %vm375_vm0 = vcmask (!%p113_p2), 122880   ;;  %s2950_s25 = smov (!%p113_p2), 106   ;;  %vm2143_vm1 = vcmask (!%p113_p2), 113664  }
   0x7   : > { %168 = vperm.xlu1 (!%p113_p2), %2936, %v155_v0   ;;  %158 = vperm.xlu0 (!%p113_p2), %2935, %v153_v1   ;;  %v206_v6 = vunpack.c.l.s4 (!%p113_p2), %v2949_v5  ;;  %v3005_v11 = vshrl.u32 (!%p113_p2), %v208_v7, 7  ;;  %s2951_s26 = smov (!%p113_p2), 84   ;;  %s2952_s27 = smov (!%p113_p2), 62  }
   0x8   : > { %s2953_s28 = smov (!%p113_p2), 40   ;;  %s2954_s29 = smov (!%p113_p2), 18  }
   0x9   : > { %v207_v10 = vunpack.c.0.s8 (!%p113_p2), %v206_v6  ;;  %s2955_s30 = smov (!%p113_p2), 124   ;;  %s2956_s3 = smov (!%p113_p2), 102  }
   0xa   : > { %s2957_s4 = smov (!%p113_p2), 80   ;;  %s2958_s5 = smov (!%p113_p2), 58  }
   0xb   : > { %2937 = vset.pattern.permute.xlu1 (!%p113_p2), %v2948_v4  ;;  %163 = vperm.xlu0 (!%p113_p2), %2935, %v154_v3   ;;  %v3011_v19 = vsub.s32 (!%p113_p2), %v207_v10, %v3005_v11  ;;  %s2959_s6 = smov (!%p113_p2), 36   ;;  %s2960_s7 = smov (!%p113_p2), 14  }
   0xc   : > { %181 = vperm.xlu1 (!%p113_p2), %2937, %v153_v1   ;;  %s2961_s8 = smov (!%p113_p2), 120   ;;  %s2963_s11 = smov (!%p113_p2), 76  }
   0xd   : > { %s5243_s10 = smov (!%p134_p3, %s2898_s10), 1  ;;  %s2964_s12 = smov 54  }
   0xe   : > { %s2907_s17 = smul.u32 72, %s5243_s10 }
   0xf   : > { %2938 = vset.pattern.permute.xlu0 %v2948_v4  ;;  %s2908_s21 = smul.u32 384, %s5243_s10  ;;  %s2962_s10 = smov 98  }
  0x10   : > { %189 = vperm.xlu1 %2937, %v155_v0   ;;  %185 = vperm.xlu0 %2938, %v154_v3   ;;  %s3003_s20 = scalar_lea.vmem %s5218_s0, %s2907_s17  ;;  %v3076_v3 = vsub.s32 0, %v3005_v11 }
  0x11   : > { %v144_v12 = vld [vmem:[%s3003_s20] sm:$0xff]  ;;  %v145_v13 = vld [vmem:[%s3003_s20 + $0x8] sm:$0xff]  ;;  %v146_v14 = vld [vmem:[%s3003_s20 + $0x10] sm:$0xff]  ;;  %s3026_s24 = scalar_lea.vmem %s5220_s2, %s2908_s21 }
  0x12   : > { %v150_v20 = vld [vmem:[%s3003_s20 + $0x30] sm:$0xff]  ;;  %v151_v22 = vld [vmem:[%s3003_s20 + $0x38] sm:$0xff]  ;;  %v152_v23 = vld [vmem:[%s3003_s20 + $0x40] sm:$0xff] }
  0x13   : > { %v147_v27 = vld [vmem:[%s3003_s20 + $0x18] sm:$0xff]  ;;  %v148_v37 = vld [vmem:[%s3003_s20 + $0x20] sm:$0xff]  ;;  %v149_v42 = vld [vmem:[%s3003_s20 + $0x28] sm:$0xff] }
  0x86   : > { %v169_v8 = vpop.permute.xlu1 %168  ;;  %v159_v9 = vpop.permute.xlu0 %158 }
  0x87   : > { %v171_v15 = vmul.f32 %v159_v9, %v144_v12  ;;  %v172_v16 = vmul.f32 %v159_v9, %v145_v13  ;;  %v173_v17 = vmul.f32 %v159_v9, %v146_v14  ;;  %v177_v28 = vmul.f32 %v169_v8, %v150_v20 }
  0x88   : > { %v178_v31 = vmul.f32 %v169_v8, %v151_v22  ;;  %v179_v32 = vmul.f32 %v169_v8, %v152_v23 }
  0x8a   : > { %v164_v18 = vpop.permute.xlu0 %163 }
  0x8b   : > { %v182_v21 = vpop.permute.xlu1 %181  ;;  %v174_v38 = vmul.f32 %v164_v18, %v147_v27  ;;  %v175_v50 = vmul.f32 %v164_v18, %v148_v37  ;;  %v176_v53 = vmul.f32 %v164_v18, %v149_v42 }
  0x8c   : > { %v192_v24 = vadd.f32 %v182_v21, %v171_v15  ;;  %v3017_v25 = vadd.f32 %v182_v21, %v172_v16  ;;  %v3019_v26 = vadd.f32 %v182_v21, %v173_v17 }
  0x8e   : > { %v204_v29 = vcombine.high %v192_v24, %v192_v24  ;;  %v211_v30 = vrot.slane %v192_v24, %v3011_v19  ;;  %v1705_v33 = vcombine.low %v3017_v25, %v3019_v26  ;;  %v1706_v34 = vcombine.high %v3017_v25, %v3019_v26 }
  0x8f   : > { %v190_v35 = vpop.permute.xlu1 %189  ;;  %v186_v36 = vpop.permute.xlu0 %185 }
  0x90   : > { %v218_v39 = vrot.slane %v204_v29, %v3011_v19  ;;  %v219_v40 = vcombine.high %v211_v30, %v211_v30  ;;  %v227_v41 = vrot.slane %v211_v30, %v3011_v19  ;;  %v198_v43 = vadd.f32 %v190_v35, %v177_v28 }
  0x91   : > { %v3036_v44 = vadd.f32 %v190_v35, %v178_v31  ;;  %v3038_v45 = vadd.f32 %v190_v35, %v179_v32  ;;  %v195_v49 = vadd.f32 %v186_v36, %v174_v38  ;;  %v3061_v60 = vadd.f32 %v186_v36, %v175_v50 }
  0x92   : > { %v220_v46 = vcombine.high %v218_v39, %v218_v39  ;;  %v3041_v47 = vrot.slane %v218_v39, %v3011_v19  ;;  %v241_v48 = vrot.slane %v219_v40, %v3011_v19  ;;  %376 = vst.msk [vmem:[%s3026_s24] sm:$0x1] %vm375_vm0, %v227_v41  ;;  %v302_v51 = vcombine.high %v198_v43, %v198_v43 }
  0x93   : > { %v309_v52 = vrot.slane %v198_v43, %v3011_v19  ;;  %v1805_v55 = vcombine.low %v3036_v44, %v3038_v45  ;;  %v1806_v56 = vcombine.high %v3036_v44, %v3038_v45  ;;  %v3066_v61 = vadd.f32 %v186_v36, %v176_v53 }
  0x94   : > { %v3048_v54 = vrot.slane %v220_v46, %v3011_v19  ;;  %377 = vst.msk [vmem:[%s3026_s24 + $0x10] sm:$0x1] %vm375_vm0, %v241_v48  ;;  %380 = vst.msk [vmem:[%s3026_s24 + $0x40] sm:$0x1] %vm375_vm0, %v3041_v47  ;;  %v316_v57 = vrot.slane %v302_v51, %v3011_v19  ;;  %v253_v62 = vcombine.high %v195_v49, %v195_v49  ;;  %v3231_v40 = vsub.s32 1, %v3005_v11 }
  0x95   : > { %v317_v58 = vcombine.high %v309_v52, %v309_v52  ;;  %v325_v59 = vrot.slane %v309_v52, %v3011_v19  ;;  %v260_v63 = vrot.slane %v195_v49, %v3011_v19  ;;  %v1755_v8 = vcombine.low %v3061_v60, %v3066_v61 }
  0x96   : > { %381 = vst.msk [vmem:[%s3026_s24 + $0x50] sm:$0x1] %vm375_vm0, %v3048_v54  ;;  %v318_v0 = vcombine.high %v316_v57, %v316_v57  ;;  %v3070_v1 = vrot.slane %v316_v57, %v3011_v19  ;;  %v267_v4 = vrot.slane %v253_v62, %v3011_v19  ;;  %v1756_v9 = vcombine.high %v3061_v60, %v3066_v61 }
  0x97   : > { %v339_v2 = vrot.slane %v317_v58, %v3011_v19  ;;  %392 = vst.msk [vmem:[%s3026_s24 + $0x100] sm:$0x1] %vm375_vm0, %v325_v59  ;;  %v268_v5 = vcombine.high %v260_v63, %v260_v63  ;;  %v276_v6 = vrot.slane %v260_v63, %v3011_v19  ;;  %v3102_v14 = vrot.slane %v227_v41, %v3076_v3 }
  0x98   : > { %v3081_v7 = vrot.slane %v318_v0, %v3011_v19  ;;  %396 = vst.msk [vmem:[%s3026_s24 + $0x140] sm:$0x1] %vm375_vm0, %v3070_v1  ;;  %v269_v10 = vcombine.high %v267_v4, %v267_v4  ;;  %v3093_v12 = vrot.slane %v267_v4, %v3011_v19  ;;  %v3105_v15 = vrot.slane %v241_v48, %v3076_v3 }
  0x99   : > { %393 = vst.msk [vmem:[%s3026_s24 + $0x110] sm:$0x1] %vm375_vm0, %v339_v2  ;;  %v290_v13 = vrot.slane %v268_v5, %v3011_v19  ;;  %384 = vst.msk [vmem:[%s3026_s24 + $0x80] sm:$0x1] %vm375_vm0, %v276_v6  ;;  %v3115_v17 = vcombine.high %v227_v41, %v227_v41  ;;  %496 = vrot.lane.b32.xlu1 %v3102_v14, %s2950_s25  ;;  %v3122_v18 = vrot.slane %v276_v6, %v3076_v3 }
  0x9a   : > { %397 = vst.msk [vmem:[%s3026_s24 + $0x150] sm:$0x1] %vm375_vm0, %v3081_v7  ;;  %v3108_v16 = vrot.slane %v269_v10, %v3011_v19  ;;  %388 = vst.msk [vmem:[%s3026_s24 + $0xc0] sm:$0x1] %vm375_vm0, %v3093_v12  ;;  %498 = vrot.lane.b32.xlu0 %v3105_v15, %s2950_s25  ;;  %v3127_v21 = vcombine.high %v241_v48, %v241_v48  ;;  %v3135_v22 = vcombine.high %v276_v6, %v276_v6 }
  0x9b   : > { %385 = vst.msk [vmem:[%s3026_s24 + $0x90] sm:$0x1] %vm375_vm0, %v290_v13  ;;  %v3125_v20 = vrot.slane %v290_v13, %v3076_v3  ;;  %378 = vst.msk [vmem:[%s3026_s24 + $0x20] sm:$0x1] %vm375_vm0, %v3115_v17  ;;  %v3137_v23 = vcombine.high %v290_v13, %v290_v13  ;;  %v3142_v24 = vcombine.high %v325_v59, %v325_v59 }
  0x9c   : > { %389 = vst.msk [vmem:[%s3026_s24 + $0xd0] sm:$0x1] %vm375_vm0, %v3108_v16  ;;  %379 = vst.msk [vmem:[%s3026_s24 + $0x30] sm:$0x1] %vm375_vm0, %v3127_v21  ;;  %v3144_v27 = vcombine.high %v339_v2, %v339_v2  ;;  %v3164_v28 = vcombine.high %v3048_v54, %v3048_v54  ;;  %v3168_v29 = vcombine.high %v3041_v47, %v3041_v47 }
  0x9d   : > { %386 = vst.msk [vmem:[%s3026_s24 + $0xa0] sm:$0x1] %vm375_vm0, %v3135_v22  ;;  %387 = vst.msk [vmem:[%s3026_s24 + $0xb0] sm:$0x1] %vm375_vm0, %v3137_v23  ;;  %512 = vrot.lane.b32.xlu1 %v3122_v18, %s2950_s25  ;;  %v3172_v30 = vcombine.high %v3108_v16, %v3108_v16  ;;  %v3176_v31 = vcombine.high %v3093_v12, %v3093_v12  ;;  %v3180_v32 = vcombine.high %v3081_v7, %v3081_v7 }
  0x9e   : > { %514 = vrot.lane.b32.xlu0 %v3125_v20, %s2950_s25  ;;  %394 = vst.msk [vmem:[%s3026_s24 + $0x120] sm:$0x1] %vm375_vm0, %v3142_v24  ;;  %395 = vst.msk [vmem:[%s3026_s24 + $0x130] sm:$0x1] %vm375_vm0, %v3144_v27  ;;  %v3183_v35 = vrot.slane %v325_v59, %v3076_v3  ;;  %v3186_v36 = vrot.slane %v339_v2, %v3076_v3  ;;  %v3193_v37 = vcombine.high %v3070_v1, %v3070_v1 }
  0x9f   : > { %383 = vst.msk [vmem:[%s3026_s24 + $0x70] sm:$0x1] %vm375_vm0, %v3164_v28  ;;  %382 = vst.msk [vmem:[%s3026_s24 + $0x60] sm:$0x1] %vm375_vm0, %v3168_v29  ;;  %v1713_v38 = vrot.slane %v1705_v33, %v3011_v19  ;;  %v1720_v39 = vrot.slane %v1706_v34, %v3011_v19  ;;  %v1763_v59 = vrot.slane %v1755_v8, %v3011_v19 }
  0xa0   : > { %391 = vst.msk [vmem:[%s3026_s24 + $0xf0] sm:$0x1] %vm375_vm0, %v3172_v30  ;;  %390 = vst.msk [vmem:[%s3026_s24 + $0xe0] sm:$0x1] %vm375_vm0, %v3176_v31  ;;  %v1770_v62 = vrot.slane %v1756_v9, %v3011_v19  ;;  %v1813_v0 = vrot.slane %v1805_v55, %v3011_v19  ;;  %v1820_v4 = vrot.slane %v1806_v56, %v3011_v19 }
  0xa1   : > { %399 = vst.msk [vmem:[%s3026_s24 + $0x170] sm:$0x1] %vm375_vm0, %v3180_v32  ;;  %528 = vrot.lane.b32.xlu1 %v3183_v35, %s2950_s25  ;;  %398 = vst.msk [vmem:[%s3026_s24 + $0x160] sm:$0x1] %vm375_vm0, %v3193_v37  ;;  %v3238_v41 = vrot.slane %v1713_v38, %v3011_v19  ;;  %v1721_v42 = vcombine.high %v1713_v38, %v1713_v38  ;;  %v3241_v33 = vrot.slane %v1720_v39, %v3011_v19 }
  0xa2   : > { %530 = vrot.lane.b32.xlu0 %v3186_v36, %s2950_s25  ;;  %v1722_v43 = vcombine.high %v1720_v39, %v1720_v39  ;;  %v3302_v5 = vrot.slane %v1763_v59, %v3011_v19  ;;  %v1771_v6 = vcombine.high %v1763_v59, %v1763_v59  ;;  %v3305_v8 = vrot.slane %v1770_v62, %v3011_v19 }
  0xa3   : > { %v1862_v34 = vrot.slane %v3238_v41, %v3231_v40  ;;  %v3246_v11 = vrot.slane %v1721_v42, %v3011_v19  ;;  %v3250_v46 = vcombine.high %v3238_v41, %v3238_v41  ;;  %v3273_v57 = vcombine.high %v3241_v33, %v3241_v33 }
  0xa4   : > { %v3259_v49 = vrot.slane %v1722_v43, %v3011_v19  ;;  %v1772_v9 = vcombine.high %v1770_v62, %v1770_v62  ;;  %v3311_v55 = vcombine.high %v3302_v5, %v3302_v5  ;;  %v3318_v13 = vrot.slane %v1771_v6, %v3011_v19 }
  0xa5   : > { %592 = vrot.lane.b32.xlu1 %v3102_v14, %s2951_s26  ;;  %v1870_v50 = vrot.slane %v3246_v11, %v3231_v40  ;;  %v1878_v51 = vrot.slane %v3250_v46, %v3231_v40  ;;  %v3267_v52 = vcombine.high %v3246_v11, %v3246_v11  ;;  %v3323_v39 = vrot.slane %v1813_v0, %v3011_v19 }
  0xa6   : > { %594 = vrot.lane.b32.xlu0 %v3105_v15, %s2951_s26  ;;  %v3277_v58 = vcombine.high %v3259_v49, %v3259_v49  ;;  %v3328_v43 = vrot.slane %v1772_v9, %v3011_v19  ;;  %v3332_v59 = vcombine.high %v3305_v8, %v3305_v8  ;;  %v1821_v62 = vcombine.high %v1813_v0, %v1813_v0 }
  0xa7   : > { %v3336_v6 = vrot.slane %v3115_v17, %v3076_v3  ;;  %v3340_v38 = vrot.slane %v3127_v21, %v3076_v3  ;;  %v3346_v9 = vcombine.high %v3318_v13, %v3318_v13  ;;  %v3369_v0 = vcombine.high %v3323_v39, %v3323_v39 }
  0xa8   : > { %v3360_v21 = vcombine.high %v3328_v43, %v3328_v43  ;;  %v3365_v42 = vrot.slane %v1821_v62, %v3011_v19  ;;  %v3377_v17 = vrot.slane %v3041_v47, %v3076_v3  ;;  %v3381_v2 = vrot.slane %v3048_v54, %v3076_v3 }
  0xa9   : > { %608 = vrot.lane.b32.xlu1 %v3122_v18, %s2951_s26  ;;  %v3398_v54 = vrot.slane %v1820_v4, %v3011_v19  ;;  %v1822_v56 = vcombine.high %v1820_v4, %v1820_v4  ;;  %v3402_v10 = vrot.slane %v3135_v22, %v3076_v3  ;;  %v3406_v53 = vrot.slane %v3137_v23, %v3076_v3 }
  0xaa   : > { %610 = vrot.lane.b32.xlu0 %v3125_v20, %s2951_s26  ;;  %v3395_v47 = vcombine.high %v3365_v42, %v3365_v42  ;;  %v3433_v48 = vrot.slane %v3108_v16, %v3076_v3  ;;  %v3451_v16 = vrot.slane %v3144_v27, %v3076_v3  ;;  %v3459_v22 = vrot.slane %v3070_v1, %v3076_v3 }
  0xab   : > { %v3413_v63 = vrot.slane %v1822_v56, %v3011_v19  ;;  %v3417_v4 = vcombine.high %v3398_v54, %v3398_v54  ;;  %v3429_v56 = vrot.slane %v3093_v12, %v3076_v3  ;;  %v3447_v12 = vrot.slane %v3142_v24, %v3076_v3 }
  0xac   : > { %v3463_v23 = vrot.slane %v3081_v7, %v3076_v3  ;;  %v3511_v1 = vrot.slane %v3164_v28, %v3076_v3  ;;  %v3519_v7 = vrot.slane %v3168_v29, %v3076_v3  ;;  %v3523_v24 = vrot.slane %v3172_v30, %v3076_v3 }
  0xad   : > { %624 = vrot.lane.b32.xlu1 %v3183_v35, %s2951_s26  ;;  %v3437_v62 = vcombine.high %v3413_v63, %v3413_v63  ;;  %v3531_v27 = vrot.slane %v3176_v31, %v3076_v3  ;;  %v3535_v28 = vrot.slane %v3180_v32, %v3076_v3  ;;  %v3543_v29 = vrot.slane %v3193_v37, %v3076_v3 }
  0xae   : > { %626 = vrot.lane.b32.xlu0 %v3186_v36, %s2951_s26 }
  0xb1   : > { %688 = vrot.lane.b32.xlu1 %v3102_v14, %s2952_s27 }
  0xb2   : > { %690 = vrot.lane.b32.xlu0 %v3105_v15, %s2952_s27 }
  0xb5   : > { %704 = vrot.lane.b32.xlu1 %v3122_v18, %s2952_s27 }
  0xb6   : > { %706 = vrot.lane.b32.xlu0 %v3125_v20, %s2952_s27 }
  0xb9   : > { %720 = vrot.lane.b32.xlu1 %v3183_v35, %s2952_s27 }
  0xba   : > { %722 = vrot.lane.b32.xlu0 %v3186_v36, %s2952_s27 }
  0xbd   : > { %500 = vrot.lane.b32.xlu1 %v3336_v6, %s2950_s25 }
  0xbe   : > { %502 = vrot.lane.b32.xlu0 %v3340_v38, %s2950_s25 }
  0xc1   : > { %504 = vrot.lane.b32.xlu1 %v3377_v17, %s2950_s25 }
  0xc2   : > { %506 = vrot.lane.b32.xlu0 %v3381_v2, %s2950_s25 }
  0xc5   : > { %516 = vrot.lane.b32.xlu1 %v3402_v10, %s2950_s25 }
  0xc6   : > { %518 = vrot.lane.b32.xlu0 %v3406_v53, %s2950_s25 }
  0xc9   : > { %520 = vrot.lane.b32.xlu1 %v3429_v56, %s2950_s25 }
  0xca   : > { %522 = vrot.lane.b32.xlu0 %v3433_v48, %s2950_s25 }
  0xcd   : > { %532 = vrot.lane.b32.xlu1 %v3447_v12, %s2950_s25 }
  0xce   : > { %534 = vrot.lane.b32.xlu0 %v3451_v16, %s2950_s25 }
  0xd1   : > { %536 = vrot.lane.b32.xlu1 %v3459_v22, %s2950_s25 }
  0xd2   : > { %538 = vrot.lane.b32.xlu0 %v3463_v23, %s2950_s25 }
  0xd5   : > { %596 = vrot.lane.b32.xlu1 %v3336_v6, %s2951_s26 }
  0xd6   : > { %598 = vrot.lane.b32.xlu0 %v3340_v38, %s2951_s26 }
  0xd9   : > { %600 = vrot.lane.b32.xlu1 %v3377_v17, %s2951_s26 }
  0xda   : > { %602 = vrot.lane.b32.xlu0 %v3381_v2, %s2951_s26 }
  0xdd   : > { %612 = vrot.lane.b32.xlu1 %v3402_v10, %s2951_s26 }
  0xde   : > { %614 = vrot.lane.b32.xlu0 %v3406_v53, %s2951_s26 }
  0xe1   : > { %616 = vrot.lane.b32.xlu1 %v3429_v56, %s2951_s26 }
  0xe2   : > { %618 = vrot.lane.b32.xlu0 %v3433_v48, %s2951_s26 }
  0xe5   : > { %628 = vrot.lane.b32.xlu1 %v3447_v12, %s2951_s26 }
  0xe6   : > { %630 = vrot.lane.b32.xlu0 %v3451_v16, %s2951_s26 }
  0xe9   : > { %632 = vrot.lane.b32.xlu1 %v3459_v22, %s2951_s26 }
  0xea   : > { %634 = vrot.lane.b32.xlu0 %v3463_v23, %s2951_s26 }
  0xed   : > { %692 = vrot.lane.b32.xlu1 %v3336_v6, %s2952_s27 }
  0xee   : > { %694 = vrot.lane.b32.xlu0 %v3340_v38, %s2952_s27 }
  0xf1   : > { %696 = vrot.lane.b32.xlu1 %v3377_v17, %s2952_s27 }
  0xf2   : > { %698 = vrot.lane.b32.xlu0 %v3381_v2, %s2952_s27 }
  0xf5   : > { %708 = vrot.lane.b32.xlu1 %v3402_v10, %s2952_s27 }
  0xf6   : > { %710 = vrot.lane.b32.xlu0 %v3406_v53, %s2952_s27 }
  0xf9   : > { %712 = vrot.lane.b32.xlu1 %v3429_v56, %s2952_s27 }
  0xfa   : > { %714 = vrot.lane.b32.xlu0 %v3433_v48, %s2952_s27 }
  0xfd   : > { %724 = vrot.lane.b32.xlu1 %v3447_v12, %s2952_s27 }
  0xfe   : > { %510 = vrot.lane.b32.xlu0 %v3511_v1, %s2950_s25 }
 0x101   : > { %508 = vrot.lane.b32.xlu1 %v3519_v7, %s2950_s25 }
 0x102   : > { %526 = vrot.lane.b32.xlu0 %v3523_v24, %s2950_s25 }
 0x105   : > { %524 = vrot.lane.b32.xlu1 %v3531_v27, %s2950_s25 }
 0x106   : > { %542 = vrot.lane.b32.xlu0 %v3535_v28, %s2950_s25 }
 0x109   : > { %540 = vrot.lane.b32.xlu1 %v3543_v29, %s2950_s25 }
 0x10a   : > { %606 = vrot.lane.b32.xlu0 %v3511_v1, %s2951_s26 }
 0x10b   : > { %v497_v30 = vpop.permute.xlu1 %496 }
 0x10c   : > { %v499_v31 = vpop.permute.xlu0 %498  ;;  %568 = vst.msk [vmem:[%s3026_s24 + $0x1] sm:$0x1] %vm375_vm0, %v497_v30 }
 0x10d   : > { %569 = vst.msk [vmem:[%s3026_s24 + $0x11] sm:$0x1] %vm375_vm0, %v499_v31  ;;  %604 = vrot.lane.b32.xlu1 %v3519_v7, %s2951_s26 }
 0x10e   : > { %622 = vrot.lane.b32.xlu0 %v3523_v24, %s2951_s26 }
 0x10f   : > { %v513_v32 = vpop.permute.xlu1 %512 }
 0x110   : > { %v515_v37 = vpop.permute.xlu0 %514  ;;  %576 = vst.msk [vmem:[%s3026_s24 + $0x81] sm:$0x1] %vm375_vm0, %v513_v32 }
 0x111   : > { %577 = vst.msk [vmem:[%s3026_s24 + $0x91] sm:$0x1] %vm375_vm0, %v515_v37  ;;  %620 = vrot.lane.b32.xlu1 %v3531_v27, %s2951_s26 }
 0x112   : > { %638 = vrot.lane.b32.xlu0 %v3535_v28, %s2951_s26 }
 0x113   : > { %v529_v30 = vpop.permute.xlu1 %528 }
 0x114   : > { %v531_v31 = vpop.permute.xlu0 %530  ;;  %584 = vst.msk [vmem:[%s3026_s24 + $0x101] sm:$0x1] %vm375_vm0, %v529_v30 }
 0x115   : > { %585 = vst.msk [vmem:[%s3026_s24 + $0x111] sm:$0x1] %vm375_vm0, %v531_v31  ;;  %636 = vrot.lane.b32.xlu1 %v3543_v29, %s2951_s26 }
 0x116   : > { %702 = vrot.lane.b32.xlu0 %v3511_v1, %s2952_s27 }
 0x117   : > { %v593_v32 = vpop.permute.xlu1 %592 }
 0x118   : > { %v595_v37 = vpop.permute.xlu0 %594  ;;  %664 = vst.msk [vmem:[%s3026_s24 + $0x2] sm:$0x1] %vm375_vm0, %v593_v32 }
 0x119   : > { %665 = vst.msk [vmem:[%s3026_s24 + $0x12] sm:$0x1] %vm375_vm0, %v595_v37  ;;  %700 = vrot.lane.b32.xlu1 %v3519_v7, %s2952_s27 }
 0x11a   : > { %718 = vrot.lane.b32.xlu0 %v3523_v24, %s2952_s27 }
 0x11b   : > { %v609_v30 = vpop.permute.xlu1 %608 }
 0x11c   : > { %v611_v31 = vpop.permute.xlu0 %610  ;;  %672 = vst.msk [vmem:[%s3026_s24 + $0x82] sm:$0x1] %vm375_vm0, %v609_v30 }
 0x11d   : > { %673 = vst.msk [vmem:[%s3026_s24 + $0x92] sm:$0x1] %vm375_vm0, %v611_v31  ;;  %716 = vrot.lane.b32.xlu1 %v3531_v27, %s2952_s27 }
 0x11e   : > { %726 = vrot.lane.b32.xlu0 %v3451_v16, %s2952_s27 }
 0x11f   : > { %v625_v32 = vpop.permute.xlu1 %624 }
 0x120   : > { %v627_v37 = vpop.permute.xlu0 %626  ;;  %680 = vst.msk [vmem:[%s3026_s24 + $0x102] sm:$0x1] %vm375_vm0, %v625_v32 }
 0x121   : > { %681 = vst.msk [vmem:[%s3026_s24 + $0x112] sm:$0x1] %vm375_vm0, %v627_v37  ;;  %728 = vrot.lane.b32.xlu1 %v3459_v22, %s2952_s27 }
 0x122   : > { %730 = vrot.lane.b32.xlu0 %v3463_v23, %s2952_s27 }
 0x123   : > { %v689_v30 = vpop.permute.xlu1 %688 }
 0x124   : > { %v691_v31 = vpop.permute.xlu0 %690  ;;  %760 = vst.msk [vmem:[%s3026_s24 + $0x3] sm:$0x1] %vm375_vm0, %v689_v30 }
 0x125   : > { %761 = vst.msk [vmem:[%s3026_s24 + $0x13] sm:$0x1] %vm375_vm0, %v691_v31  ;;  %732 = vrot.lane.b32.xlu1 %v3543_v29, %s2952_s27 }
 0x126   : > { %734 = vrot.lane.b32.xlu0 %v3535_v28, %s2952_s27 }
 0x127   : > { %v705_v32 = vpop.permute.xlu1 %704 }
 0x128   : > { %v707_v37 = vpop.permute.xlu0 %706  ;;  %768 = vst.msk [vmem:[%s3026_s24 + $0x83] sm:$0x1] %vm375_vm0, %v705_v32 }
 0x129   : > { %769 = vst.msk [vmem:[%s3026_s24 + $0x93] sm:$0x1] %vm375_vm0, %v707_v37  ;;  %784 = vrot.lane.b32.xlu1 %v3102_v14, %s2953_s28 }
 0x12a   : > { %786 = vrot.lane.b32.xlu0 %v3105_v15, %s2953_s28 }
 0x12b   : > { %v721_v30 = vpop.permute.xlu1 %720 }
 0x12c   : > { %v723_v31 = vpop.permute.xlu0 %722  ;;  %776 = vst.msk [vmem:[%s3026_s24 + $0x103] sm:$0x1] %vm375_vm0, %v721_v30 }
 0x12d   : > { %777 = vst.msk [vmem:[%s3026_s24 + $0x113] sm:$0x1] %vm375_vm0, %v723_v31  ;;  %788 = vrot.lane.b32.xlu1 %v3336_v6, %s2953_s28 }
 0x12e   : > { %790 = vrot.lane.b32.xlu0 %v3340_v38, %s2953_s28 }
 0x12f   : > { %v501_v32 = vpop.permute.xlu1 %500 }
 0x130   : > { %v503_v37 = vpop.permute.xlu0 %502  ;;  %570 = vst.msk [vmem:[%s3026_s24 + $0x21] sm:$0x1] %vm375_vm0, %v501_v32 }
 0x131   : > { %571 = vst.msk [vmem:[%s3026_s24 + $0x31] sm:$0x1] %vm375_vm0, %v503_v37  ;;  %792 = vrot.lane.b32.xlu1 %v3377_v17, %s2953_s28 }
 0x132   : > { %794 = vrot.lane.b32.xlu0 %v3381_v2, %s2953_s28 }
 0x133   : > { %v505_v30 = vpop.permute.xlu1 %504 }
 0x134   : > { %v507_v31 = vpop.permute.xlu0 %506  ;;  %572 = vst.msk [vmem:[%s3026_s24 + $0x41] sm:$0x1] %vm375_vm0, %v505_v30 }
 0x135   : > { %573 = vst.msk [vmem:[%s3026_s24 + $0x51] sm:$0x1] %vm375_vm0, %v507_v31  ;;  %796 = vrot.lane.b32.xlu1 %v3519_v7, %s2953_s28 }
 0x136   : > { %798 = vrot.lane.b32.xlu0 %v3511_v1, %s2953_s28 }
 0x137   : > { %v517_v32 = vpop.permute.xlu1 %516 }
 0x138   : > { %v519_v37 = vpop.permute.xlu0 %518  ;;  %578 = vst.msk [vmem:[%s3026_s24 + $0xa1] sm:$0x1] %vm375_vm0, %v517_v32 }
 0x139   : > { %579 = vst.msk [vmem:[%s3026_s24 + $0xb1] sm:$0x1] %vm375_vm0, %v519_v37  ;;  %800 = vrot.lane.b32.xlu1 %v3122_v18, %s2953_s28 }
 0x13a   : > { %802 = vrot.lane.b32.xlu0 %v3125_v20, %s2953_s28 }
 0x13b   : > { %v521_v30 = vpop.permute.xlu1 %520 }
 0x13c   : > { %v523_v31 = vpop.permute.xlu0 %522  ;;  %580 = vst.msk [vmem:[%s3026_s24 + $0xc1] sm:$0x1] %vm375_vm0, %v521_v30 }
 0x13d   : > { %581 = vst.msk [vmem:[%s3026_s24 + $0xd1] sm:$0x1] %vm375_vm0, %v523_v31  ;;  %804 = vrot.lane.b32.xlu1 %v3402_v10, %s2953_s28 }
 0x13e   : > { %806 = vrot.lane.b32.xlu0 %v3406_v53, %s2953_s28 }
 0x13f   : > { %v533_v32 = vpop.permute.xlu1 %532 }
 0x140   : > { %v535_v37 = vpop.permute.xlu0 %534  ;;  %586 = vst.msk [vmem:[%s3026_s24 + $0x121] sm:$0x1] %vm375_vm0, %v533_v32 }
 0x141   : > { %587 = vst.msk [vmem:[%s3026_s24 + $0x131] sm:$0x1] %vm375_vm0, %v535_v37  ;;  %808 = vrot.lane.b32.xlu1 %v3429_v56, %s2953_s28 }
 0x142   : > { %810 = vrot.lane.b32.xlu0 %v3433_v48, %s2953_s28 }
 0x143   : > { %v537_v30 = vpop.permute.xlu1 %536 }
 0x144   : > { %v539_v31 = vpop.permute.xlu0 %538  ;;  %588 = vst.msk [vmem:[%s3026_s24 + $0x141] sm:$0x1] %vm375_vm0, %v537_v30 }
 0x145   : > { %589 = vst.msk [vmem:[%s3026_s24 + $0x151] sm:$0x1] %vm375_vm0, %v539_v31  ;;  %812 = vrot.lane.b32.xlu1 %v3531_v27, %s2953_s28 }
 0x146   : > { %814 = vrot.lane.b32.xlu0 %v3523_v24, %s2953_s28 }
 0x147   : > { %v597_v32 = vpop.permute.xlu1 %596 }
 0x148   : > { %v599_v37 = vpop.permute.xlu0 %598  ;;  %666 = vst.msk [vmem:[%s3026_s24 + $0x22] sm:$0x1] %vm375_vm0, %v597_v32 }
 0x149   : > { %667 = vst.msk [vmem:[%s3026_s24 + $0x32] sm:$0x1] %vm375_vm0, %v599_v37  ;;  %816 = vrot.lane.b32.xlu1 %v3183_v35, %s2953_s28 }
 0x14a   : > { %818 = vrot.lane.b32.xlu0 %v3186_v36, %s2953_s28 }
 0x14b   : > { %v601_v30 = vpop.permute.xlu1 %600 }
 0x14c   : > { %v603_v31 = vpop.permute.xlu0 %602  ;;  %668 = vst.msk [vmem:[%s3026_s24 + $0x42] sm:$0x1] %vm375_vm0, %v601_v30 }
 0x14d   : > { %669 = vst.msk [vmem:[%s3026_s24 + $0x52] sm:$0x1] %vm375_vm0, %v603_v31  ;;  %820 = vrot.lane.b32.xlu1 %v3447_v12, %s2953_s28 }
 0x14e   : > { %822 = vrot.lane.b32.xlu0 %v3451_v16, %s2953_s28 }
 0x14f   : > { %v613_v32 = vpop.permute.xlu1 %612 }
 0x150   : > { %v615_v37 = vpop.permute.xlu0 %614  ;;  %674 = vst.msk [vmem:[%s3026_s24 + $0xa2] sm:$0x1] %vm375_vm0, %v613_v32 }
 0x151   : > { %675 = vst.msk [vmem:[%s3026_s24 + $0xb2] sm:$0x1] %vm375_vm0, %v615_v37  ;;  %824 = vrot.lane.b32.xlu1 %v3459_v22, %s2953_s28 }
 0x152   : > { %826 = vrot.lane.b32.xlu0 %v3463_v23, %s2953_s28 }
 0x153   : > { %v617_v30 = vpop.permute.xlu1 %616 }
 0x154   : > { %v619_v31 = vpop.permute.xlu0 %618  ;;  %676 = vst.msk [vmem:[%s3026_s24 + $0xc2] sm:$0x1] %vm375_vm0, %v617_v30 }
 0x155   : > { %677 = vst.msk [vmem:[%s3026_s24 + $0xd2] sm:$0x1] %vm375_vm0, %v619_v31  ;;  %828 = vrot.lane.b32.xlu1 %v3543_v29, %s2953_s28 }
 0x156   : > { %830 = vrot.lane.b32.xlu0 %v3535_v28, %s2953_s28 }
 0x157   : > { %v629_v32 = vpop.permute.xlu1 %628 }
 0x158   : > { %v631_v37 = vpop.permute.xlu0 %630  ;;  %682 = vst.msk [vmem:[%s3026_s24 + $0x122] sm:$0x1] %vm375_vm0, %v629_v32 }
 0x159   : > { %683 = vst.msk [vmem:[%s3026_s24 + $0x132] sm:$0x1] %vm375_vm0, %v631_v37  ;;  %880 = vrot.lane.b32.xlu1 %v3102_v14, %s2954_s29 }
 0x15a   : > { %882 = vrot.lane.b32.xlu0 %v3105_v15, %s2954_s29 }
 0x15b   : > { %v633_v30 = vpop.permute.xlu1 %632 }
 0x15c   : > { %v635_v31 = vpop.permute.xlu0 %634  ;;  %684 = vst.msk [vmem:[%s3026_s24 + $0x142] sm:$0x1] %vm375_vm0, %v633_v30 }
 0x15d   : > { %685 = vst.msk [vmem:[%s3026_s24 + $0x152] sm:$0x1] %vm375_vm0, %v635_v31  ;;  %884 = vrot.lane.b32.xlu1 %v3336_v6, %s2954_s29 }
 0x15e   : > { %886 = vrot.lane.b32.xlu0 %v3340_v38, %s2954_s29 }
 0x15f   : > { %v693_v14 = vpop.permute.xlu1 %692 }
 0x160   : > { %v695_v32 = vpop.permute.xlu0 %694  ;;  %762 = vst.msk [vmem:[%s3026_s24 + $0x23] sm:$0x1] %vm375_vm0, %v693_v14 }
 0x161   : > { %763 = vst.msk [vmem:[%s3026_s24 + $0x33] sm:$0x1] %vm375_vm0, %v695_v32  ;;  %888 = vrot.lane.b32.xlu1 %v3377_v17, %s2954_s29 }
 0x162   : > { %890 = vrot.lane.b32.xlu0 %v3381_v2, %s2954_s29 }
 0x163   : > { %v697_v15 = vpop.permute.xlu1 %696 }
 0x164   : > { %v699_v6 = vpop.permute.xlu0 %698  ;;  %764 = vst.msk [vmem:[%s3026_s24 + $0x43] sm:$0x1] %vm375_vm0, %v697_v15 }
 0x165   : > { %765 = vst.msk [vmem:[%s3026_s24 + $0x53] sm:$0x1] %vm375_vm0, %v699_v6  ;;  %892 = vrot.lane.b32.xlu1 %v3519_v7, %s2954_s29 }
 0x166   : > { %894 = vrot.lane.b32.xlu0 %v3511_v1, %s2954_s29 }
 0x167   : > { %v709_v38 = vpop.permute.xlu1 %708 }
 0x168   : > { %v711_v17 = vpop.permute.xlu0 %710  ;;  %770 = vst.msk [vmem:[%s3026_s24 + $0xa3] sm:$0x1] %vm375_vm0, %v709_v38 }
 0x169   : > { %771 = vst.msk [vmem:[%s3026_s24 + $0xb3] sm:$0x1] %vm375_vm0, %v711_v17  ;;  %896 = vrot.lane.b32.xlu1 %v3122_v18, %s2954_s29 }
 0x16a   : > { %898 = vrot.lane.b32.xlu0 %v3125_v20, %s2954_s29 }
 0x16b   : > { %v713_v2 = vpop.permute.xlu1 %712 }
 0x16c   : > { %v715_v7 = vpop.permute.xlu0 %714  ;;  %772 = vst.msk [vmem:[%s3026_s24 + $0xc3] sm:$0x1] %vm375_vm0, %v713_v2 }
 0x16d   : > { %773 = vst.msk [vmem:[%s3026_s24 + $0xd3] sm:$0x1] %vm375_vm0, %v715_v7  ;;  %900 = vrot.lane.b32.xlu1 %v3402_v10, %s2954_s29 }
 0x16e   : > { %902 = vrot.lane.b32.xlu0 %v3406_v53, %s2954_s29 }
 0x16f   : > { %v725_v18 = vpop.permute.xlu1 %724 }
 0x170   : > { %v511_v1 = vpop.permute.xlu0 %510  ;;  %778 = vst.msk [vmem:[%s3026_s24 + $0x123] sm:$0x1] %vm375_vm0, %v725_v18 }
 0x171   : > { %575 = vst.msk [vmem:[%s3026_s24 + $0x71] sm:$0x1] %vm375_vm0, %v511_v1  ;;  %904 = vrot.lane.b32.xlu1 %v3429_v56, %s2954_s29 }
 0x172   : > { %906 = vrot.lane.b32.xlu0 %v3433_v48, %s2954_s29  ;;  %v986_v48 = vrot.slane %v3017_v25, %v3011_v19 }
 0x173   : > { %v509_v20 = vpop.permute.xlu1 %508 }
 0x174   : > { %v527_v10 = vpop.permute.xlu0 %526  ;;  %574 = vst.msk [vmem:[%s3026_s24 + $0x61] sm:$0x1] %vm375_vm0, %v509_v20 }
 0x175   : > { %583 = vst.msk [vmem:[%s3026_s24 + $0xf1] sm:$0x1] %vm375_vm0, %v527_v10  ;;  %908 = vrot.lane.b32.xlu1 %v3531_v27, %s2954_s29  ;;  %v1028_v10 = vcombine.high %v3061_v60, %v3061_v60 }
 0x176   : > { %910 = vrot.lane.b32.xlu0 %v3523_v24, %s2954_s29 }
 0x177   : > { %v525_v53 = vpop.permute.xlu1 %524 }
 0x178   : > { %v543_v37 = vpop.permute.xlu0 %542  ;;  %582 = vst.msk [vmem:[%s3026_s24 + $0xe1] sm:$0x1] %vm375_vm0, %v525_v53 }
 0x179   : > { %591 = vst.msk [vmem:[%s3026_s24 + $0x171] sm:$0x1] %vm375_vm0, %v543_v37  ;;  %912 = vrot.lane.b32.xlu1 %v3183_v35, %s2954_s29  ;;  %v979_v35 = vcombine.high %v3017_v25, %v3017_v25 }
 0x17a   : > { %914 = vrot.lane.b32.xlu0 %v3186_v36, %s2954_s29  ;;  %v994_v36 = vcombine.high %v986_v48, %v986_v48 }
 0x17b   : > { %v541_v56 = vpop.permute.xlu1 %540 }
 0x17c   : > { %v607_v27 = vpop.permute.xlu0 %606  ;;  %590 = vst.msk [vmem:[%s3026_s24 + $0x161] sm:$0x1] %vm375_vm0, %v541_v56  ;;  %v1016_v14 = vrot.slane %v994_v36, %v3011_v19 }
 0x17d   : > { %671 = vst.msk [vmem:[%s3026_s24 + $0x72] sm:$0x1] %vm375_vm0, %v607_v27  ;;  %916 = vrot.lane.b32.xlu1 %v3447_v12, %s2954_s29  ;;  %v1002_v12 = vrot.slane %v986_v48, %v3011_v19 }
 0x17e   : > { %918 = vrot.lane.b32.xlu0 %v3451_v16, %s2954_s29  ;;  %v993_v16 = vrot.slane %v979_v35, %v3011_v19  ;;  %v3808_v15 = vrot.slane %v1016_v14, %v3076_v3  ;;  %v1026_v38 = vcombine.high %v1016_v14, %v1016_v14 }
 0x17f   : > { %v605_v24 = vpop.permute.xlu1 %604  ;;  %v1024_v6 = vcombine.high %v1002_v12, %v1002_v12 }
 0x180   : > { %v623_v30 = vpop.permute.xlu0 %622  ;;  %670 = vst.msk [vmem:[%s3026_s24 + $0x62] sm:$0x1] %vm375_vm0, %v605_v24  ;;  %v995_v17 = vcombine.high %v993_v16, %v993_v16  ;;  %v3824_v18 = vrot.slane %v1026_v38, %v3076_v3  ;;  %v1009_v1 = vrot.slane %v993_v16, %v3011_v19 }
 0x181   : > { %679 = vst.msk [vmem:[%s3026_s24 + $0xf2] sm:$0x1] %vm375_vm0, %v623_v30  ;;  %920 = vrot.lane.b32.xlu1 %v3459_v22, %s2954_s29  ;;  %v3805_v22 = vrot.slane %v1002_v12, %v3076_v3  ;;  %v3821_v2 = vrot.slane %v1024_v6, %v3076_v3 }
 0x182   : > { %922 = vrot.lane.b32.xlu0 %v3463_v23, %s2954_s29  ;;  %v1023_v20 = vrot.slane %v995_v17, %v3011_v19  ;;  %v3839_v48 = vrot.slane %v1009_v1, %v3076_v3  ;;  %v1025_v35 = vcombine.high %v1009_v1, %v1009_v1 }
 0x183   : > { %v621_v25 = vpop.permute.xlu1 %620 }
 0x184   : > { %v639_v31 = vpop.permute.xlu0 %638  ;;  %678 = vst.msk [vmem:[%s3026_s24 + $0xe2] sm:$0x1] %vm375_vm0, %v621_v25  ;;  %v3842_v27 = vrot.slane %v1023_v20, %v3076_v3  ;;  %v1027_v36 = vcombine.high %v1023_v20, %v1023_v20  ;;  %v3854_v30 = vrot.slane %v1025_v35, %v3076_v3 }
 0x185   : > { %687 = vst.msk [vmem:[%s3026_s24 + $0x172] sm:$0x1] %vm375_vm0, %v639_v31  ;;  %924 = vrot.lane.b32.xlu1 %v3543_v29, %s2954_s29 }
 0x186   : > { %926 = vrot.lane.b32.xlu0 %v3535_v28, %s2954_s29  ;;  %v1035_v28 = vrot.slane %v3061_v60, %v3011_v19  ;;  %v1042_v60 = vrot.slane %v1028_v10, %v3011_v19  ;;  %v3857_v16 = vrot.slane %v1027_v36, %v3076_v3 }
 0x187   : > { %v637_v23 = vpop.permute.xlu1 %636 }
 0x188   : > { %v703_v32 = vpop.permute.xlu0 %702  ;;  %686 = vst.msk [vmem:[%s3026_s24 + $0x162] sm:$0x1] %vm375_vm0, %v637_v23  ;;  %v1043_v53 = vcombine.high %v1035_v28, %v1035_v28  ;;  %v1051_v25 = vrot.slane %v1035_v28, %v3011_v19  ;;  %v1044_v14 = vcombine.high %v1042_v60, %v1042_v60 }
 0x189   : > { %767 = vst.msk [vmem:[%s3026_s24 + $0x73] sm:$0x1] %vm375_vm0, %v703_v32  ;;  %1222 = vrot.lane.b32.xlu1 %v3805_v22, %s2955_s30 }
 0x18a   : > { %1224 = vrot.lane.b32.xlu0 %v3808_v15, %s2955_s30  ;;  %v1065_v31 = vrot.slane %v1043_v53, %v3011_v19  ;;  %v3870_v32 = vrot.slane %v1051_v25, %v3076_v3  ;;  %v1073_v17 = vcombine.high %v1051_v25, %v1051_v25  ;;  %v1058_v53 = vrot.slane %v1042_v60, %v3011_v19 }
 0x18b   : > { %v701_v29 = vpop.permute.xlu1 %700 }
 0x18c   : > { %v719_v7 = vpop.permute.xlu0 %718  ;;  %766 = vst.msk [vmem:[%s3026_s24 + $0x63] sm:$0x1] %vm375_vm0, %v701_v29  ;;  %v3873_v38 = vrot.slane %v1065_v31, %v3076_v3  ;;  %v1075_v28 = vcombine.high %v1065_v31, %v1065_v31  ;;  %v1084_v29 = vrot.slane %v3036_v44, %v3011_v19  ;;  %v3886_v1 = vrot.slane %v1073_v17, %v3076_v3 }
 0x18d   : > { %775 = vst.msk [vmem:[%s3026_s24 + $0xf3] sm:$0x1] %vm375_vm0, %v719_v7  ;;  %1226 = vrot.lane.b32.xlu1 %v3821_v2, %s2955_s30  ;;  %v1074_v25 = vcombine.high %v1058_v53, %v1058_v53 }
 0x18e   : > { %1228 = vrot.lane.b32.xlu0 %v3824_v18, %s2955_s30  ;;  %v3889_v10 = vrot.slane %v1075_v28, %v3076_v3  ;;  %v1092_v35 = vcombine.high %v1084_v29, %v1084_v29 }
 0x18f   : > { %v717_v37 = vpop.permute.xlu1 %716 }
 0x190   : > { %v727_v56 = vpop.permute.xlu0 %726  ;;  %774 = vst.msk [vmem:[%s3026_s24 + $0xe3] sm:$0x1] %vm375_vm0, %v717_v37  ;;  %v1072_v37 = vrot.slane %v1044_v14, %v3011_v19 }
 0x191   : > { %779 = vst.msk [vmem:[%s3026_s24 + $0x133] sm:$0x1] %vm375_vm0, %v727_v56  ;;  %1230 = vrot.lane.b32.xlu1 %v3839_v48, %s2955_s30  ;;  %v1077_v56 = vcombine.high %v3036_v44, %v3036_v44  ;;  %v1100_v44 = vrot.slane %v1084_v29, %v3011_v19 }
 0x192   : > { %1232 = vrot.lane.b32.xlu0 %v3842_v27, %s2955_s30  ;;  %v1076_v31 = vcombine.high %v1072_v37, %v1072_v37 }
 0x193   : > { %v729_v24 = vpop.permute.xlu1 %728  ;;  %v1091_v14 = vrot.slane %v1077_v56, %v3011_v19  ;;  %v3935_v29 = vrot.slane %v1100_v44, %v3076_v3  ;;  %v1122_v56 = vcombine.high %v1100_v44, %v1100_v44 }
 0x194   : > { %v731_v12 = vpop.permute.xlu0 %730  ;;  %780 = vst.msk [vmem:[%s3026_s24 + $0x143] sm:$0x1] %vm375_vm0, %v729_v24  ;;  %v3904_v24 = vrot.slane %v1058_v53, %v3076_v3  ;;  %v3923_v28 = vrot.slane %v1076_v31, %v3076_v3 }
 0x195   : > { %781 = vst.msk [vmem:[%s3026_s24 + $0x153] sm:$0x1] %vm375_vm0, %v731_v12  ;;  %1234 = vrot.lane.b32.xlu1 %v3854_v30, %s2955_s30  ;;  %v3907_v12 = vrot.slane %v1072_v37, %v3076_v3 }
 0x196   : > { %1236 = vrot.lane.b32.xlu0 %v3857_v16, %s2955_s30 }
 0x197   : > { %v733_v23 = vpop.permute.xlu1 %732 }
 0x198   : > { %v735_v6 = vpop.permute.xlu0 %734  ;;  %782 = vst.msk [vmem:[%s3026_s24 + $0x163] sm:$0x1] %vm375_vm0, %v733_v23 }
 0x199   : > { %783 = vst.msk [vmem:[%s3026_s24 + $0x173] sm:$0x1] %vm375_vm0, %v735_v6  ;;  %1238 = vrot.lane.b32.xlu1 %v3870_v32, %s2955_s30  ;;  %v3920_v6 = vrot.slane %v1074_v25, %v3076_v3  ;;  %v3949_v25 = vrot.slane %v1122_v56, %v3076_v3 }
 0x19a   : > { %1240 = vrot.lane.b32.xlu0 %v3873_v38, %s2955_s30 }
 0x19b   : > { %v785_v7 = vpop.permute.xlu1 %784 }
 0x19c   : > { %v787_v20 = vpop.permute.xlu0 %786  ;;  %856 = vst.msk [vmem:[%s3026_s24 + $0x4] sm:$0x1] %vm375_vm0, %v785_v7  ;;  %v1114_v7 = vrot.slane %v1092_v35, %v3011_v19 }
 0x19d   : > { %857 = vst.msk [vmem:[%s3026_s24 + $0x14] sm:$0x1] %vm375_vm0, %v787_v20  ;;  %1242 = vrot.lane.b32.xlu1 %v3886_v1, %s2955_s30 }
 0x19e   : > { %1244 = vrot.lane.b32.xlu0 %v3889_v10, %s2955_s30  ;;  %v3938_v37 = vrot.slane %v1114_v7, %v3076_v3  ;;  %v1124_v35 = vcombine.high %v1114_v7, %v1114_v7 }
 0x19f   : > { %v789_v36 = vpop.permute.xlu1 %788 }
 0x1a0   : > { %v791_v60 = vpop.permute.xlu0 %790  ;;  %858 = vst.msk [vmem:[%s3026_s24 + $0x24] sm:$0x1] %vm375_vm0, %v789_v36  ;;  %v1093_v36 = vcombine.high %v1091_v14, %v1091_v14  ;;  %v3952_v44 = vrot.slane %v1124_v35, %v3076_v3 }
 0x1a1   : > { %859 = vst.msk [vmem:[%s3026_s24 + $0x34] sm:$0x1] %vm375_vm0, %v791_v60  ;;  %1246 = vrot.lane.b32.xlu1 %v3904_v24, %s2955_s30 }
 0x1a2   : > { %1248 = vrot.lane.b32.xlu0 %v3907_v12, %s2955_s30 }
 0x1a3   : > { %v793_v23 = vpop.permute.xlu1 %792 }
 0x1a4   : > { %v795_v17 = vpop.permute.xlu0 %794  ;;  %860 = vst.msk [vmem:[%s3026_s24 + $0x44] sm:$0x1] %vm375_vm0, %v793_v23  ;;  %v1107_v23 = vrot.slane %v1091_v14, %v3011_v19 }
 0x1a5   : > { %861 = vst.msk [vmem:[%s3026_s24 + $0x54] sm:$0x1] %vm375_vm0, %v795_v17  ;;  %1250 = vrot.lane.b32.xlu1 %v3920_v6, %s2955_s30  ;;  %v1121_v17 = vrot.slane %v1093_v36, %v3011_v19 }
 0x1a6   : > { %1252 = vrot.lane.b32.xlu0 %v3923_v28, %s2955_s30  ;;  %v1123_v56 = vcombine.high %v1107_v23, %v1107_v23 }
 0x1a7   : > { %v797_v20 = vpop.permute.xlu1 %796  ;;  %v3968_v14 = vrot.slane %v1121_v17, %v3076_v3  ;;  %v1125_v35 = vcombine.high %v1121_v17, %v1121_v17 }
 0x1a8   : > { %v799_v53 = vpop.permute.xlu0 %798  ;;  %862 = vst.msk [vmem:[%s3026_s24 + $0x64] sm:$0x1] %vm375_vm0, %v797_v20  ;;  %v3965_v20 = vrot.slane %v1107_v23, %v3076_v3 }
 0x1a9   : > { %863 = vst.msk [vmem:[%s3026_s24 + $0x74] sm:$0x1] %vm375_vm0, %v799_v53  ;;  %1254 = vrot.lane.b32.xlu1 %v3935_v29, %s2955_s30  ;;  %v3982_v23 = vrot.slane %v1125_v35, %v3076_v3 }
 0x1aa   : > { %1256 = vrot.lane.b32.xlu0 %v3938_v37, %s2955_s30 }
 0x1ab   : > { %v801_v60 = vpop.permute.xlu1 %800 }
 0x1ac   : > { %v803_v31 = vpop.permute.xlu0 %802  ;;  %864 = vst.msk [vmem:[%s3026_s24 + $0x84] sm:$0x1] %vm375_vm0, %v801_v60  ;;  %v3979_v60 = vrot.slane %v1123_v56, %v3076_v3 }
 0x1ad   : > { %865 = vst.msk [vmem:[%s3026_s24 + $0x94] sm:$0x1] %vm375_vm0, %v803_v31  ;;  %1258 = vrot.lane.b32.xlu1 %v3949_v25, %s2955_s30 }
 0x1ae   : > { %1260 = vrot.lane.b32.xlu0 %v3952_v44, %s2955_s30 }
 0x1af   : > { %v805_v7 = vpop.permute.xlu1 %804 }
 0x1b0   : > { %v807_v53 = vpop.permute.xlu0 %806  ;;  %866 = vst.msk [vmem:[%s3026_s24 + $0xa4] sm:$0x1] %vm375_vm0, %v805_v7 }
 0x1b1   : > { %867 = vst.msk [vmem:[%s3026_s24 + $0xb4] sm:$0x1] %vm375_vm0, %v807_v53  ;;  %1262 = vrot.lane.b32.xlu1 %v3965_v20, %s2955_s30 }
 0x1b2   : > { %1264 = vrot.lane.b32.xlu0 %v3968_v14, %s2955_s30 }
 0x1b3   : > { %v809_v36 = vpop.permute.xlu1 %808 }
 0x1b4   : > { %v811_v31 = vpop.permute.xlu0 %810  ;;  %868 = vst.msk [vmem:[%s3026_s24 + $0xc4] sm:$0x1] %vm375_vm0, %v809_v36 }
 0x1b5   : > { %869 = vst.msk [vmem:[%s3026_s24 + $0xd4] sm:$0x1] %vm375_vm0, %v811_v31  ;;  %1266 = vrot.lane.b32.xlu1 %v3979_v60, %s2955_s30 }
 0x1b6   : > { %1268 = vrot.lane.b32.xlu0 %v3982_v23, %s2955_s30 }
 0x1b7   : > { %v813_v17 = vpop.permute.xlu1 %812 }
 0x1b8   : > { %v815_v7 = vpop.permute.xlu0 %814  ;;  %870 = vst.msk [vmem:[%s3026_s24 + $0xe4] sm:$0x1] %vm375_vm0, %v813_v17 }
 0x1b9   : > { %871 = vst.msk [vmem:[%s3026_s24 + $0xf4] sm:$0x1] %vm375_vm0, %v815_v7  ;;  %1318 = vrot.lane.b32.xlu1 %v3805_v22, %s2956_s3 }
 0x1ba   : > { %1320 = vrot.lane.b32.xlu0 %v3808_v15, %s2956_s3 }
 0x1bb   : > { %v817_v53 = vpop.permute.xlu1 %816 }
 0x1bc   : > { %v819_v56 = vpop.permute.xlu0 %818  ;;  %872 = vst.msk [vmem:[%s3026_s24 + $0x104] sm:$0x1] %vm375_vm0, %v817_v53 }
 0x1bd   : > { %873 = vst.msk [vmem:[%s3026_s24 + $0x114] sm:$0x1] %vm375_vm0, %v819_v56  ;;  %1322 = vrot.lane.b32.xlu1 %v3821_v2, %s2956_s3 }
 0x1be   : > { %1324 = vrot.lane.b32.xlu0 %v3824_v18, %s2956_s3 }
 0x1bf   : > { %v821_v35 = vpop.permute.xlu1 %820 }
 0x1c0   : > { %v823_v36 = vpop.permute.xlu0 %822  ;;  %874 = vst.msk [vmem:[%s3026_s24 + $0x124] sm:$0x1] %vm375_vm0, %v821_v35 }
 0x1c1   : > { %875 = vst.msk [vmem:[%s3026_s24 + $0x134] sm:$0x1] %vm375_vm0, %v823_v36  ;;  %1326 = vrot.lane.b32.xlu1 %v3839_v48, %s2956_s3 }
 0x1c2   : > { %1328 = vrot.lane.b32.xlu0 %v3842_v27, %s2956_s3 }
 0x1c3   : > { %v825_v31 = vpop.permute.xlu1 %824 }
 0x1c4   : > { %v827_v17 = vpop.permute.xlu0 %826  ;;  %876 = vst.msk [vmem:[%s3026_s24 + $0x144] sm:$0x1] %vm375_vm0, %v825_v31 }
 0x1c5   : > { %877 = vst.msk [vmem:[%s3026_s24 + $0x154] sm:$0x1] %vm375_vm0, %v827_v17  ;;  %1330 = vrot.lane.b32.xlu1 %v3854_v30, %s2956_s3 }
 0x1c6   : > { %1332 = vrot.lane.b32.xlu0 %v3857_v16, %s2956_s3 }
 0x1c7   : > { %v829_v7 = vpop.permute.xlu1 %828 }
 0x1c8   : > { %v831_v53 = vpop.permute.xlu0 %830  ;;  %878 = vst.msk [vmem:[%s3026_s24 + $0x164] sm:$0x1] %vm375_vm0, %v829_v7 }
 0x1c9   : > { %879 = vst.msk [vmem:[%s3026_s24 + $0x174] sm:$0x1] %vm375_vm0, %v831_v53  ;;  %1334 = vrot.lane.b32.xlu1 %v3870_v32, %s2956_s3 }
 0x1ca   : > { %1336 = vrot.lane.b32.xlu0 %v3873_v38, %s2956_s3 }
 0x1cb   : > { %v881_v56 = vpop.permute.xlu1 %880 }
 0x1cc   : > { %v883_v35 = vpop.permute.xlu0 %882  ;;  %952 = vst.msk [vmem:[%s3026_s24 + $0x5] sm:$0x1] %vm375_vm0, %v881_v56 }
 0x1cd   : > { %953 = vst.msk [vmem:[%s3026_s24 + $0x15] sm:$0x1] %vm375_vm0, %v883_v35  ;;  %1338 = vrot.lane.b32.xlu1 %v3886_v1, %s2956_s3 }
 0x1ce   : > { %1340 = vrot.lane.b32.xlu0 %v3889_v10, %s2956_s3 }
 0x1cf   : > { %v885_v36 = vpop.permute.xlu1 %884 }
 0x1d0   : > { %v887_v31 = vpop.permute.xlu0 %886  ;;  %954 = vst.msk [vmem:[%s3026_s24 + $0x25] sm:$0x1] %vm375_vm0, %v885_v36 }
 0x1d1   : > { %955 = vst.msk [vmem:[%s3026_s24 + $0x35] sm:$0x1] %vm375_vm0, %v887_v31  ;;  %1342 = vrot.lane.b32.xlu1 %v3904_v24, %s2956_s3 }
 0x1d2   : > { %1344 = vrot.lane.b32.xlu0 %v3907_v12, %s2956_s3 }
 0x1d3   : > { %v889_v17 = vpop.permute.xlu1 %888 }
 0x1d4   : > { %v891_v7 = vpop.permute.xlu0 %890  ;;  %956 = vst.msk [vmem:[%s3026_s24 + $0x45] sm:$0x1] %vm375_vm0, %v889_v17 }
 0x1d5   : > { %957 = vst.msk [vmem:[%s3026_s24 + $0x55] sm:$0x1] %vm375_vm0, %v891_v7  ;;  %1346 = vrot.lane.b32.xlu1 %v3920_v6, %s2956_s3 }
 0x1d6   : > { %1348 = vrot.lane.b32.xlu0 %v3923_v28, %s2956_s3 }
 0x1d7   : > { %v893_v53 = vpop.permute.xlu1 %892 }
 0x1d8   : > { %v895_v56 = vpop.permute.xlu0 %894  ;;  %958 = vst.msk [vmem:[%s3026_s24 + $0x65] sm:$0x1] %vm375_vm0, %v893_v53 }
 0x1d9   : > { %959 = vst.msk [vmem:[%s3026_s24 + $0x75] sm:$0x1] %vm375_vm0, %v895_v56  ;;  %1350 = vrot.lane.b32.xlu1 %v3935_v29, %s2956_s3 }
 0x1da   : > { %1352 = vrot.lane.b32.xlu0 %v3938_v37, %s2956_s3 }
 0x1db   : > { %v897_v35 = vpop.permute.xlu1 %896 }
 0x1dc   : > { %v899_v36 = vpop.permute.xlu0 %898  ;;  %960 = vst.msk [vmem:[%s3026_s24 + $0x85] sm:$0x1] %vm375_vm0, %v897_v35 }
 0x1dd   : > { %961 = vst.msk [vmem:[%s3026_s24 + $0x95] sm:$0x1] %vm375_vm0, %v899_v36  ;;  %1354 = vrot.lane.b32.xlu1 %v3949_v25, %s2956_s3 }
 0x1de   : > { %1356 = vrot.lane.b32.xlu0 %v3952_v44, %s2956_s3 }
 0x1df   : > { %v901_v31 = vpop.permute.xlu1 %900 }
 0x1e0   : > { %v903_v17 = vpop.permute.xlu0 %902  ;;  %962 = vst.msk [vmem:[%s3026_s24 + $0xa5] sm:$0x1] %vm375_vm0, %v901_v31 }
 0x1e1   : > { %963 = vst.msk [vmem:[%s3026_s24 + $0xb5] sm:$0x1] %vm375_vm0, %v903_v17  ;;  %1358 = vrot.lane.b32.xlu1 %v3965_v20, %s2956_s3 }
 0x1e2   : > { %1360 = vrot.lane.b32.xlu0 %v3968_v14, %s2956_s3 }
 0x1e3   : > { %v905_v7 = vpop.permute.xlu1 %904 }
 0x1e4   : > { %v907_v53 = vpop.permute.xlu0 %906  ;;  %964 = vst.msk [vmem:[%s3026_s24 + $0xc5] sm:$0x1] %vm375_vm0, %v905_v7 }
 0x1e5   : > { %965 = vst.msk [vmem:[%s3026_s24 + $0xd5] sm:$0x1] %vm375_vm0, %v907_v53  ;;  %1362 = vrot.lane.b32.xlu1 %v3979_v60, %s2956_s3 }
 0x1e6   : > { %1364 = vrot.lane.b32.xlu0 %v3982_v23, %s2956_s3 }
 0x1e7   : > { %v909_v56 = vpop.permute.xlu1 %908 }
 0x1e8   : > { %v911_v35 = vpop.permute.xlu0 %910  ;;  %966 = vst.msk [vmem:[%s3026_s24 + $0xe5] sm:$0x1] %vm375_vm0, %v909_v56 }
 0x1e9   : > { %967 = vst.msk [vmem:[%s3026_s24 + $0xf5] sm:$0x1] %vm375_vm0, %v911_v35  ;;  %1414 = vrot.lane.b32.xlu1 %v3805_v22, %s2957_s4 }
 0x1ea   : > { %1416 = vrot.lane.b32.xlu0 %v3808_v15, %s2957_s4 }
 0x1eb   : > { %v913_v36 = vpop.permute.xlu1 %912 }
 0x1ec   : > { %v915_v31 = vpop.permute.xlu0 %914  ;;  %968 = vst.msk [vmem:[%s3026_s24 + $0x105] sm:$0x1] %vm375_vm0, %v913_v36 }
 0x1ed   : > { %969 = vst.msk [vmem:[%s3026_s24 + $0x115] sm:$0x1] %vm375_vm0, %v915_v31  ;;  %1418 = vrot.lane.b32.xlu1 %v3821_v2, %s2957_s4 }
 0x1ee   : > { %1420 = vrot.lane.b32.xlu0 %v3824_v18, %s2957_s4 }
 0x1ef   : > { %v917_v17 = vpop.permute.xlu1 %916 }
 0x1f0   : > { %v919_v7 = vpop.permute.xlu0 %918  ;;  %970 = vst.msk [vmem:[%s3026_s24 + $0x125] sm:$0x1] %vm375_vm0, %v917_v17 }
 0x1f1   : > { %971 = vst.msk [vmem:[%s3026_s24 + $0x135] sm:$0x1] %vm375_vm0, %v919_v7  ;;  %1422 = vrot.lane.b32.xlu1 %v3839_v48, %s2957_s4 }
 0x1f2   : > { %1424 = vrot.lane.b32.xlu0 %v3842_v27, %s2957_s4 }
 0x1f3   : > { %v921_v53 = vpop.permute.xlu1 %920 }
 0x1f4   : > { %v923_v56 = vpop.permute.xlu0 %922  ;;  %972 = vst.msk [vmem:[%s3026_s24 + $0x145] sm:$0x1] %vm375_vm0, %v921_v53 }
 0x1f5   : > { %973 = vst.msk [vmem:[%s3026_s24 + $0x155] sm:$0x1] %vm375_vm0, %v923_v56  ;;  %1426 = vrot.lane.b32.xlu1 %v3854_v30, %s2957_s4 }
 0x1f6   : > { %1428 = vrot.lane.b32.xlu0 %v3857_v16, %s2957_s4 }
 0x1f7   : > { %v925_v35 = vpop.permute.xlu1 %924 }
 0x1f8   : > { %v927_v36 = vpop.permute.xlu0 %926  ;;  %974 = vst.msk [vmem:[%s3026_s24 + $0x165] sm:$0x1] %vm375_vm0, %v925_v35 }
 0x1f9   : > { %975 = vst.msk [vmem:[%s3026_s24 + $0x175] sm:$0x1] %vm375_vm0, %v927_v36  ;;  %1430 = vrot.lane.b32.xlu1 %v3870_v32, %s2957_s4 }
 0x1fa   : > { %1432 = vrot.lane.b32.xlu0 %v3873_v38, %s2957_s4 }
 0x1fb   : > { %v1223_v31 = vpop.permute.xlu1 %1222 }
 0x1fc   : > { %v1225_v17 = vpop.permute.xlu0 %1224  ;;  %1294 = vst.msk [vmem:[%s3026_s24 + $0x6] sm:$0x1] %vm375_vm0, %v1223_v31 }
 0x1fd   : > { %1295 = vst.msk [vmem:[%s3026_s24 + $0x16] sm:$0x1] %vm375_vm0, %v1225_v17  ;;  %1434 = vrot.lane.b32.xlu1 %v3886_v1, %s2957_s4 }
 0x1fe   : > { %1436 = vrot.lane.b32.xlu0 %v3889_v10, %s2957_s4 }
 0x1ff   : > { %v1227_v7 = vpop.permute.xlu1 %1226 }
 0x200   : > { %v1229_v53 = vpop.permute.xlu0 %1228  ;;  %1296 = vst.msk [vmem:[%s3026_s24 + $0x26] sm:$0x1] %vm375_vm0, %v1227_v7 }
 0x201   : > { %1297 = vst.msk [vmem:[%s3026_s24 + $0x36] sm:$0x1] %vm375_vm0, %v1229_v53  ;;  %1438 = vrot.lane.b32.xlu1 %v3904_v24, %s2957_s4 }
 0x202   : > { %1440 = vrot.lane.b32.xlu0 %v3907_v12, %s2957_s4 }
 0x203   : > { %v1231_v56 = vpop.permute.xlu1 %1230 }
 0x204   : > { %v1233_v35 = vpop.permute.xlu0 %1232  ;;  %1298 = vst.msk [vmem:[%s3026_s24 + $0x46] sm:$0x1] %vm375_vm0, %v1231_v56 }
 0x205   : > { %1299 = vst.msk [vmem:[%s3026_s24 + $0x56] sm:$0x1] %vm375_vm0, %v1233_v35  ;;  %1442 = vrot.lane.b32.xlu1 %v3920_v6, %s2957_s4 }
 0x206   : > { %1444 = vrot.lane.b32.xlu0 %v3923_v28, %s2957_s4 }
 0x207   : > { %v1235_v36 = vpop.permute.xlu1 %1234 }
 0x208   : > { %v1237_v31 = vpop.permute.xlu0 %1236  ;;  %1300 = vst.msk [vmem:[%s3026_s24 + $0x66] sm:$0x1] %vm375_vm0, %v1235_v36 }
 0x209   : > { %1301 = vst.msk [vmem:[%s3026_s24 + $0x76] sm:$0x1] %vm375_vm0, %v1237_v31  ;;  %1446 = vrot.lane.b32.xlu1 %v3935_v29, %s2957_s4 }
 0x20a   : > { %1448 = vrot.lane.b32.xlu0 %v3938_v37, %s2957_s4 }
 0x20b   : > { %v1239_v17 = vpop.permute.xlu1 %1238 }
 0x20c   : > { %v1241_v7 = vpop.permute.xlu0 %1240  ;;  %1302 = vst.msk [vmem:[%s3026_s24 + $0x86] sm:$0x1] %vm375_vm0, %v1239_v17 }
 0x20d   : > { %1303 = vst.msk [vmem:[%s3026_s24 + $0x96] sm:$0x1] %vm375_vm0, %v1241_v7  ;;  %1450 = vrot.lane.b32.xlu1 %v3949_v25, %s2957_s4 }
 0x20e   : > { %1452 = vrot.lane.b32.xlu0 %v3952_v44, %s2957_s4 }
 0x20f   : > { %v1243_v53 = vpop.permute.xlu1 %1242 }
 0x210   : > { %v1245_v56 = vpop.permute.xlu0 %1244  ;;  %1304 = vst.msk [vmem:[%s3026_s24 + $0xa6] sm:$0x1] %vm375_vm0, %v1243_v53 }
 0x211   : > { %1305 = vst.msk [vmem:[%s3026_s24 + $0xb6] sm:$0x1] %vm375_vm0, %v1245_v56  ;;  %1454 = vrot.lane.b32.xlu1 %v3965_v20, %s2957_s4 }
 0x212   : > { %1456 = vrot.lane.b32.xlu0 %v3968_v14, %s2957_s4 }
 0x213   : > { %v1247_v35 = vpop.permute.xlu1 %1246 }
 0x214   : > { %v1249_v36 = vpop.permute.xlu0 %1248  ;;  %1306 = vst.msk [vmem:[%s3026_s24 + $0xc6] sm:$0x1] %vm375_vm0, %v1247_v35 }
 0x215   : > { %1307 = vst.msk [vmem:[%s3026_s24 + $0xd6] sm:$0x1] %vm375_vm0, %v1249_v36  ;;  %1458 = vrot.lane.b32.xlu1 %v3979_v60, %s2957_s4 }
 0x216   : > { %1460 = vrot.lane.b32.xlu0 %v3982_v23, %s2957_s4 }
 0x217   : > { %v1251_v31 = vpop.permute.xlu1 %1250 }
 0x218   : > { %v1253_v17 = vpop.permute.xlu0 %1252  ;;  %1308 = vst.msk [vmem:[%s3026_s24 + $0xe6] sm:$0x1] %vm375_vm0, %v1251_v31 }
 0x219   : > { %1309 = vst.msk [vmem:[%s3026_s24 + $0xf6] sm:$0x1] %vm375_vm0, %v1253_v17  ;;  %1510 = vrot.lane.b32.xlu1 %v3805_v22, %s2958_s5 }
 0x21a   : > { %1512 = vrot.lane.b32.xlu0 %v3808_v15, %s2958_s5 }
 0x21b   : > { %v1255_v7 = vpop.permute.xlu1 %1254 }
 0x21c   : > { %v1257_v53 = vpop.permute.xlu0 %1256  ;;  %1310 = vst.msk [vmem:[%s3026_s24 + $0x106] sm:$0x1] %vm375_vm0, %v1255_v7 }
 0x21d   : > { %1311 = vst.msk [vmem:[%s3026_s24 + $0x116] sm:$0x1] %vm375_vm0, %v1257_v53  ;;  %1514 = vrot.lane.b32.xlu1 %v3821_v2, %s2958_s5 }
 0x21e   : > { %1516 = vrot.lane.b32.xlu0 %v3824_v18, %s2958_s5 }
 0x21f   : > { %v1259_v56 = vpop.permute.xlu1 %1258 }
 0x220   : > { %v1261_v35 = vpop.permute.xlu0 %1260  ;;  %1312 = vst.msk [vmem:[%s3026_s24 + $0x126] sm:$0x1] %vm375_vm0, %v1259_v56 }
 0x221   : > { %1313 = vst.msk [vmem:[%s3026_s24 + $0x136] sm:$0x1] %vm375_vm0, %v1261_v35  ;;  %1518 = vrot.lane.b32.xlu1 %v3839_v48, %s2958_s5 }
 0x222   : > { %1520 = vrot.lane.b32.xlu0 %v3842_v27, %s2958_s5 }
 0x223   : > { %v1263_v36 = vpop.permute.xlu1 %1262 }
 0x224   : > { %v1265_v31 = vpop.permute.xlu0 %1264  ;;  %1314 = vst.msk [vmem:[%s3026_s24 + $0x146] sm:$0x1] %vm375_vm0, %v1263_v36 }
 0x225   : > { %1315 = vst.msk [vmem:[%s3026_s24 + $0x156] sm:$0x1] %vm375_vm0, %v1265_v31  ;;  %1522 = vrot.lane.b32.xlu1 %v3854_v30, %s2958_s5 }
 0x226   : > { %1524 = vrot.lane.b32.xlu0 %v3857_v16, %s2958_s5 }
 0x227   : > { %v1267_v17 = vpop.permute.xlu1 %1266 }
 0x228   : > { %v1269_v7 = vpop.permute.xlu0 %1268  ;;  %1316 = vst.msk [vmem:[%s3026_s24 + $0x166] sm:$0x1] %vm375_vm0, %v1267_v17 }
 0x229   : > { %1317 = vst.msk [vmem:[%s3026_s24 + $0x176] sm:$0x1] %vm375_vm0, %v1269_v7  ;;  %1526 = vrot.lane.b32.xlu1 %v3870_v32, %s2958_s5 }
 0x22a   : > { %1528 = vrot.lane.b32.xlu0 %v3873_v38, %s2958_s5 }
 0x22b   : > { %v1319_v53 = vpop.permute.xlu1 %1318 }
 0x22c   : > { %v1321_v56 = vpop.permute.xlu0 %1320  ;;  %1390 = vst.msk [vmem:[%s3026_s24 + $0x7] sm:$0x1] %vm375_vm0, %v1319_v53 }
 0x22d   : > { %1391 = vst.msk [vmem:[%s3026_s24 + $0x17] sm:$0x1] %vm375_vm0, %v1321_v56  ;;  %1530 = vrot.lane.b32.xlu1 %v3886_v1, %s2958_s5 }
 0x22e   : > { %1532 = vrot.lane.b32.xlu0 %v3889_v10, %s2958_s5 }
 0x22f   : > { %v1323_v35 = vpop.permute.xlu1 %1322 }
 0x230   : > { %v1325_v36 = vpop.permute.xlu0 %1324  ;;  %1392 = vst.msk [vmem:[%s3026_s24 + $0x27] sm:$0x1] %vm375_vm0, %v1323_v35 }
 0x231   : > { %1393 = vst.msk [vmem:[%s3026_s24 + $0x37] sm:$0x1] %vm375_vm0, %v1325_v36  ;;  %1534 = vrot.lane.b32.xlu1 %v3904_v24, %s2958_s5 }
 0x232   : > { %1536 = vrot.lane.b32.xlu0 %v3907_v12, %s2958_s5 }
 0x233   : > { %v1327_v31 = vpop.permute.xlu1 %1326 }
 0x234   : > { %v1329_v17 = vpop.permute.xlu0 %1328  ;;  %1394 = vst.msk [vmem:[%s3026_s24 + $0x47] sm:$0x1] %vm375_vm0, %v1327_v31 }
 0x235   : > { %1395 = vst.msk [vmem:[%s3026_s24 + $0x57] sm:$0x1] %vm375_vm0, %v1329_v17  ;;  %1538 = vrot.lane.b32.xlu1 %v3920_v6, %s2958_s5 }
 0x236   : > { %1540 = vrot.lane.b32.xlu0 %v3923_v28, %s2958_s5 }
 0x237   : > { %v1331_v7 = vpop.permute.xlu1 %1330 }
 0x238   : > { %v1333_v53 = vpop.permute.xlu0 %1332  ;;  %1396 = vst.msk [vmem:[%s3026_s24 + $0x67] sm:$0x1] %vm375_vm0, %v1331_v7 }
 0x239   : > { %1397 = vst.msk [vmem:[%s3026_s24 + $0x77] sm:$0x1] %vm375_vm0, %v1333_v53  ;;  %1542 = vrot.lane.b32.xlu1 %v3935_v29, %s2958_s5 }
 0x23a   : > { %1544 = vrot.lane.b32.xlu0 %v3938_v37, %s2958_s5 }
 0x23b   : > { %v1335_v56 = vpop.permute.xlu1 %1334 }
 0x23c   : > { %v1337_v35 = vpop.permute.xlu0 %1336  ;;  %1398 = vst.msk [vmem:[%s3026_s24 + $0x87] sm:$0x1] %vm375_vm0, %v1335_v56 }
 0x23d   : > { %1399 = vst.msk [vmem:[%s3026_s24 + $0x97] sm:$0x1] %vm375_vm0, %v1337_v35  ;;  %1546 = vrot.lane.b32.xlu1 %v3949_v25, %s2958_s5 }
 0x23e   : > { %1548 = vrot.lane.b32.xlu0 %v3952_v44, %s2958_s5 }
 0x23f   : > { %v1339_v36 = vpop.permute.xlu1 %1338 }
 0x240   : > { %v1341_v31 = vpop.permute.xlu0 %1340  ;;  %1400 = vst.msk [vmem:[%s3026_s24 + $0xa7] sm:$0x1] %vm375_vm0, %v1339_v36 }
 0x241   : > { %1401 = vst.msk [vmem:[%s3026_s24 + $0xb7] sm:$0x1] %vm375_vm0, %v1341_v31  ;;  %1550 = vrot.lane.b32.xlu1 %v3965_v20, %s2958_s5 }
 0x242   : > { %1552 = vrot.lane.b32.xlu0 %v3968_v14, %s2958_s5 }
 0x243   : > { %v1343_v17 = vpop.permute.xlu1 %1342 }
 0x244   : > { %v1345_v7 = vpop.permute.xlu0 %1344  ;;  %1402 = vst.msk [vmem:[%s3026_s24 + $0xc7] sm:$0x1] %vm375_vm0, %v1343_v17 }
 0x245   : > { %1403 = vst.msk [vmem:[%s3026_s24 + $0xd7] sm:$0x1] %vm375_vm0, %v1345_v7  ;;  %1554 = vrot.lane.b32.xlu1 %v3979_v60, %s2958_s5 }
 0x246   : > { %1556 = vrot.lane.b32.xlu0 %v3982_v23, %s2958_s5 }
 0x247   : > { %v1347_v53 = vpop.permute.xlu1 %1346 }
 0x248   : > { %v1349_v56 = vpop.permute.xlu0 %1348  ;;  %1404 = vst.msk [vmem:[%s3026_s24 + $0xe7] sm:$0x1] %vm375_vm0, %v1347_v53 }
 0x249   : > { %1405 = vst.msk [vmem:[%s3026_s24 + $0xf7] sm:$0x1] %vm375_vm0, %v1349_v56  ;;  %1606 = vrot.lane.b32.xlu1 %v3805_v22, %s2959_s6  ;;  %v5221_v56 = vrot.slane %v3267_v52, %v3231_v40 }
 0x24a   : > { %1608 = vrot.lane.b32.xlu0 %v3808_v15, %s2959_s6 }
 0x24b   : > { %v1351_v35 = vpop.permute.xlu1 %1350 }
 0x24c   : > { %v1353_v36 = vpop.permute.xlu0 %1352  ;;  %1406 = vst.msk [vmem:[%s3026_s24 + $0x107] sm:$0x1] %vm375_vm0, %v1351_v35 }
 0x24d   : > { %1407 = vst.msk [vmem:[%s3026_s24 + $0x117] sm:$0x1] %vm375_vm0, %v1353_v36  ;;  %1610 = vrot.lane.b32.xlu1 %v3821_v2, %s2959_s6  ;;  %v5222_v36 = vrot.slane %v3241_v33, %v3231_v40 }
 0x24e   : > { %1612 = vrot.lane.b32.xlu0 %v3824_v18, %s2959_s6 }
 0x24f   : > { %v1355_v22 = vpop.permute.xlu1 %1354 }
 0x250   : > { %v1357_v31 = vpop.permute.xlu0 %1356  ;;  %1408 = vst.msk [vmem:[%s3026_s24 + $0x127] sm:$0x1] %vm375_vm0, %v1355_v22  ;;  %v1898_v22 = vrot.slane %v3259_v49, %v3076_v3 }
 0x251   : > { %1409 = vst.msk [vmem:[%s3026_s24 + $0x137] sm:$0x1] %vm375_vm0, %v1357_v31  ;;  %1614 = vrot.lane.b32.xlu1 %v3839_v48, %s2959_s6 }
 0x252   : > { %1616 = vrot.lane.b32.xlu0 %v3842_v27, %s2959_s6 }
 0x253   : > { %v1359_v15 = vpop.permute.xlu1 %1358 }
 0x254   : > { %v1361_v2 = vpop.permute.xlu0 %1360  ;;  %1410 = vst.msk [vmem:[%s3026_s24 + $0x147] sm:$0x1] %vm375_vm0, %v1359_v15  ;;  %v5223_v15 = vrot.slane %v3259_v49, %v3231_v40 }
 0x255   : > { %1411 = vst.msk [vmem:[%s3026_s24 + $0x157] sm:$0x1] %vm375_vm0, %v1361_v2  ;;  %1618 = vrot.lane.b32.xlu1 %v3854_v30, %s2959_s6  ;;  %v1906_v2 = vrot.slane %v3273_v57, %v3076_v3 }
 0x256   : > { %1620 = vrot.lane.b32.xlu0 %v3857_v16, %s2959_s6 }
 0x257   : > { %v1363_v18 = vpop.permute.xlu1 %1362 }
 0x258   : > { %v1365_v48 = vpop.permute.xlu0 %1364  ;;  %1412 = vst.msk [vmem:[%s3026_s24 + $0x167] sm:$0x1] %vm375_vm0, %v1363_v18 }
 0x259   : > { %1413 = vst.msk [vmem:[%s3026_s24 + $0x177] sm:$0x1] %vm375_vm0, %v1365_v48  ;;  %1622 = vrot.lane.b32.xlu1 %v3870_v32, %s2959_s6  ;;  %v5224_v48 = vrot.slane %v3273_v57, %v3231_v40 }
 0x25a   : > { %1624 = vrot.lane.b32.xlu0 %v3873_v38, %s2959_s6 }
 0x25b   : > { %v1415_v27 = vpop.permute.xlu1 %1414 }
 0x25c   : > { %v1417_v30 = vpop.permute.xlu0 %1416  ;;  %1486 = vst.msk [vmem:[%s3026_s24 + $0x8] sm:$0x1] %vm375_vm0, %v1415_v27  ;;  %v1914_v27 = vrot.slane %v3277_v58, %v3076_v3 }
 0x25d   : > { %1487 = vst.msk [vmem:[%s3026_s24 + $0x18] sm:$0x1] %vm375_vm0, %v1417_v30  ;;  %1626 = vrot.lane.b32.xlu1 %v3886_v1, %s2959_s6 }
 0x25e   : > { %1628 = vrot.lane.b32.xlu0 %v3889_v10, %s2959_s6 }
 0x25f   : > { %v1419_v16 = vpop.permute.xlu1 %1418 }
 0x260   : > { %v1421_v32 = vpop.permute.xlu0 %1420  ;;  %1488 = vst.msk [vmem:[%s3026_s24 + $0x28] sm:$0x1] %vm375_vm0, %v1419_v16  ;;  %v5225_v16 = vrot.slane %v3277_v58, %v3231_v40 }
 0x261   : > { %1489 = vst.msk [vmem:[%s3026_s24 + $0x38] sm:$0x1] %vm375_vm0, %v1421_v32  ;;  %1630 = vrot.lane.b32.xlu1 %v3904_v24, %s2959_s6  ;;  %v1922_v32 = vrot.slane %v3302_v5, %v3076_v3 }
 0x262   : > { %1632 = vrot.lane.b32.xlu0 %v3907_v12, %s2959_s6 }
 0x263   : > { %v1423_v38 = vpop.permute.xlu1 %1422 }
 0x264   : > { %v1425_v1 = vpop.permute.xlu0 %1424  ;;  %1490 = vst.msk [vmem:[%s3026_s24 + $0x48] sm:$0x1] %vm375_vm0, %v1423_v38 }
 0x265   : > { %1491 = vst.msk [vmem:[%s3026_s24 + $0x58] sm:$0x1] %vm375_vm0, %v1425_v1  ;;  %1634 = vrot.lane.b32.xlu1 %v3920_v6, %s2959_s6  ;;  %v5226_v1 = vrot.slane %v3302_v5, %v3231_v40 }
 0x266   : > { %1636 = vrot.lane.b32.xlu0 %v3923_v28, %s2959_s6 }
 0x267   : > { %v1427_v10 = vpop.permute.xlu1 %1426 }
 0x268   : > { %v1429_v24 = vpop.permute.xlu0 %1428  ;;  %1492 = vst.msk [vmem:[%s3026_s24 + $0x68] sm:$0x1] %vm375_vm0, %v1427_v10  ;;  %v1930_v10 = vrot.slane %v3318_v13, %v3076_v3 }
 0x269   : > { %1493 = vst.msk [vmem:[%s3026_s24 + $0x78] sm:$0x1] %vm375_vm0, %v1429_v24  ;;  %1638 = vrot.lane.b32.xlu1 %v3935_v29, %s2959_s6 }
 0x26a   : > { %1640 = vrot.lane.b32.xlu0 %v3938_v37, %s2959_s6 }
 0x26b   : > { %v1431_v12 = vpop.permute.xlu1 %1430 }
 0x26c   : > { %v1433_v6 = vpop.permute.xlu0 %1432  ;;  %1494 = vst.msk [vmem:[%s3026_s24 + $0x88] sm:$0x1] %vm375_vm0, %v1431_v12  ;;  %v5227_v12 = vrot.slane %v3318_v13, %v3231_v40 }
 0x26d   : > { %1495 = vst.msk [vmem:[%s3026_s24 + $0x98] sm:$0x1] %vm375_vm0, %v1433_v6  ;;  %1642 = vrot.lane.b32.xlu1 %v3949_v25, %s2959_s6  ;;  %v1938_v6 = vrot.slane %v3311_v55, %v3076_v3 }
 0x26e   : > { %1644 = vrot.lane.b32.xlu0 %v3952_v44, %s2959_s6  ;;  %v1858_v44 = vrot.slane %v3238_v41, %v3076_v3 }
 0x26f   : > { %v1435_v28 = vpop.permute.xlu1 %1434 }
 0x270   : > { %v1437_v29 = vpop.permute.xlu0 %1436  ;;  %1496 = vst.msk [vmem:[%s3026_s24 + $0xa8] sm:$0x1] %vm375_vm0, %v1435_v28 }
 0x271   : > { %1497 = vst.msk [vmem:[%s3026_s24 + $0xb8] sm:$0x1] %vm375_vm0, %v1437_v29  ;;  %1646 = vrot.lane.b32.xlu1 %v3965_v20, %s2959_s6  ;;  %v5228_v29 = vrot.slane %v3311_v55, %v3231_v40 }
 0x272   : > { %1648 = vrot.lane.b32.xlu0 %v3968_v14, %s2959_s6 }
 0x273   : > { %v1439_v37 = vpop.permute.xlu1 %1438 }
 0x274   : > { %v1441_v17 = vpop.permute.xlu0 %1440  ;;  %1498 = vst.msk [vmem:[%s3026_s24 + $0xc8] sm:$0x1] %vm375_vm0, %v1439_v37  ;;  %v1946_v37 = vrot.slane %v3346_v9, %v3076_v3 }
 0x275   : > { %1499 = vst.msk [vmem:[%s3026_s24 + $0xd8] sm:$0x1] %vm375_vm0, %v1441_v17  ;;  %1650 = vrot.lane.b32.xlu1 %v3979_v60, %s2959_s6  ;;  %v1866_v60 = vrot.slane %v3246_v11, %v3076_v3 }
 0x276   : > { %1652 = vrot.lane.b32.xlu0 %v3982_v23, %s2959_s6 }
 0x277   : > { %v1443_v25 = vpop.permute.xlu1 %1442 }
 0x278   : > { %v1445_v20 = vpop.permute.xlu0 %1444  ;;  %1500 = vst.msk [vmem:[%s3026_s24 + $0xe8] sm:$0x1] %vm375_vm0, %v1443_v25  ;;  %v5229_v25 = vrot.slane %v3346_v9, %v3231_v40 }
 0x279   : > { %1501 = vst.msk [vmem:[%s3026_s24 + $0xf8] sm:$0x1] %vm375_vm0, %v1445_v20  ;;  %2047 = vrot.lane.b32.xlu1 %v1858_v44, %s2960_s7  ;;  %v1954_v44 = vrot.slane %v3305_v8, %v3076_v3 }
 0x27a   : > { %2049 = vrot.lane.b32.xlu0 %v1862_v34, %s2960_s7  ;;  %v1874_v34 = vrot.slane %v3250_v46, %v3076_v3 }
 0x27b   : > { %v1447_v14 = vpop.permute.xlu1 %1446 }
 0x27c   : > { %v1449_v23 = vpop.permute.xlu0 %1448  ;;  %1502 = vst.msk [vmem:[%s3026_s24 + $0x108] sm:$0x1] %vm375_vm0, %v1447_v14  ;;  %v5230_v14 = vrot.slane %v3305_v8, %v3231_v40 }
 0x27d   : > { %1503 = vst.msk [vmem:[%s3026_s24 + $0x118] sm:$0x1] %vm375_vm0, %v1449_v23  ;;  %2051 = vrot.lane.b32.xlu1 %v1866_v60, %s2960_s7  ;;  %v1962_v60 = vrot.slane %v3328_v43, %v3076_v3 }
 0x27e   : > { %2053 = vrot.lane.b32.xlu0 %v1870_v50, %s2960_s7  ;;  %v1882_v50 = vrot.slane %v3267_v52, %v3076_v3 }
 0x27f   : > { %v1451_v41 = vpop.permute.xlu1 %1450 }
 0x280   : > { %v1453_v7 = vpop.permute.xlu0 %1452  ;;  %1504 = vst.msk [vmem:[%s3026_s24 + $0x128] sm:$0x1] %vm375_vm0, %v1451_v41  ;;  %v5231_v41 = vrot.slane %v3328_v43, %v3231_v40 }
 0x281   : > { %1505 = vst.msk [vmem:[%s3026_s24 + $0x138] sm:$0x1] %vm375_vm0, %v1453_v7  ;;  %2055 = vrot.lane.b32.xlu1 %v1874_v34, %s2960_s7  ;;  %v1970_v34 = vrot.slane %v3332_v59, %v3076_v3 }
 0x282   : > { %2057 = vrot.lane.b32.xlu0 %v1878_v51, %s2960_s7  ;;  %v1890_v51 = vrot.slane %v3241_v33, %v3076_v3 }
 0x283   : > { %v1455_v11 = vpop.permute.xlu1 %1454 }
 0x284   : > { %v1457_v53 = vpop.permute.xlu0 %1456  ;;  %1506 = vst.msk [vmem:[%s3026_s24 + $0x148] sm:$0x1] %vm375_vm0, %v1455_v11  ;;  %v5232_v11 = vrot.slane %v3332_v59, %v3231_v40 }
 0x285   : > { %1507 = vst.msk [vmem:[%s3026_s24 + $0x158] sm:$0x1] %vm375_vm0, %v1457_v53  ;;  %2059 = vrot.lane.b32.xlu1 %v1882_v50, %s2960_s7  ;;  %v1978_v50 = vrot.slane %v3360_v21, %v3076_v3 }
 0x286   : > { %2061 = vrot.lane.b32.xlu0 %v5221_v56, %s2960_s7  ;;  %v5233_v56 = vrot.slane %v3360_v21, %v3231_v40 }
 0x287   : > { %v1459_v46 = vpop.permute.xlu1 %1458 }
 0x288   : > { %v1461_v35 = vpop.permute.xlu0 %1460  ;;  %1508 = vst.msk [vmem:[%s3026_s24 + $0x168] sm:$0x1] %vm375_vm0, %v1459_v46  ;;  %v1986_v46 = vrot.slane %v3323_v39, %v3076_v3 }
 0x289   : > { %1509 = vst.msk [vmem:[%s3026_s24 + $0x178] sm:$0x1] %vm375_vm0, %v1461_v35  ;;  %2063 = vrot.lane.b32.xlu1 %v1890_v51, %s2960_s7  ;;  %v5234_v35 = vrot.slane %v3323_v39, %v3231_v40 }
 0x28a   : > { %2065 = vrot.lane.b32.xlu0 %v5222_v36, %s2960_s7  ;;  %v1994_v36 = vrot.slane %v3365_v42, %v3076_v3 }
 0x28b   : > { %v1511_v52 = vpop.permute.xlu1 %1510 }
 0x28c   : > { %v1513_v31 = vpop.permute.xlu0 %1512  ;;  %1582 = vst.msk [vmem:[%s3026_s24 + $0x9] sm:$0x1] %vm375_vm0, %v1511_v52 }
 0x28d   : > { %1583 = vst.msk [vmem:[%s3026_s24 + $0x19] sm:$0x1] %vm375_vm0, %v1513_v31  ;;  %2067 = vrot.lane.b32.xlu1 %v1898_v22, %s2960_s7  ;;  %v5235_v22 = vrot.slane %v3365_v42, %v3231_v40  ;;  %v2002_v31 = vrot.slane %v3369_v0, %v3076_v3 }
 0x28e   : > { %2069 = vrot.lane.b32.xlu0 %v5223_v15, %s2960_s7 }
 0x28f   : > { %v1515_v33 = vpop.permute.xlu1 %1514 }
 0x290   : > { %v1517_v18 = vpop.permute.xlu0 %1516  ;;  %1584 = vst.msk [vmem:[%s3026_s24 + $0x29] sm:$0x1] %vm375_vm0, %v1515_v33  ;;  %v5236_v33 = vrot.slane %v3369_v0, %v3231_v40 }
 0x291   : > { %1585 = vst.msk [vmem:[%s3026_s24 + $0x39] sm:$0x1] %vm375_vm0, %v1517_v18  ;;  %2071 = vrot.lane.b32.xlu1 %v1906_v2, %s2960_s7  ;;  %v2010_v2 = vrot.slane %v3395_v47, %v3076_v3 }
 0x292   : > { %2073 = vrot.lane.b32.xlu0 %v5224_v48, %s2960_s7  ;;  %v5237_v48 = vrot.slane %v3395_v47, %v3231_v40 }
 0x293   : > { %v1519_v49 = vpop.permute.xlu1 %1518 }
 0x294   : > { %v1521_v30 = vpop.permute.xlu0 %1520  ;;  %1586 = vst.msk [vmem:[%s3026_s24 + $0x49] sm:$0x1] %vm375_vm0, %v1519_v49  ;;  %v2018_v49 = vrot.slane %v3398_v54, %v3076_v3 }
 0x295   : > { %1587 = vst.msk [vmem:[%s3026_s24 + $0x59] sm:$0x1] %vm375_vm0, %v1521_v30  ;;  %2075 = vrot.lane.b32.xlu1 %v1914_v27, %s2960_s7  ;;  %v5238_v30 = vrot.slane %v3398_v54, %v3231_v40  ;;  %v5239_v54 = vrot.slane %v3413_v63, %v3231_v40 }
 0x296   : > { %2077 = vrot.lane.b32.xlu0 %v5225_v16, %s2960_s7  ;;  %v2026_v16 = vrot.slane %v3413_v63, %v3076_v3  ;;  %v5240_v63 = vrot.slane %v3417_v4, %v3231_v40 }
 0x297   : > { %v1523_v57 = vpop.permute.xlu1 %1522 }
 0x298   : > { %v1525_v38 = vpop.permute.xlu0 %1524  ;;  %1588 = vst.msk [vmem:[%s3026_s24 + $0x69] sm:$0x1] %vm375_vm0, %v1523_v57 }
 0x299   : > { %1589 = vst.msk [vmem:[%s3026_s24 + $0x79] sm:$0x1] %vm375_vm0, %v1525_v38  ;;  %2079 = vrot.lane.b32.xlu1 %v1922_v32, %s2960_s7  ;;  %v2223_v32 = vrot.slane %v3019_v26, %v3011_v19 }
 0x29a   : > { %2081 = vrot.lane.b32.xlu0 %v5226_v1, %s2960_s7  ;;  %v2034_v1 = vrot.slane %v3417_v4, %v3076_v3  ;;  %v5241_v4 = vrot.slane %v3437_v62, %v3231_v40 }
 0x29b   : > { %v1527_v58 = vpop.permute.xlu1 %1526 }
 0x29c   : > { %v1529_v24 = vpop.permute.xlu0 %1528  ;;  %1590 = vst.msk [vmem:[%s3026_s24 + $0x89] sm:$0x1] %vm375_vm0, %v1527_v58 }
 0x29d   : > { %1591 = vst.msk [vmem:[%s3026_s24 + $0x99] sm:$0x1] %vm375_vm0, %v1529_v24  ;;  %2083 = vrot.lane.b32.xlu1 %v1930_v10, %s2960_s7  ;;  %v2231_v10 = vcombine.high %v2223_v32, %v2223_v32  ;;  %v2216_v24 = vcombine.high %v3019_v26, %v3019_v26 }
 0x29e   : > { %2085 = vrot.lane.b32.xlu0 %v5227_v12, %s2960_s7  ;;  %v2239_v12 = vrot.slane %v2223_v32, %v3011_v19 }
 0x29f   : > { %v1531_v5 = vpop.permute.xlu1 %1530 }
 0x2a0   : > { %v1533_v28 = vpop.permute.xlu0 %1532  ;;  %1592 = vst.msk [vmem:[%s3026_s24 + $0xa9] sm:$0x1] %vm375_vm0, %v1531_v5 }
 0x2a1   : > { %1593 = vst.msk [vmem:[%s3026_s24 + $0xb9] sm:$0x1] %vm375_vm0, %v1533_v28  ;;  %2087 = vrot.lane.b32.xlu1 %v1938_v6, %s2960_s7  ;;  %v2042_v6 = vrot.slane %v3437_v62, %v3076_v3  ;;  %v2253_v28 = vrot.slane %v2231_v10, %v3011_v19 }
 0x2a2   : > { %2089 = vrot.lane.b32.xlu0 %v5228_v29, %s2960_s7  ;;  %v2230_v29 = vrot.slane %v2216_v24, %v3011_v19 }
 0x2a3   : > { %v1535_v13 = vpop.permute.xlu1 %1534 }
 0x2a4   : > { %v1537_v17 = vpop.permute.xlu0 %1536  ;;  %1594 = vst.msk [vmem:[%s3026_s24 + $0xc9] sm:$0x1] %vm375_vm0, %v1535_v13  ;;  %v4648_v13 = vrot.slane %v2239_v12, %v3076_v3  ;;  %v2246_v40 = vrot.slane %v2230_v29, %v3011_v19 }
 0x2a5   : > { %1595 = vst.msk [vmem:[%s3026_s24 + $0xd9] sm:$0x1] %vm375_vm0, %v1537_v17  ;;  %2091 = vrot.lane.b32.xlu1 %v1946_v37, %s2960_s7 }
 0x2a6   : > { %2093 = vrot.lane.b32.xlu0 %v5229_v25, %s2960_s7  ;;  %v4651_v25 = vrot.slane %v2253_v28, %v3076_v3 }
 0x2a7   : > { %v1539_v55 = vpop.permute.xlu1 %1538 }
 0x2a8   : > { %v1541_v20 = vpop.permute.xlu0 %1540  ;;  %1596 = vst.msk [vmem:[%s3026_s24 + $0xe9] sm:$0x1] %vm375_vm0, %v1539_v55  ;;  %v2261_v55 = vcombine.high %v2239_v12, %v2239_v12 }
 0x2a9   : > { %1597 = vst.msk [vmem:[%s3026_s24 + $0xf9] sm:$0x1] %vm375_vm0, %v1541_v20  ;;  %2095 = vrot.lane.b32.xlu1 %v1954_v44, %s2960_s7  ;;  %v2263_v44 = vcombine.high %v2253_v28, %v2253_v28  ;;  %v2232_v20 = vcombine.high %v2230_v29, %v2230_v29 }
 0x2aa   : > { %2097 = vrot.lane.b32.xlu0 %v5230_v14, %s2960_s7  ;;  %v4663_v14 = vrot.slane %v2261_v55, %v3076_v3 }
 0x2ab   : > { %v1543_v9 = vpop.permute.xlu1 %1542 }
 0x2ac   : > { %v1545_v23 = vpop.permute.xlu0 %1544  ;;  %1598 = vst.msk [vmem:[%s3026_s24 + $0x109] sm:$0x1] %vm375_vm0, %v1543_v9 }
 0x2ad   : > { %1599 = vst.msk [vmem:[%s3026_s24 + $0x119] sm:$0x1] %vm375_vm0, %v1545_v23  ;;  %2099 = vrot.lane.b32.xlu1 %v1962_v60, %s2960_s7  ;;  %v4666_v60 = vrot.slane %v2263_v44, %v3076_v3  ;;  %v2260_v23 = vrot.slane %v2232_v20, %v3011_v19 }
 0x2ae   : > { %2101 = vrot.lane.b32.xlu0 %v5231_v41, %s2960_s7  ;;  %v2272_v41 = vrot.slane %v3066_v61, %v3011_v19 }
 0x2af   : > { %v1547_v8 = vpop.permute.xlu1 %1546 }
 0x2b0   : > { %v1549_v7 = vpop.permute.xlu0 %1548  ;;  %1600 = vst.msk [vmem:[%s3026_s24 + $0x129] sm:$0x1] %vm375_vm0, %v1547_v8  ;;  %v4680_v8 = vrot.slane %v2246_v40, %v3076_v3 }
 0x2b1   : > { %1601 = vst.msk [vmem:[%s3026_s24 + $0x139] sm:$0x1] %vm375_vm0, %v1549_v7  ;;  %2103 = vrot.lane.b32.xlu1 %v1970_v34, %s2960_s7  ;;  %v2262_v34 = vcombine.high %v2246_v40, %v2246_v40 }
 0x2b2   : > { %2105 = vrot.lane.b32.xlu0 %v5232_v11, %s2960_s7 }
 0x2b3   : > { %v1551_v43 = vpop.permute.xlu1 %1550 }
 0x2b4   : > { %v1553_v53 = vpop.permute.xlu0 %1552  ;;  %1602 = vst.msk [vmem:[%s3026_s24 + $0x149] sm:$0x1] %vm375_vm0, %v1551_v43  ;;  %v4683_v43 = vrot.slane %v2260_v23, %v3076_v3 }
 0x2b5   : > { %1603 = vst.msk [vmem:[%s3026_s24 + $0x159] sm:$0x1] %vm375_vm0, %v1553_v53  ;;  %2107 = vrot.lane.b32.xlu1 %v1978_v50, %s2960_s7  ;;  %v2264_v50 = vcombine.high %v2260_v23, %v2260_v23  ;;  %v2280_v53 = vcombine.high %v2272_v41, %v2272_v41 }
 0x2b6   : > { %2109 = vrot.lane.b32.xlu0 %v5233_v56, %s2960_s7  ;;  %v2265_v56 = vcombine.high %v3066_v61, %v3066_v61 }
 0x2b7   : > { %v1555_v59 = vpop.permute.xlu1 %1554  ;;  %v4700_v61 = vrot.slane %v2264_v50, %v3076_v3 }
 0x2b8   : > { %v1557_v51 = vpop.permute.xlu0 %1556  ;;  %1604 = vst.msk [vmem:[%s3026_s24 + $0x169] sm:$0x1] %vm375_vm0, %v1555_v59  ;;  %v2288_v59 = vrot.slane %v2272_v41, %v3011_v19 }
 0x2b9   : > { %1605 = vst.msk [vmem:[%s3026_s24 + $0x179] sm:$0x1] %vm375_vm0, %v1557_v51  ;;  %2111 = vrot.lane.b32.xlu1 %v1986_v46, %s2960_s7  ;;  %v4697_v51 = vrot.slane %v2262_v34, %v3076_v3 }
 0x2ba   : > { %2113 = vrot.lane.b32.xlu0 %v5234_v35, %s2960_s7 }
 0x2bb   : > { %v1607_v21 = vpop.permute.xlu1 %1606 }
 0x2bc   : > { %v1609_v52 = vpop.permute.xlu0 %1608  ;;  %1678 = vst.msk [vmem:[%s3026_s24 + $0xa] sm:$0x1] %vm375_vm0, %v1607_v21  ;;  %v2302_v21 = vrot.slane %v2280_v53, %v3011_v19 }
 0x2bd   : > { %1679 = vst.msk [vmem:[%s3026_s24 + $0x1a] sm:$0x1] %vm375_vm0, %v1609_v52  ;;  %2115 = vrot.lane.b32.xlu1 %v1994_v36, %s2960_s7  ;;  %v2279_v36 = vrot.slane %v2265_v56, %v3011_v19  ;;  %v4713_v52 = vrot.slane %v2288_v59, %v3076_v3 }
 0x2be   : > { %2117 = vrot.lane.b32.xlu0 %v5235_v22, %s2960_s7 }
 0x2bf   : > { %v1611_v39 = vpop.permute.xlu1 %1610 }
 0x2c0   : > { %v1613_v15 = vpop.permute.xlu0 %1612  ;;  %1680 = vst.msk [vmem:[%s3026_s24 + $0x2a] sm:$0x1] %vm375_vm0, %v1611_v39 }
 0x2c1   : > { %1681 = vst.msk [vmem:[%s3026_s24 + $0x3a] sm:$0x1] %vm375_vm0, %v1613_v15  ;;  %2119 = vrot.lane.b32.xlu1 %v2002_v31, %s2960_s7  ;;  %v4716_v31 = vrot.slane %v2302_v21, %v3076_v3  ;;  %v2310_v15 = vcombine.high %v2288_v59, %v2288_v59 }
 0x2c2   : > { %2121 = vrot.lane.b32.xlu0 %v5236_v33, %s2960_s7  ;;  %v2312_v33 = vcombine.high %v2302_v21, %v2302_v21 }
 0x2c3   : > { %v1615_v42 = vpop.permute.xlu1 %1614 }
 0x2c4   : > { %v1617_v18 = vpop.permute.xlu0 %1616  ;;  %1682 = vst.msk [vmem:[%s3026_s24 + $0x4a] sm:$0x1] %vm375_vm0, %v1615_v42  ;;  %v2281_v42 = vcombine.high %v2279_v36, %v2279_v36 }
 0x2c5   : > { %1683 = vst.msk [vmem:[%s3026_s24 + $0x5a] sm:$0x1] %vm375_vm0, %v1617_v18  ;;  %2123 = vrot.lane.b32.xlu1 %v2010_v2, %s2960_s7  ;;  %v2321_v2 = vrot.slane %v3038_v45, %v3011_v19 }
 0x2c6   : > { %2125 = vrot.lane.b32.xlu0 %v5237_v48, %s2960_s7  ;;  %v4729_v48 = vrot.slane %v2310_v15, %v3076_v3 }
 0x2c7   : > { %v1619_v0 = vpop.permute.xlu1 %1618 }
 0x2c8   : > { %v1621_v27 = vpop.permute.xlu0 %1620  ;;  %1684 = vst.msk [vmem:[%s3026_s24 + $0x6a] sm:$0x1] %vm375_vm0, %v1619_v0 }
 0x2c9   : > { %1685 = vst.msk [vmem:[%s3026_s24 + $0x7a] sm:$0x1] %vm375_vm0, %v1621_v27  ;;  %2127 = vrot.lane.b32.xlu1 %v2018_v49, %s2960_s7  ;;  %v4732_v49 = vrot.slane %v2312_v33, %v3076_v3  ;;  %v2295_v27 = vrot.slane %v2279_v36, %v3011_v19 }
 0x2ca   : > { %2129 = vrot.lane.b32.xlu0 %v5238_v30, %s2960_s7  ;;  %v2309_v30 = vrot.slane %v2281_v42, %v3011_v19 }
 0x2cb   : > { %v1623_v47 = vpop.permute.xlu1 %1622 }
 0x2cc   : > { %v1625_v57 = vpop.permute.xlu0 %1624  ;;  %1686 = vst.msk [vmem:[%s3026_s24 + $0x8a] sm:$0x1] %vm375_vm0, %v1623_v47  ;;  %v2313_v10 = vcombine.high %v2309_v30, %v2309_v30 }
 0x2cd   : > { %1687 = vst.msk [vmem:[%s3026_s24 + $0x9a] sm:$0x1] %vm375_vm0, %v1625_v57  ;;  %2131 = vrot.lane.b32.xlu1 %v2026_v16, %s2960_s7  ;;  %v2329_v16 = vcombine.high %v2321_v2, %v2321_v2  ;;  %v2314_v57 = vcombine.high %v3038_v45, %v3038_v45  ;;  %v2337_v45 = vrot.slane %v2321_v2, %v3011_v19 }
 0x2ce   : > { %2133 = vrot.lane.b32.xlu0 %v5239_v54, %s2960_s7  ;;  %v4746_v54 = vrot.slane %v2295_v27, %v3076_v3 }
 0x2cf   : > { %v1627_v38 = vpop.permute.xlu1 %1626  ;;  %v2328_v28 = vrot.slane %v2314_v57, %v3011_v19  ;;  %v2359_v44 = vcombine.high %v2337_v45, %v2337_v45 }
 0x2d0   : > { %v1629_v58 = vpop.permute.xlu0 %1628  ;;  %1688 = vst.msk [vmem:[%s3026_s24 + $0xaa] sm:$0x1] %vm375_vm0, %v1627_v38 }
 0x2d1   : > { %1689 = vst.msk [vmem:[%s3026_s24 + $0xba] sm:$0x1] %vm375_vm0, %v1629_v58  ;;  %2135 = vrot.lane.b32.xlu1 %v2034_v1, %s2960_s7  ;;  %v4749_v1 = vrot.slane %v2309_v30, %v3076_v3  ;;  %v2311_v58 = vcombine.high %v2295_v27, %v2295_v27  ;;  %v2330_v40 = vcombine.high %v2328_v28, %v2328_v28 }
 0x2d2   : > { %2137 = vrot.lane.b32.xlu0 %v5240_v63, %s2960_s7  ;;  %v4788_v23 = vrot.slane %v2359_v44, %v3076_v3 }
 0x2d3   : > { %v1631_v5 = vpop.permute.xlu1 %1630  ;;  %v4760_v12 = vrot.slane %v2311_v58, %v3076_v3 }
 0x2d4   : > { %v1633_v26 = vpop.permute.xlu0 %1632  ;;  %1690 = vst.msk [vmem:[%s3026_s24 + $0xca] sm:$0x1] %vm375_vm0, %v1631_v5 }
 0x2d5   : > { %1691 = vst.msk [vmem:[%s3026_s24 + $0xda] sm:$0x1] %vm375_vm0, %v1633_v26  ;;  %2139 = vrot.lane.b32.xlu1 %v2042_v6, %s2960_s7  ;;  %v4763_v6 = vrot.slane %v2313_v10, %v3076_v3  ;;  %v2351_v26 = vrot.slane %v2329_v16, %v3011_v19 }
 0x2d6   : > { %2141 = vrot.lane.b32.xlu0 %v5241_v4, %s2960_s7  ;;  %v4775_v4 = vrot.slane %v2337_v45, %v3076_v3 }
 0x2d7   : > { %v1635_v37 = vpop.permute.xlu1 %1634  ;;  %v4778_v55 = vrot.slane %v2351_v26, %v3076_v3  ;;  %v2361_v20 = vcombine.high %v2351_v26, %v2351_v26 }
 0x2d8   : > { %v1637_v17 = vpop.permute.xlu0 %1636  ;;  %1692 = vst.msk [vmem:[%s3026_s24 + $0xea] sm:$0x1] %vm375_vm0, %v1635_v37 }
 0x2d9   : > { %1693 = vst.msk [vmem:[%s3026_s24 + $0xfa] sm:$0x1] %vm375_vm0, %v1637_v17  ;;  %2459 = vrot.lane.b32.xlu1 %v4648_v13, %s2961_s8  ;;  %v4791_v34 = vrot.slane %v2361_v20, %v3076_v3 }
 0x2da   : > { %2461 = vrot.lane.b32.xlu0 %v4651_v25, %s2961_s8 }
 0x2db   : > { %v1639_v62 = vpop.permute.xlu1 %1638 }
 0x2dc   : > { %v1641_v9 = vpop.permute.xlu0 %1640  ;;  %1694 = vst.msk [vmem:[%s3026_s24 + $0x10a] sm:$0x1] %vm375_vm0, %v1639_v62 }
 0x2dd   : > { %1695 = vst.msk [vmem:[%s3026_s24 + $0x11a] sm:$0x1] %vm375_vm0, %v1641_v9  ;;  %2463 = vrot.lane.b32.xlu1 %v4663_v14, %s2961_s8 }
 0x2de   : > { %2465 = vrot.lane.b32.xlu0 %v4666_v60, %s2961_s8 }
 0x2df   : > { %v1643_v7 = vpop.permute.xlu1 %1642 }
 0x2e0   : > { %v1645_v11 = vpop.permute.xlu0 %1644  ;;  %1696 = vst.msk [vmem:[%s3026_s24 + $0x12a] sm:$0x1] %vm375_vm0, %v1643_v7  ;;  %v2344_v7 = vrot.slane %v2328_v28, %v3011_v19 }
 0x2e1   : > { %1697 = vst.msk [vmem:[%s3026_s24 + $0x13a] sm:$0x1] %vm375_vm0, %v1645_v11  ;;  %2467 = vrot.lane.b32.xlu1 %v4680_v8, %s2961_s8  ;;  %v2358_v11 = vrot.slane %v2330_v40, %v3011_v19 }
 0x2e2   : > { %2469 = vrot.lane.b32.xlu0 %v4683_v43, %s2961_s8  ;;  %v4803_v56 = vrot.slane %v2344_v7, %v3076_v3  ;;  %v2360_v19 = vcombine.high %v2344_v7, %v2344_v7 }
 0x2e3   : > { %v1647_v46 = vpop.permute.xlu1 %1646 }
 0x2e4   : > { %v1649_v35 = vpop.permute.xlu0 %1648  ;;  %1698 = vst.msk [vmem:[%s3026_s24 + $0x14a] sm:$0x1] %vm375_vm0, %v1647_v46  ;;  %v4806_v46 = vrot.slane %v2358_v11, %v3076_v3 }
 0x2e5   : > { %1699 = vst.msk [vmem:[%s3026_s24 + $0x15a] sm:$0x1] %vm375_vm0, %v1649_v35  ;;  %2471 = vrot.lane.b32.xlu1 %v4697_v51, %s2961_s8  ;;  %v2362_v35 = vcombine.high %v2358_v11, %v2358_v11 }
 0x2e6   : > { %2473 = vrot.lane.b32.xlu0 %v4700_v61, %s2961_s8 }
 0x2e7   : > { %v1651_v22 = vpop.permute.xlu1 %1650  ;;  %v4819_v15 = vrot.slane %v2362_v35, %v3076_v3 }
 0x2e8   : > { %v1653_v39 = vpop.permute.xlu0 %1652  ;;  %1700 = vst.msk [vmem:[%s3026_s24 + $0x16a] sm:$0x1] %vm375_vm0, %v1651_v22  ;;  %v4816_v22 = vrot.slane %v2360_v19, %v3076_v3 }
 0x2e9   : > { %1701 = vst.msk [vmem:[%s3026_s24 + $0x17a] sm:$0x1] %vm375_vm0, %v1653_v39  ;;  %2475 = vrot.lane.b32.xlu1 %v4713_v52, %s2961_s8 }
 0x2ea   : > { %2477 = vrot.lane.b32.xlu0 %v4716_v31, %s2961_s8 }
 0x2eb   : > { %v2048_v18 = vpop.permute.xlu1 %2047 }
 0x2ec   : > { %v2050_v0 = vpop.permute.xlu0 %2049 }
 0x2ed   : > { %v2144_v47 = vsel %vm2143_vm1, %v2048_v18, %v2050_v0  ;;  %2479 = vrot.lane.b32.xlu1 %v4729_v48, %s2961_s8 }
 0x2ee   : > { %2192 = vst.msk [vmem:[%s3026_s24 + $0xb] sm:$0x1] %vm375_vm0, %v2144_v47  ;;  %2481 = vrot.lane.b32.xlu0 %v4732_v49, %s2961_s8 }
 0x2ef   : > { %v2052_v32 = vpop.permute.xlu1 %2051 }
 0x2f0   : > { %v2054_v38 = vpop.permute.xlu0 %2053 }
 0x2f1   : > { %v2145_v24 = vsel %vm2143_vm1, %v2052_v32, %v2054_v38  ;;  %2483 = vrot.lane.b32.xlu1 %v4746_v54, %s2961_s8 }
 0x2f2   : > { %2193 = vst.msk [vmem:[%s3026_s24 + $0x1b] sm:$0x1] %vm375_vm0, %v2145_v24  ;;  %2485 = vrot.lane.b32.xlu0 %v4749_v1, %s2961_s8 }
 0x2f3   : > { %v2056_v63 = vpop.permute.xlu1 %2055 }
 0x2f4   : > { %v2058_v5 = vpop.permute.xlu0 %2057 }
 0x2f5   : > { %v2146_v29 = vsel %vm2143_vm1, %v2056_v63, %v2058_v5  ;;  %2487 = vrot.lane.b32.xlu1 %v4760_v12, %s2961_s8 }
 0x2f6   : > { %2194 = vst.msk [vmem:[%s3026_s24 + $0x2b] sm:$0x1] %vm375_vm0, %v2146_v29  ;;  %2489 = vrot.lane.b32.xlu0 %v4763_v6, %s2961_s8 }
 0x2f7   : > { %v2060_v37 = vpop.permute.xlu1 %2059 }
 0x2f8   : > { %v2062_v17 = vpop.permute.xlu0 %2061 }
 0x2f9   : > { %v2147_v62 = vsel %vm2143_vm1, %v2060_v37, %v2062_v17  ;;  %2491 = vrot.lane.b32.xlu1 %v4775_v4, %s2961_s8 }
 0x2fa   : > { %2195 = vst.msk [vmem:[%s3026_s24 + $0x3b] sm:$0x1] %vm375_vm0, %v2147_v62  ;;  %2493 = vrot.lane.b32.xlu0 %v4778_v55, %s2961_s8 }
 0x2fb   : > { %v2064_v9 = vpop.permute.xlu1 %2063 }
 0x2fc   : > { %v2066_v41 = vpop.permute.xlu0 %2065 }
 0x2fd   : > { %v2148_v50 = vsel %vm2143_vm1, %v2064_v9, %v2066_v41  ;;  %2495 = vrot.lane.b32.xlu1 %v4788_v23, %s2961_s8 }
 0x2fe   : > { %2196 = vst.msk [vmem:[%s3026_s24 + $0x4b] sm:$0x1] %vm375_vm0, %v2148_v50  ;;  %2497 = vrot.lane.b32.xlu0 %v4791_v34, %s2961_s8 }
 0x2ff   : > { %v2068_v53 = vpop.permute.xlu1 %2067 }
 0x300   : > { %v2070_v59 = vpop.permute.xlu0 %2069 }
 0x301   : > { %v2149_v21 = vsel %vm2143_vm1, %v2068_v53, %v2070_v59  ;;  %2499 = vrot.lane.b32.xlu1 %v4803_v56, %s2961_s8 }
 0x302   : > { %2197 = vst.msk [vmem:[%s3026_s24 + $0x5b] sm:$0x1] %vm375_vm0, %v2149_v21  ;;  %2501 = vrot.lane.b32.xlu0 %v4806_v46, %s2961_s8 }
 0x303   : > { %v2072_v36 = vpop.permute.xlu1 %2071 }
 0x304   : > { %v2074_v39 = vpop.permute.xlu0 %2073 }
 0x305   : > { %v2150_v33 = vsel %vm2143_vm1, %v2072_v36, %v2074_v39  ;;  %2503 = vrot.lane.b32.xlu1 %v4816_v22, %s2961_s8 }
 0x306   : > { %2198 = vst.msk [vmem:[%s3026_s24 + $0x6b] sm:$0x1] %vm375_vm0, %v2150_v33  ;;  %2505 = vrot.lane.b32.xlu0 %v4819_v15, %s2961_s8 }
 0x307   : > { %v2076_v42 = vpop.permute.xlu1 %2075 }
 0x308   : > { %v2078_v2 = vpop.permute.xlu0 %2077 }
 0x309   : > { %v2151_v18 = vsel %vm2143_vm1, %v2076_v42, %v2078_v2  ;;  %2555 = vrot.lane.b32.xlu1 %v4648_v13, %s2962_s10 }
 0x30a   : > { %2199 = vst.msk [vmem:[%s3026_s24 + $0x7b] sm:$0x1] %vm375_vm0, %v2151_v18  ;;  %2557 = vrot.lane.b32.xlu0 %v4651_v25, %s2962_s10 }
 0x30b   : > { %v2080_v3 = vpop.permute.xlu1 %2079 }
 0x30c   : > { %v2082_v0 = vpop.permute.xlu0 %2081 }
 0x30d   : > { %v2152_v27 = vsel %vm2143_vm1, %v2080_v3, %v2082_v0  ;;  %2559 = vrot.lane.b32.xlu1 %v4663_v14, %s2962_s10 }
 0x30e   : > { %2200 = vst.msk [vmem:[%s3026_s24 + $0x8b] sm:$0x1] %vm375_vm0, %v2152_v27  ;;  %2561 = vrot.lane.b32.xlu0 %v4666_v60, %s2962_s10 }
 0x30f   : > { %v2084_v30 = vpop.permute.xlu1 %2083 }
 0x310   : > { %v2086_v47 = vpop.permute.xlu0 %2085 }
 0x311   : > { %v2153_v16 = vsel %vm2143_vm1, %v2084_v30, %v2086_v47  ;;  %2563 = vrot.lane.b32.xlu1 %v4680_v8, %s2962_s10 }
 0x312   : > { %2201 = vst.msk [vmem:[%s3026_s24 + $0x9b] sm:$0x1] %vm375_vm0, %v2153_v16  ;;  %2565 = vrot.lane.b32.xlu0 %v4683_v43, %s2962_s10 }
 0x313   : > { %v2088_v57 = vpop.permute.xlu1 %2087 }
 0x314   : > { %v2090_v32 = vpop.permute.xlu0 %2089 }
 0x315   : > { %v2154_v38 = vsel %vm2143_vm1, %v2088_v57, %v2090_v32  ;;  %2567 = vrot.lane.b32.xlu1 %v4697_v51, %s2962_s10 }
 0x316   : > { %2202 = vst.msk [vmem:[%s3026_s24 + $0xab] sm:$0x1] %vm375_vm0, %v2154_v38  ;;  %2569 = vrot.lane.b32.xlu0 %v4700_v61, %s2962_s10 }
 0x317   : > { %v2092_v58 = vpop.permute.xlu1 %2091 }
 0x318   : > { %v2094_v10 = vpop.permute.xlu0 %2093 }
 0x319   : > { %v2155_v24 = vsel %vm2143_vm1, %v2092_v58, %v2094_v10  ;;  %2571 = vrot.lane.b32.xlu1 %v4713_v52, %s2962_s10 }
 0x31a   : > { %2203 = vst.msk [vmem:[%s3026_s24 + $0xbb] sm:$0x1] %vm375_vm0, %v2155_v24  ;;  %2573 = vrot.lane.b32.xlu0 %v4716_v31, %s2962_s10 }
 0x31b   : > { %v2096_v45 = vpop.permute.xlu1 %2095 }
 0x31c   : > { %v2098_v63 = vpop.permute.xlu0 %2097 }
 0x31d   : > { %v2156_v5 = vsel %vm2143_vm1, %v2096_v45, %v2098_v63  ;;  %2575 = vrot.lane.b32.xlu1 %v4729_v48, %s2962_s10 }
 0x31e   : > { %2204 = vst.msk [vmem:[%s3026_s24 + $0xcb] sm:$0x1] %vm375_vm0, %v2156_v5  ;;  %2577 = vrot.lane.b32.xlu0 %v4732_v49, %s2962_s10 }
 0x31f   : > { %v2100_v26 = vpop.permute.xlu1 %2099 }
 0x320   : > { %v2102_v28 = vpop.permute.xlu0 %2101 }
 0x321   : > { %v2157_v29 = vsel %vm2143_vm1, %v2100_v26, %v2102_v28  ;;  %2579 = vrot.lane.b32.xlu1 %v4746_v54, %s2962_s10 }
 0x322   : > { %2205 = vst.msk [vmem:[%s3026_s24 + $0xdb] sm:$0x1] %vm375_vm0, %v2157_v29  ;;  %2581 = vrot.lane.b32.xlu0 %v4749_v1, %s2962_s10 }
 0x323   : > { %v2104_v37 = vpop.permute.xlu1 %2103 }
 0x324   : > { %v2106_v17 = vpop.permute.xlu0 %2105 }
 0x325   : > { %v2158_v44 = vsel %vm2143_vm1, %v2104_v37, %v2106_v17  ;;  %2583 = vrot.lane.b32.xlu1 %v4760_v12, %s2962_s10 }
 0x326   : > { %2206 = vst.msk [vmem:[%s3026_s24 + $0xeb] sm:$0x1] %vm375_vm0, %v2158_v44  ;;  %2585 = vrot.lane.b32.xlu0 %v4763_v6, %s2962_s10 }
 0x327   : > { %v2108_v20 = vpop.permute.xlu1 %2107 }
 0x328   : > { %v2110_v40 = vpop.permute.xlu0 %2109 }
 0x329   : > { %v2159_v62 = vsel %vm2143_vm1, %v2108_v20, %v2110_v40  ;;  %2587 = vrot.lane.b32.xlu1 %v4775_v4, %s2962_s10 }
 0x32a   : > { %2207 = vst.msk [vmem:[%s3026_s24 + $0xfb] sm:$0x1] %vm375_vm0, %v2159_v62  ;;  %2589 = vrot.lane.b32.xlu0 %v4778_v55, %s2962_s10 }
 0x32b   : > { %v2112_v9 = vpop.permute.xlu1 %2111 }
 0x32c   : > { %v2114_v41 = vpop.permute.xlu0 %2113 }
 0x32d   : > { %v2160_v7 = vsel %vm2143_vm1, %v2112_v9, %v2114_v41  ;;  %2591 = vrot.lane.b32.xlu1 %v4788_v23, %s2962_s10 }
 0x32e   : > { %2208 = vst.msk [vmem:[%s3026_s24 + $0x10b] sm:$0x1] %vm375_vm0, %v2160_v7  ;;  %2593 = vrot.lane.b32.xlu0 %v4791_v34, %s2962_s10 }
 0x32f   : > { %v2116_v11 = vpop.permute.xlu1 %2115 }
 0x330   : > { %v2118_v50 = vpop.permute.xlu0 %2117 }
 0x331   : > { %v2161_v53 = vsel %vm2143_vm1, %v2116_v11, %v2118_v50  ;;  %2595 = vrot.lane.b32.xlu1 %v4803_v56, %s2962_s10 }
 0x332   : > { %2209 = vst.msk [vmem:[%s3026_s24 + $0x11b] sm:$0x1] %vm375_vm0, %v2161_v53  ;;  %2597 = vrot.lane.b32.xlu0 %v4806_v46, %s2962_s10 }
 0x333   : > { %v2120_v59 = vpop.permute.xlu1 %2119 }
 0x334   : > { %v2122_v19 = vpop.permute.xlu0 %2121 }
 0x335   : > { %v2162_v35 = vsel %vm2143_vm1, %v2120_v59, %v2122_v19  ;;  %2599 = vrot.lane.b32.xlu1 %v4816_v22, %s2962_s10 }
 0x336   : > { %2210 = vst.msk [vmem:[%s3026_s24 + $0x12b] sm:$0x1] %vm375_vm0, %v2162_v35  ;;  %2601 = vrot.lane.b32.xlu0 %v4819_v15, %s2962_s10 }
 0x337   : > { %v2124_v21 = vpop.permute.xlu1 %2123 }
 0x338   : > { %v2126_v36 = vpop.permute.xlu0 %2125 }
 0x339   : > { %v2163_v39 = vsel %vm2143_vm1, %v2124_v21, %v2126_v36  ;;  %2651 = vrot.lane.b32.xlu1 %v4648_v13, %s2963_s11 }
 0x33a   : > { %2211 = vst.msk [vmem:[%s3026_s24 + $0x13b] sm:$0x1] %vm375_vm0, %v2163_v39  ;;  %2653 = vrot.lane.b32.xlu0 %v4651_v25, %s2963_s11 }
 0x33b   : > { %v2128_v33 = vpop.permute.xlu1 %2127 }
 0x33c   : > { %v2130_v42 = vpop.permute.xlu0 %2129 }
 0x33d   : > { %v2164_v2 = vsel %vm2143_vm1, %v2128_v33, %v2130_v42  ;;  %2655 = vrot.lane.b32.xlu1 %v4663_v14, %s2963_s11 }
 0x33e   : > { %2212 = vst.msk [vmem:[%s3026_s24 + $0x14b] sm:$0x1] %vm375_vm0, %v2164_v2  ;;  %2657 = vrot.lane.b32.xlu0 %v4666_v60, %s2963_s11 }
 0x33f   : > { %v2132_v18 = vpop.permute.xlu1 %2131 }
 0x340   : > { %v2134_v3 = vpop.permute.xlu0 %2133 }
 0x341   : > { %v2165_v0 = vsel %vm2143_vm1, %v2132_v18, %v2134_v3  ;;  %2659 = vrot.lane.b32.xlu1 %v4680_v8, %s2963_s11 }
 0x342   : > { %2213 = vst.msk [vmem:[%s3026_s24 + $0x15b] sm:$0x1] %vm375_vm0, %v2165_v0  ;;  %2661 = vrot.lane.b32.xlu0 %v4683_v43, %s2963_s11 }
 0x343   : > { %v2136_v27 = vpop.permute.xlu1 %2135 }
 0x344   : > { %v2138_v30 = vpop.permute.xlu0 %2137 }
 0x345   : > { %v2166_v47 = vsel %vm2143_vm1, %v2136_v27, %v2138_v30  ;;  %2663 = vrot.lane.b32.xlu1 %v4697_v51, %s2963_s11 }
 0x346   : > { %2214 = vst.msk [vmem:[%s3026_s24 + $0x16b] sm:$0x1] %vm375_vm0, %v2166_v47  ;;  %2665 = vrot.lane.b32.xlu0 %v4700_v61, %s2963_s11 }
 0x347   : > { %v2140_v16 = vpop.permute.xlu1 %2139 }
 0x348   : > { %v2142_v57 = vpop.permute.xlu0 %2141 }
 0x349   : > { %v2167_v32 = vsel %vm2143_vm1, %v2140_v16, %v2142_v57  ;;  %2667 = vrot.lane.b32.xlu1 %v4713_v52, %s2963_s11 }
 0x34a   : > { %2215 = vst.msk [vmem:[%s3026_s24 + $0x17b] sm:$0x1] %vm375_vm0, %v2167_v32  ;;  %2669 = vrot.lane.b32.xlu0 %v4716_v31, %s2963_s11 }
 0x34b   : > { %v2460_v38 = vpop.permute.xlu1 %2459 }
 0x34c   : > { %v2462_v58 = vpop.permute.xlu0 %2461  ;;  %2531 = vst.msk [vmem:[%s3026_s24 + $0xc] sm:$0x1] %vm375_vm0, %v2460_v38 }
 0x34d   : > { %2532 = vst.msk [vmem:[%s3026_s24 + $0x1c] sm:$0x1] %vm375_vm0, %v2462_v58  ;;  %2671 = vrot.lane.b32.xlu1 %v4729_v48, %s2963_s11 }
 0x34e   : > { %2673 = vrot.lane.b32.xlu0 %v4732_v49, %s2963_s11 }
 0x34f   : > { %v2464_v10 = vpop.permute.xlu1 %2463 }
 0x350   : > { %v2466_v24 = vpop.permute.xlu0 %2465  ;;  %2533 = vst.msk [vmem:[%s3026_s24 + $0x2c] sm:$0x1] %vm375_vm0, %v2464_v10 }
 0x351   : > { %2534 = vst.msk [vmem:[%s3026_s24 + $0x3c] sm:$0x1] %vm375_vm0, %v2466_v24  ;;  %2675 = vrot.lane.b32.xlu1 %v4746_v54, %s2963_s11 }
 0x352   : > { %2677 = vrot.lane.b32.xlu0 %v4749_v1, %s2963_s11 }
 0x353   : > { %v2468_v45 = vpop.permute.xlu1 %2467 }
 0x354   : > { %v2470_v63 = vpop.permute.xlu0 %2469  ;;  %2535 = vst.msk [vmem:[%s3026_s24 + $0x4c] sm:$0x1] %vm375_vm0, %v2468_v45 }
 0x355   : > { %2536 = vst.msk [vmem:[%s3026_s24 + $0x5c] sm:$0x1] %vm375_vm0, %v2470_v63  ;;  %2679 = vrot.lane.b32.xlu1 %v4760_v12, %s2963_s11 }
 0x356   : > { %2681 = vrot.lane.b32.xlu0 %v4763_v6, %s2963_s11 }
 0x357   : > { %v2472_v5 = vpop.permute.xlu1 %2471 }
 0x358   : > { %v2474_v26 = vpop.permute.xlu0 %2473  ;;  %2537 = vst.msk [vmem:[%s3026_s24 + $0x6c] sm:$0x1] %vm375_vm0, %v2472_v5 }
 0x359   : > { %2538 = vst.msk [vmem:[%s3026_s24 + $0x7c] sm:$0x1] %vm375_vm0, %v2474_v26  ;;  %2683 = vrot.lane.b32.xlu1 %v4775_v4, %s2963_s11 }
 0x35a   : > { %2685 = vrot.lane.b32.xlu0 %v4778_v55, %s2963_s11 }
 0x35b   : > { %v2476_v28 = vpop.permute.xlu1 %2475 }
 0x35c   : > { %v2478_v29 = vpop.permute.xlu0 %2477  ;;  %2539 = vst.msk [vmem:[%s3026_s24 + $0x8c] sm:$0x1] %vm375_vm0, %v2476_v28 }
 0x35d   : > { %2540 = vst.msk [vmem:[%s3026_s24 + $0x9c] sm:$0x1] %vm375_vm0, %v2478_v29  ;;  %2687 = vrot.lane.b32.xlu1 %v4788_v23, %s2963_s11 }
 0x35e   : > { %2689 = vrot.lane.b32.xlu0 %v4791_v34, %s2963_s11 }
 0x35f   : > { %v2480_v37 = vpop.permute.xlu1 %2479 }
 0x360   : > { %v2482_v17 = vpop.permute.xlu0 %2481  ;;  %2541 = vst.msk [vmem:[%s3026_s24 + $0xac] sm:$0x1] %vm375_vm0, %v2480_v37 }
 0x361   : > { %2542 = vst.msk [vmem:[%s3026_s24 + $0xbc] sm:$0x1] %vm375_vm0, %v2482_v17  ;;  %2691 = vrot.lane.b32.xlu1 %v4803_v56, %s2963_s11 }
 0x362   : > { %2693 = vrot.lane.b32.xlu0 %v4806_v46, %s2963_s11 }
 0x363   : > { %v2484_v44 = vpop.permute.xlu1 %2483 }
 0x364   : > { %v2486_v20 = vpop.permute.xlu0 %2485  ;;  %2543 = vst.msk [vmem:[%s3026_s24 + $0xcc] sm:$0x1] %vm375_vm0, %v2484_v44 }
 0x365   : > { %2544 = vst.msk [vmem:[%s3026_s24 + $0xdc] sm:$0x1] %vm375_vm0, %v2486_v20  ;;  %2695 = vrot.lane.b32.xlu1 %v4816_v22, %s2963_s11 }
 0x366   : > { %2697 = vrot.lane.b32.xlu0 %v4819_v15, %s2963_s11 }
 0x367   : > { %v2488_v40 = vpop.permute.xlu1 %2487 }
 0x368   : > { %v2490_v62 = vpop.permute.xlu0 %2489  ;;  %2545 = vst.msk [vmem:[%s3026_s24 + $0xec] sm:$0x1] %vm375_vm0, %v2488_v40 }
 0x369   : > { %2546 = vst.msk [vmem:[%s3026_s24 + $0xfc] sm:$0x1] %vm375_vm0, %v2490_v62  ;;  %2747 = vrot.lane.b32.xlu1 %v4648_v13, %s2964_s12 }
 0x36a   : > { %2749 = vrot.lane.b32.xlu0 %v4651_v25, %s2964_s12 }
 0x36b   : > { %v2492_v9 = vpop.permute.xlu1 %2491 }
 0x36c   : > { %v2494_v41 = vpop.permute.xlu0 %2493  ;;  %2547 = vst.msk [vmem:[%s3026_s24 + $0x10c] sm:$0x1] %vm375_vm0, %v2492_v9 }
 0x36d   : > { %2548 = vst.msk [vmem:[%s3026_s24 + $0x11c] sm:$0x1] %vm375_vm0, %v2494_v41  ;;  %2751 = vrot.lane.b32.xlu1 %v4663_v14, %s2964_s12 }
 0x36e   : > { %2753 = vrot.lane.b32.xlu0 %v4666_v60, %s2964_s12 }
 0x36f   : > { %v2496_v13 = vpop.permute.xlu1 %2495 }
 0x370   : > { %v2498_v7 = vpop.permute.xlu0 %2497  ;;  %2549 = vst.msk [vmem:[%s3026_s24 + $0x12c] sm:$0x1] %vm375_vm0, %v2496_v13 }
 0x371   : > { %2550 = vst.msk [vmem:[%s3026_s24 + $0x13c] sm:$0x1] %vm375_vm0, %v2498_v7  ;;  %2755 = vrot.lane.b32.xlu1 %v4680_v8, %s2964_s12 }
 0x372   : > { %2757 = vrot.lane.b32.xlu0 %v4683_v43, %s2964_s12 }
 0x373   : > { %v2500_v25 = vpop.permute.xlu1 %2499 }
 0x374   : > { %v2502_v14 = vpop.permute.xlu0 %2501  ;;  %2551 = vst.msk [vmem:[%s3026_s24 + $0x14c] sm:$0x1] %vm375_vm0, %v2500_v25 }
 0x375   : > { %2552 = vst.msk [vmem:[%s3026_s24 + $0x15c] sm:$0x1] %vm375_vm0, %v2502_v14  ;;  %2759 = vrot.lane.b32.xlu1 %v4697_v51, %s2964_s12 }
 0x376   : > { %2761 = vrot.lane.b32.xlu0 %v4700_v61, %s2964_s12 }
 0x377   : > { %v2504_v60 = vpop.permute.xlu1 %2503 }
 0x378   : > { %v2506_v8 = vpop.permute.xlu0 %2505  ;;  %2553 = vst.msk [vmem:[%s3026_s24 + $0x16c] sm:$0x1] %vm375_vm0, %v2504_v60 }
 0x379   : > { %2554 = vst.msk [vmem:[%s3026_s24 + $0x17c] sm:$0x1] %vm375_vm0, %v2506_v8  ;;  %2763 = vrot.lane.b32.xlu1 %v4713_v52, %s2964_s12 }
 0x37a   : > { %2765 = vrot.lane.b32.xlu0 %v4716_v31, %s2964_s12 }
 0x37b   : > { %v2556_v43 = vpop.permute.xlu1 %2555 }
 0x37c   : > { %v2558_v51 = vpop.permute.xlu0 %2557  ;;  %2627 = vst.msk [vmem:[%s3026_s24 + $0xd] sm:$0x1] %vm375_vm0, %v2556_v43 }
 0x37d   : > { %2628 = vst.msk [vmem:[%s3026_s24 + $0x1d] sm:$0x1] %vm375_vm0, %v2558_v51  ;;  %2767 = vrot.lane.b32.xlu1 %v4729_v48, %s2964_s12 }
 0x37e   : > { %2769 = vrot.lane.b32.xlu0 %v4732_v49, %s2964_s12 }
 0x37f   : > { %v2560_v61 = vpop.permute.xlu1 %2559 }
 0x380   : > { %v2562_v52 = vpop.permute.xlu0 %2561  ;;  %2629 = vst.msk [vmem:[%s3026_s24 + $0x2d] sm:$0x1] %vm375_vm0, %v2560_v61 }
 0x381   : > { %2630 = vst.msk [vmem:[%s3026_s24 + $0x3d] sm:$0x1] %vm375_vm0, %v2562_v52  ;;  %2771 = vrot.lane.b32.xlu1 %v4746_v54, %s2964_s12 }
 0x382   : > { %2773 = vrot.lane.b32.xlu0 %v4749_v1, %s2964_s12 }
 0x383   : > { %v2564_v31 = vpop.permute.xlu1 %2563 }
 0x384   : > { %v2566_v48 = vpop.permute.xlu0 %2565  ;;  %2631 = vst.msk [vmem:[%s3026_s24 + $0x4d] sm:$0x1] %vm375_vm0, %v2564_v31 }
 0x385   : > { %2632 = vst.msk [vmem:[%s3026_s24 + $0x5d] sm:$0x1] %vm375_vm0, %v2566_v48  ;;  %2775 = vrot.lane.b32.xlu1 %v4760_v12, %s2964_s12 }
 0x386   : > { %2777 = vrot.lane.b32.xlu0 %v4763_v6, %s2964_s12 }
 0x387   : > { %v2568_v49 = vpop.permute.xlu1 %2567 }
 0x388   : > { %v2570_v54 = vpop.permute.xlu0 %2569  ;;  %2633 = vst.msk [vmem:[%s3026_s24 + $0x6d] sm:$0x1] %vm375_vm0, %v2568_v49 }
 0x389   : > { %2634 = vst.msk [vmem:[%s3026_s24 + $0x7d] sm:$0x1] %vm375_vm0, %v2570_v54  ;;  %2779 = vrot.lane.b32.xlu1 %v4775_v4, %s2964_s12 }
 0x38a   : > { %2781 = vrot.lane.b32.xlu0 %v4778_v55, %s2964_s12 }
 0x38b   : > { %v2572_v1 = vpop.permute.xlu1 %2571 }
 0x38c   : > { %v2574_v12 = vpop.permute.xlu0 %2573  ;;  %2635 = vst.msk [vmem:[%s3026_s24 + $0x8d] sm:$0x1] %vm375_vm0, %v2572_v1 }
 0x38d   : > { %2636 = vst.msk [vmem:[%s3026_s24 + $0x9d] sm:$0x1] %vm375_vm0, %v2574_v12  ;;  %2783 = vrot.lane.b32.xlu1 %v4788_v23, %s2964_s12 }
 0x38e   : > { %2785 = vrot.lane.b32.xlu0 %v4791_v34, %s2964_s12 }
 0x38f   : > { %v2576_v6 = vpop.permute.xlu1 %2575 }
 0x390   : > { %v2578_v4 = vpop.permute.xlu0 %2577  ;;  %2637 = vst.msk [vmem:[%s3026_s24 + $0xad] sm:$0x1] %vm375_vm0, %v2576_v6 }
 0x391   : > { %2638 = vst.msk [vmem:[%s3026_s24 + $0xbd] sm:$0x1] %vm375_vm0, %v2578_v4  ;;  %2787 = vrot.lane.b32.xlu1 %v4803_v56, %s2964_s12 }
 0x392   : > { %2789 = vrot.lane.b32.xlu0 %v4806_v46, %s2964_s12 }
 0x393   : > { %v2580_v55 = vpop.permute.xlu1 %2579 }
 0x394   : > { %v2582_v23 = vpop.permute.xlu0 %2581  ;;  %2639 = vst.msk [vmem:[%s3026_s24 + $0xcd] sm:$0x1] %vm375_vm0, %v2580_v55 }
 0x395   : > { %2640 = vst.msk [vmem:[%s3026_s24 + $0xdd] sm:$0x1] %vm375_vm0, %v2582_v23  ;;  %2791 = vrot.lane.b32.xlu1 %v4816_v22, %s2964_s12 }
 0x396   : > { %2793 = vrot.lane.b32.xlu0 %v4819_v15, %s2964_s12 }
 0x397   : > { %v2584_v34 = vpop.permute.xlu1 %2583 }
 0x398   : > { %v2586_v56 = vpop.permute.xlu0 %2585  ;;  %2641 = vst.msk [vmem:[%s3026_s24 + $0xed] sm:$0x1] %vm375_vm0, %v2584_v34 }
 0x399   : > { %2642 = vst.msk [vmem:[%s3026_s24 + $0xfd] sm:$0x1] %vm375_vm0, %v2586_v56 }
 0x39b   : > { %v2588_v46 = vpop.permute.xlu1 %2587 }
 0x39c   : > { %v2590_v11 = vpop.permute.xlu0 %2589  ;;  %2643 = vst.msk [vmem:[%s3026_s24 + $0x10d] sm:$0x1] %vm375_vm0, %v2588_v46 }
 0x39d   : > { %2644 = vst.msk [vmem:[%s3026_s24 + $0x11d] sm:$0x1] %vm375_vm0, %v2590_v11 }
 0x39f   : > { %v2592_v22 = vpop.permute.xlu1 %2591 }
 0x3a0   : > { %v2594_v50 = vpop.permute.xlu0 %2593  ;;  %2645 = vst.msk [vmem:[%s3026_s24 + $0x12d] sm:$0x1] %vm375_vm0, %v2592_v22 }
 0x3a1   : > { %2646 = vst.msk [vmem:[%s3026_s24 + $0x13d] sm:$0x1] %vm375_vm0, %v2594_v50 }
 0x3a3   : > { %v2596_v15 = vpop.permute.xlu1 %2595 }
 0x3a4   : > { %v2598_v53 = vpop.permute.xlu0 %2597  ;;  %2647 = vst.msk [vmem:[%s3026_s24 + $0x14d] sm:$0x1] %vm375_vm0, %v2596_v15 }
 0x3a5   : > { %2648 = vst.msk [vmem:[%s3026_s24 + $0x15d] sm:$0x1] %vm375_vm0, %v2598_v53 }
 0x3a7   : > { %v2600_v59 = vpop.permute.xlu1 %2599 }
 0x3a8   : > { %v2602_v19 = vpop.permute.xlu0 %2601  ;;  %2649 = vst.msk [vmem:[%s3026_s24 + $0x16d] sm:$0x1] %vm375_vm0, %v2600_v59 }
 0x3a9   : > { %2650 = vst.msk [vmem:[%s3026_s24 + $0x17d] sm:$0x1] %vm375_vm0, %v2602_v19 }
 0x3ab   : > { %v2652_v35 = vpop.permute.xlu1 %2651 }
 0x3ac   : > { %v2654_v21 = vpop.permute.xlu0 %2653  ;;  %2723 = vst.msk [vmem:[%s3026_s24 + $0xe] sm:$0x1] %vm375_vm0, %v2652_v35 }
 0x3ad   : > { %2724 = vst.msk [vmem:[%s3026_s24 + $0x1e] sm:$0x1] %vm375_vm0, %v2654_v21 }
 0x3af   : > { %v2656_v36 = vpop.permute.xlu1 %2655 }
 0x3b0   : > { %v2658_v39 = vpop.permute.xlu0 %2657  ;;  %2725 = vst.msk [vmem:[%s3026_s24 + $0x2e] sm:$0x1] %vm375_vm0, %v2656_v36 }
 0x3b1   : > { %2726 = vst.msk [vmem:[%s3026_s24 + $0x3e] sm:$0x1] %vm375_vm0, %v2658_v39 }
 0x3b3   : > { %v2660_v33 = vpop.permute.xlu1 %2659 }
 0x3b4   : > { %v2662_v42 = vpop.permute.xlu0 %2661  ;;  %2727 = vst.msk [vmem:[%s3026_s24 + $0x4e] sm:$0x1] %vm375_vm0, %v2660_v33 }
 0x3b5   : > { %2728 = vst.msk [vmem:[%s3026_s24 + $0x5e] sm:$0x1] %vm375_vm0, %v2662_v42 }
 0x3b7   : > { %v2664_v2 = vpop.permute.xlu1 %2663 }
 0x3b8   : > { %v2666_v18 = vpop.permute.xlu0 %2665  ;;  %2729 = vst.msk [vmem:[%s3026_s24 + $0x6e] sm:$0x1] %vm375_vm0, %v2664_v2 }
 0x3b9   : > { %2730 = vst.msk [vmem:[%s3026_s24 + $0x7e] sm:$0x1] %vm375_vm0, %v2666_v18 }
 0x3bb   : > { %v2668_v3 = vpop.permute.xlu1 %2667 }
 0x3bc   : > { %v2670_v0 = vpop.permute.xlu0 %2669  ;;  %2731 = vst.msk [vmem:[%s3026_s24 + $0x8e] sm:$0x1] %vm375_vm0, %v2668_v3 }
 0x3bd   : > { %2732 = vst.msk [vmem:[%s3026_s24 + $0x9e] sm:$0x1] %vm375_vm0, %v2670_v0 }
 0x3bf   : > { %v2672_v27 = vpop.permute.xlu1 %2671 }
 0x3c0   : > { %v2674_v30 = vpop.permute.xlu0 %2673  ;;  %2733 = vst.msk [vmem:[%s3026_s24 + $0xae] sm:$0x1] %vm375_vm0, %v2672_v27 }
 0x3c1   : > { %2734 = vst.msk [vmem:[%s3026_s24 + $0xbe] sm:$0x1] %vm375_vm0, %v2674_v30 }
 0x3c3   : > { %v2676_v47 = vpop.permute.xlu1 %2675 }
 0x3c4   : > { %v2678_v16 = vpop.permute.xlu0 %2677  ;;  %2735 = vst.msk [vmem:[%s3026_s24 + $0xce] sm:$0x1] %vm375_vm0, %v2676_v47 }
 0x3c5   : > { %2736 = vst.msk [vmem:[%s3026_s24 + $0xde] sm:$0x1] %vm375_vm0, %v2678_v16 }
 0x3c7   : > { %v2680_v57 = vpop.permute.xlu1 %2679 }
 0x3c8   : > { %v2682_v32 = vpop.permute.xlu0 %2681  ;;  %2737 = vst.msk [vmem:[%s3026_s24 + $0xee] sm:$0x1] %vm375_vm0, %v2680_v57 }
 0x3c9   : > { %2738 = vst.msk [vmem:[%s3026_s24 + $0xfe] sm:$0x1] %vm375_vm0, %v2682_v32 }
 0x3cb   : > { %v2684_v38 = vpop.permute.xlu1 %2683 }
 0x3cc   : > { %v2686_v58 = vpop.permute.xlu0 %2685  ;;  %2739 = vst.msk [vmem:[%s3026_s24 + $0x10e] sm:$0x1] %vm375_vm0, %v2684_v38 }
 0x3cd   : > { %2740 = vst.msk [vmem:[%s3026_s24 + $0x11e] sm:$0x1] %vm375_vm0, %v2686_v58 }
 0x3cf   : > { %v2688_v10 = vpop.permute.xlu1 %2687 }
 0x3d0   : > { %v2690_v24 = vpop.permute.xlu0 %2689  ;;  %2741 = vst.msk [vmem:[%s3026_s24 + $0x12e] sm:$0x1] %vm375_vm0, %v2688_v10 }
 0x3d1   : > { %2742 = vst.msk [vmem:[%s3026_s24 + $0x13e] sm:$0x1] %vm375_vm0, %v2690_v24 }
 0x3d3   : > { %v2692_v45 = vpop.permute.xlu1 %2691 }
 0x3d4   : > { %v2694_v63 = vpop.permute.xlu0 %2693  ;;  %2743 = vst.msk [vmem:[%s3026_s24 + $0x14e] sm:$0x1] %vm375_vm0, %v2692_v45 }
 0x3d5   : > { %2744 = vst.msk [vmem:[%s3026_s24 + $0x15e] sm:$0x1] %vm375_vm0, %v2694_v63 }
 0x3d7   : > { %v2696_v5 = vpop.permute.xlu1 %2695 }
 0x3d8   : > { %v2698_v26 = vpop.permute.xlu0 %2697  ;;  %2745 = vst.msk [vmem:[%s3026_s24 + $0x16e] sm:$0x1] %vm375_vm0, %v2696_v5 }
 0x3d9   : > { %2746 = vst.msk [vmem:[%s3026_s24 + $0x17e] sm:$0x1] %vm375_vm0, %v2698_v26 }
 0x3db   : > { %v2748_v28 = vpop.permute.xlu1 %2747 }
 0x3dc   : > { %v2750_v29 = vpop.permute.xlu0 %2749  ;;  %2819 = vst.msk [vmem:[%s3026_s24 + $0xf] sm:$0x1] %vm375_vm0, %v2748_v28 }
 0x3dd   : > { %2820 = vst.msk [vmem:[%s3026_s24 + $0x1f] sm:$0x1] %vm375_vm0, %v2750_v29 }
 0x3df   : > { %v2752_v37 = vpop.permute.xlu1 %2751 }
 0x3e0   : > { %v2754_v17 = vpop.permute.xlu0 %2753  ;;  %2821 = vst.msk [vmem:[%s3026_s24 + $0x2f] sm:$0x1] %vm375_vm0, %v2752_v37 }
 0x3e1   : > { %2822 = vst.msk [vmem:[%s3026_s24 + $0x3f] sm:$0x1] %vm375_vm0, %v2754_v17 }
 0x3e3   : > { %v2756_v44 = vpop.permute.xlu1 %2755 }
 0x3e4   : > { %v2758_v20 = vpop.permute.xlu0 %2757  ;;  %2823 = vst.msk [vmem:[%s3026_s24 + $0x4f] sm:$0x1] %vm375_vm0, %v2756_v44 }
 0x3e5   : > { %2824 = vst.msk [vmem:[%s3026_s24 + $0x5f] sm:$0x1] %vm375_vm0, %v2758_v20 }
 0x3e7   : > { %v2760_v40 = vpop.permute.xlu1 %2759 }
 0x3e8   : > { %v2762_v62 = vpop.permute.xlu0 %2761  ;;  %2825 = vst.msk [vmem:[%s3026_s24 + $0x6f] sm:$0x1] %vm375_vm0, %v2760_v40 }
 0x3e9   : > { %2826 = vst.msk [vmem:[%s3026_s24 + $0x7f] sm:$0x1] %vm375_vm0, %v2762_v62 }
 0x3eb   : > { %v2764_v9 = vpop.permute.xlu1 %2763 }
 0x3ec   : > { %v2766_v41 = vpop.permute.xlu0 %2765  ;;  %2827 = vst.msk [vmem:[%s3026_s24 + $0x8f] sm:$0x1] %vm375_vm0, %v2764_v9 }
 0x3ed   : > { %2828 = vst.msk [vmem:[%s3026_s24 + $0x9f] sm:$0x1] %vm375_vm0, %v2766_v41 }
 0x3ef   : > { %v2768_v13 = vpop.permute.xlu1 %2767 }
 0x3f0   : > { %v2770_v7 = vpop.permute.xlu0 %2769  ;;  %2829 = vst.msk [vmem:[%s3026_s24 + $0xaf] sm:$0x1] %vm375_vm0, %v2768_v13 }
 0x3f1   : > { %2830 = vst.msk [vmem:[%s3026_s24 + $0xbf] sm:$0x1] %vm375_vm0, %v2770_v7 }
 0x3f3   : > { %v2772_v25 = vpop.permute.xlu1 %2771 }
 0x3f4   : > { %v2774_v14 = vpop.permute.xlu0 %2773  ;;  %2831 = vst.msk [vmem:[%s3026_s24 + $0xcf] sm:$0x1] %vm375_vm0, %v2772_v25 }
 0x3f5   : > { %2832 = vst.msk [vmem:[%s3026_s24 + $0xdf] sm:$0x1] %vm375_vm0, %v2774_v14 }
 0x3f7   : > { %v2776_v60 = vpop.permute.xlu1 %2775 }
 0x3f8   : > { %v2778_v8 = vpop.permute.xlu0 %2777  ;;  %2833 = vst.msk [vmem:[%s3026_s24 + $0xef] sm:$0x1] %vm375_vm0, %v2776_v60 }
 0x3f9   : > { %2834 = vst.msk [vmem:[%s3026_s24 + $0xff] sm:$0x1] %vm375_vm0, %v2778_v8 }
 0x3fb   : > { %v2780_v43 = vpop.permute.xlu1 %2779 }
 0x3fc   : > { %v2782_v51 = vpop.permute.xlu0 %2781  ;;  %2835 = vst.msk [vmem:[%s3026_s24 + $0x10f] sm:$0x1] %vm375_vm0, %v2780_v43 }
 0x3fd   : > { %2836 = vst.msk [vmem:[%s3026_s24 + $0x11f] sm:$0x1] %vm375_vm0, %v2782_v51 }
 0x3ff   : > { %v2784_v61 = vpop.permute.xlu1 %2783 }
 0x400   : > { %v2786_v52 = vpop.permute.xlu0 %2785  ;;  %2837 = vst.msk [vmem:[%s3026_s24 + $0x12f] sm:$0x1] %vm375_vm0, %v2784_v61 }
 0x401   : > { %2838 = vst.msk [vmem:[%s3026_s24 + $0x13f] sm:$0x1] %vm375_vm0, %v2786_v52 }
 0x403   : > { %v2788_v31 = vpop.permute.xlu1 %2787 }
 0x404   : > { %v2790_v48 = vpop.permute.xlu0 %2789  ;;  %2839 = vst.msk [vmem:[%s3026_s24 + $0x14f] sm:$0x1] %vm375_vm0, %v2788_v31 }
 0x405   : > { %2840 = vst.msk [vmem:[%s3026_s24 + $0x15f] sm:$0x1] %vm375_vm0, %v2790_v48 }
 0x407   : > { %v2792_v49 = vpop.permute.xlu1 %2791 }
 0x408   : > { %v2794_v54 = vpop.permute.xlu0 %2793  ;;  %2841 = vst.msk [vmem:[%s3026_s24 + $0x16f] sm:$0x1] %vm375_vm0, %v2792_v49 }
 0x409   : > { %2842 = vst.msk [vmem:[%s3026_s24 + $0x17f] sm:$0x1] %vm375_vm0, %v2794_v54 }
 0x40a PF: > { %s12_s9 = sadd.s32 1, %s2945_s9  }
 0x40b   : > { %p9_p4 = scmp.ge.s32.totalorder %s12_s9, 4  }
 0x40d   :  { %11 = sbr.rel (!%p9_p4) target bundleno = 1 (0x1), region = 58 }

</bundles_post_ra>
